<compile_context>
chip_gen: v6e
topology: v6e:2x2x1
jax: 0.10.0
libtpu: 0.0.40
codegen_flags: <defaults>
</compile_context>

<pallas_src>
import math
from functools import partial

import numpy as np
import jax
import jax.numpy as jnp
from jax import lax
from jax.experimental import pallas as pl
from jax.experimental.pallas import tpu as pltpu  # noqa: F401  (TPU backend)

# ---------------- configuration (small, consistent with the module) ----------
STATE_DIM = 16
ACTION_DIM = 4
SEQ_LEN = 8                      # T  -> transformer sequence length L = 3*T = 24
EMB_DIM = 32
HIDDEN_DIM = 64                  # != EMB_DIM so the emb2hid Linear is exercised
NUM_LAYERS = 2
NUM_HEADS = 4
HEAD_DIM = HIDDEN_DIM // NUM_HEADS
FF_DIM = 4 * HIDDEN_DIM
LN_EPS = 1e-5                    # nn.LayerNorm default
NEG_INF = -1e30

# ---------------- packed-operand layout (shared by host packer & kernel) ------
SQ_E2H = 0                                    # w_sq[0] = emb2hid (row-padded to H)
def _sq_idx(layer, which):                    # which: 0=Wq 1=Wk 2=Wv 3=Wo
    return 1 + 4 * layer + which

B64_E2H = 0                                   # b64[0] = emb2hid bias
def _b64_idx(layer, which):                   # 0=bq 1=bk 2=bv 3=bo 4=ln1g 5=ln1b 6=b2 7=ln2g 8=ln2b
    return 1 + 9 * layer + which

W_WIDE_HEAD = NUM_LAYERS                      # w_wide[l]=W1_l ; w_wide[NL]=padded action head
B256_HEAD = NUM_LAYERS                        # b256[l]=b1_l  ; b256[NL]=padded head bias


# ---------------- shared math helpers -----------------------------------------
def _layernorm(x, g, b):
    mu = jnp.mean(x, axis=-1, keepdims=True)
    var = jnp.mean((x - mu) ** 2, axis=-1, keepdims=True)
    return (x - mu) * lax.rsqrt(var + LN_EPS) * g + b


def _gelu_tanh(x):
    # tanh-approximation GELU: one EUP tanh, few VALU ops; |err| << test tolerance.
    c = jnp.float32(math.sqrt(2.0 / math.pi))
    return 0.5 * x * (1.0 + jnp.tanh(c * (x + 0.044715 * x * x * x)))


# ---------------- the fused Pallas kernel --------------------------------------
def _fused_dt_kernel(seq_ref, w_sq_ref, w_wide_ref, w_mlp2_ref, b64_ref, b256_ref,
                     out_ref, *, batch, timesteps):
    """Whole DT forward (post-embedding) for the full batch, no grid.

    seq_ref    : [B*L, H]            f32   embeddings+PE, lane-padded E->H, batch folded
    w_sq_ref   : [1+4*NL, H, H]      bf16  emb2hid(pad), per-layer Wq*scale, Wk, Wv, Wo
    w_wide_ref : [NL+1, H, 4H]       bf16  per-layer W1, then action head (lane-padded)
    w_mlp2_ref : [NL, 4H, H]         bf16  per-layer W2
    b64_ref    : [1+9*NL, 1, H]      f32   e2h_b, per-layer bq*scale,bk,bv,bo,ln1,b2,ln2
    b256_ref   : [NL+1, 1, 4H]       f32   per-layer b1, then padded head bias
    out_ref    : [B*T, 4H]           f32   action head output (lanes ACTION_DIM: padding)
    """
    f32, bf16 = jnp.float32, jnp.bfloat16
    H, HD, NH = HIDDEN_DIM, HEAD_DIM, NUM_HEADS
    L = 3 * timesteps
    BL = batch * L
    NHBL = NH * BL

    # ---- masks built in-kernel (iota + compares, no div/mod, no big inputs) ---
    ii = lax.broadcasted_iota(jnp.int32, (BL, BL), 0)
    jj = lax.broadcasted_iota(jnp.int32, (BL, BL), 1)
    bi = jnp.zeros_like(ii)
    bj = jnp.zeros_like(jj)
    for b in range(1, batch):                         # batch id without integer division
        bi = bi + jnp.where(ii >= b * L, 1, 0)
        bj = bj + jnp.where(jj >= b * L, 1, 0)
    allowed = (bi == bj) & (jj <= ii)                 # same-batch & causal
    base_mask = jnp.where(allowed, 0.0, NEG_INF).astype(f32)          # [BL, BL]
    smask = jnp.concatenate([base_mask] * NH, axis=0)                 # [NH*BL, BL]

    col = lax.broadcasted_iota(jnp.int32, (BL, H), 1)
    hmask = jnp.concatenate(                                          # [NH*BL, H] 0/1
        [jnp.where((col >= h * HD) & (col < (h + 1) * HD), 1.0, 0.0).astype(f32)
         for h in range(NH)], axis=0)

    # ---- emb2hid Linear (seq & weight zero-padded to H on the host) ----------
    x = (jnp.dot(seq_ref[...].astype(bf16), w_sq_ref[SQ_E2H],
                 preferred_element_type=f32) + b64_ref[B64_E2H])      # [BL, H]

    # ---- transformer blocks (postnorm, dropout = 0) ---------------------------
    for l in range(NUM_LAYERS):                        # static unroll over layers
        xb = x.astype(bf16)
        # three separate projections (no 64-lane-offset slices of a fused QKV)
        q = (jnp.dot(xb, w_sq_ref[_sq_idx(l, 0)], preferred_element_type=f32)
             + b64_ref[_b64_idx(l, 0)])                # scale pre-folded into Wq/bq
        k = (jnp.dot(xb, w_sq_ref[_sq_idx(l, 1)], preferred_element_type=f32)
             + b64_ref[_b64_idx(l, 1)])
        v = (jnp.dot(xb, w_sq_ref[_sq_idx(l, 2)], preferred_element_type=f32)
             + b64_ref[_b64_idx(l, 2)])

        # all heads in ONE MXU op: replicate Q per head, zero the non-head columns
        q_rep = (jnp.concatenate([q] * NH, axis=0) * hmask).astype(bf16)   # [NH*BL, H]
        s = lax.dot_general(q_rep, k.astype(bf16), (((1,), (1,)), ((), ())),
                            preferred_element_type=f32)                    # [NH*BL, BL]
        s = s + smask
        s = s - jnp.max(s, axis=-1, keepdims=True)
        p = jnp.exp(s)
        p = p * pl.reciprocal(jnp.sum(p, axis=-1, keepdims=True), approx=True)

        pv = jnp.dot(p.astype(bf16), v.astype(bf16), preferred_element_type=f32)  # [NH*BL, H]
        pv = pv * hmask                              # keep head-h columns on block h
        heads = pv[0:BL]
        for h in range(1, NH):                       # sum NH sublane blocks -> concat-of-heads
            heads = heads + pv[h * BL:(h + 1) * BL]  # [BL, H]
        attn = (jnp.dot(heads.astype(bf16), w_sq_ref[_sq_idx(l, 3)],
                        preferred_element_type=f32) + b64_ref[_b64_idx(l, 3)])

        x1 = _layernorm(x + attn, b64_ref[_b64_idx(l, 4)], b64_ref[_b64_idx(l, 5)])
        h1 = (jnp.dot(x1.astype(bf16), w_wide_ref[l], preferred_element_type=f32)
              + b256_ref[l])                                                  # [BL, 4H]
        h1 = _gelu_tanh(h1)
        h2 = (jnp.dot(h1.astype(bf16), w_mlp2_ref[l], preferred_element_type=f32)
              + b64_ref[_b64_idx(l, 6)])                                      # [BL, H]
        x = _layernorm(x1 + h2, b64_ref[_b64_idx(l, 7)], b64_ref[_b64_idx(l, 8)])

    # ---- state-token selection (seq[:, 0::3]) + action head -------------------
    # state token of output row m = b*T + t sits at folded row b*L + 3*t = 3*m.
    BT = batch * timesteps
    m = lax.broadcasted_iota(jnp.int32, (BT, BL), 0)
    r = lax.broadcasted_iota(jnp.int32, (BT, BL), 1)
    sel = jnp.where(r == 3 * m, 1.0, 0.0).astype(bf16)                       # [BT, BL]
    st = jnp.dot(sel, x.astype(bf16), preferred_element_type=f32)            # [BT, H]
    out_ref[...] = (jnp.dot(st.astype(bf16), w_wide_ref[W_WIDE_HEAD],
                            preferred_element_type=f32) + b256_ref[B256_HEAD])  # [BT, 4H]


def fused_forward_pallas(seq2d, kp, batch, timesteps):
    n_state = batch * timesteps
    kernel = partial(_fused_dt_kernel, batch=batch, timesteps=timesteps)
    out = pl.pallas_call(
        kernel,
        out_shape=jax.ShapeDtypeStruct((n_state, FF_DIM), jnp.float32),
    )(seq2d, kp["w_sq"], kp["w_wide"], kp["w_mlp2"], kp["b64"], kp["b256"])
    return out[:, :ACTION_DIM]                         # drop lane padding


# ---------------- kernel-input preparation (host-side packing) -----------------
def build_kernel_params(params):
    """Collapse all weights into 3 bf16 + 2 f32 operands; fold the q scale."""
    bf = jnp.bfloat16
    H, FF = HIDDEN_DIM, FF_DIM
    scale = 1.0 / math.sqrt(HEAD_DIM)
    blocks = params["blocks"]

    e2h_pad = jnp.zeros((H, H), jnp.float32).at[:EMB_DIM, :].set(params["emb2hid_w"])
    sq = [e2h_pad]
    for blk in blocks:
        sq += [blk["wq"] * scale, blk["wk"], blk["wv"], blk["wo"]]
    w_sq = jnp.stack(sq, axis=0).astype(bf)                              # [1+4L, H, H]

    head_w_pad = jnp.zeros((H, FF), jnp.float32).at[:, :ACTION_DIM].set(params["head_w"])
    w_wide = jnp.stack([blk["w1"] for blk in blocks] + [head_w_pad], axis=0).astype(bf)
    w_mlp2 = jnp.stack([blk["w2"] for blk in blocks], axis=0).astype(bf)

    v64 = [params["emb2hid_b"]]
    for blk in blocks:
        v64 += [blk["bq"] * scale, blk["bk"], blk["bv"], blk["bo"],
                blk["ln1g"], blk["ln1b"], blk["b2"], blk["ln2g"], blk["ln2b"]]
    b64 = jnp.stack(v64, axis=0)                                         # [1+9L, 1, H] f32

    head_b_pad = jnp.zeros((1, FF), jnp.float32).at[:, :ACTION_DIM].set(params["head_b"])
    b256 = jnp.stack([blk["b1"] for blk in blocks] + [head_b_pad], axis=0)  # [L+1, 1, FF] f32

    return {"w_sq": w_sq, "w_wide": w_wide, "w_mlp2": w_mlp2, "b64": b64, "b256": b256}


# ---------------- parameter setup (deterministic, synthetic) -------------------
def positional_encoding(emb_size, maxlen):
    den = jnp.exp(-jnp.arange(0, emb_size, 2, dtype=jnp.float32)
                  * math.log(10000.0) / emb_size)
    pos = jnp.arange(0, maxlen, dtype=jnp.float32).reshape(maxlen, 1)
    pe = jnp.zeros((maxlen, emb_size), jnp.float32)
    pe = pe.at[:, 0::2].set(jnp.sin(pos * den))
    pe = pe.at[:, 1::2].set(jnp.cos(pos * den))
    return pe                                         # [maxlen, E]


def _normal(key, shape, std=0.02):
    return std * jax.random.normal(key, shape, dtype=jnp.float32)


def init_params(key):
    # Biases / LN params get small random values (instead of torch's zero init)
    # so the bias paths are actually exercised by the self-check.
    keys = iter(jax.random.split(key, 128))
    H, FF = HIDDEN_DIM, FF_DIM
    p = {
        "state_emb": _normal(next(keys), (STATE_DIM, EMB_DIM)),
        "action_emb": _normal(next(keys), (ACTION_DIM, EMB_DIM)),
        "reward_emb": _normal(next(keys), (2, EMB_DIM)),
        "pos_emb": positional_encoding(EMB_DIM, 3 * SEQ_LEN),
        "emb2hid_w": _normal(next(keys), (EMB_DIM, H)),
        "emb2hid_b": _normal(next(keys), (1, H)),
        "head_w": _normal(next(keys), (H, ACTION_DIM)),
        "head_b": _normal(next(keys), (1, ACTION_DIM)),
    }
    blocks = []
    for _ in range(NUM_LAYERS):
        blocks.append({
            "wq": _normal(next(keys), (H, H)), "bq": _normal(next(keys), (1, H)),
            "wk": _normal(next(keys), (H, H)), "bk": _normal(next(keys), (1, H)),
            "wv": _normal(next(keys), (H, H)), "bv": _normal(next(keys), (1, H)),
            "wo": _normal(next(keys), (H, H)), "bo": _normal(next(keys), (1, H)),
            "ln1g": 1.0 + _normal(next(keys), (1, H)), "ln1b": _normal(next(keys), (1, H)),
            "w1": _normal(next(keys), (H, FF)), "b1": _normal(next(keys), (1, FF)),
            "w2": _normal(next(keys), (FF, H)), "b2": _normal(next(keys), (1, H)),
            "ln2g": 1.0 + _normal(next(keys), (1, H)), "ln2b": _normal(next(keys), (1, H)),
        })
    p["blocks"] = blocks
    return p


# ---------------- full forward (embedding glue in XLA, hot path fused in Pallas) -
def decision_transformer_forward(params, states, actions, rewards):
    B, T = states.shape
    L = 3 * T
    pe = params["pos_emb"][:T]                                   # [T, E]
    s_emb = params["state_emb"][states] + pe                     # [B, T, E]
    a_emb = params["action_emb"][actions] + pe
    r_emb = params["reward_emb"][rewards] + pe
    seq = jnp.stack([s_emb, a_emb, r_emb], axis=1)               # [B, 3, T, E]
    seq = jnp.transpose(seq, (0, 2, 1, 3)).reshape(B * L, EMB_DIM)
    seq = jnp.pad(seq, ((0, 0), (0, HIDDEN_DIM - EMB_DIM)))      # lane-pad E -> H

    kp = build_kernel_params(params)                             # constant-folded under jit
    act_out = fused_forward_pallas(seq, kp, B, T)                # [B*T, ACTION_DIM]
    return act_out.reshape(B, T, ACTION_DIM), None               # add_reward_head=False


# ---------------- pure-JAX f32 reference (for self-check) ----------------------
def _ref_block(x, blk):
    B, L, H = x.shape
    q = x @ blk["wq"] + blk["bq"]
    k = x @ blk["wk"] + blk["bk"]
    v = x @ blk["wv"] + blk["bv"]

    def heads(t):
        return jnp.transpose(t.reshape(B, L, NUM_HEADS, HEAD_DIM), (0, 2, 1, 3))

    qh, kh, vh = heads(q), heads(k), heads(v)
    s = jnp.einsum("bhqd,bhkd->bhqk", qh, kh) / math.sqrt(HEAD_DIM)
    causal = jnp.triu(jnp.ones((L, L), bool), 1)
    s = jnp.where(causal, NEG_INF, s)
    p = jax.nn.softmax(s, axis=-1)
    attn = jnp.einsum("bhqk,bhkd->bhqd", p, vh)
    attn = jnp.transpose(attn, (0, 2, 1, 3)).reshape(B, L, H) @ blk["wo"] + blk["bo"]
    x1 = _layernorm(x + attn, blk["ln1g"], blk["ln1b"])
    h = jax.nn.gelu(x1 @ blk["w1"] + blk["b1"], approximate=False) @ blk["w2"] + blk["b2"]
    return _layernorm(x1 + h, blk["ln2g"], blk["ln2b"])


def ref_forward(params, states, actions, rewards):
    B, T = states.shape
    pe = params["pos_emb"][:T]
    s_emb = params["state_emb"][states] + pe
    a_emb = params["action_emb"][actions] + pe
    r_emb = params["reward_emb"][rewards] + pe
    seq = jnp.transpose(jnp.stack([s_emb, a_emb, r_emb], axis=1),
                        (0, 2, 1, 3)).reshape(B, 3 * T, EMB_DIM)
    x = seq @ params["emb2hid_w"] + params["emb2hid_b"]
    for blk in params["blocks"]:
        x = _ref_block(x, blk)
    st = x[:, 0::3]
    return st @ params["head_w"] + params["head_b"], None


# ---------------- main ----------------------------------------------------------
if __name__ == "__main__":
    root = jax.random.PRNGKey(0)
    kparam, ks, ka, kr = jax.random.split(root, 4)
    params = init_params(kparam)

    B = 2
    states = jax.random.randint(ks, (B, SEQ_LEN), 0, STATE_DIM, dtype=jnp.int32)
    actions = jax.random.randint(ka, (B, SEQ_LEN), 0, ACTION_DIM, dtype=jnp.int32)
    rewards = jax.random.randint(kr, (B, SEQ_LEN), 0, 2, dtype=jnp.int32)

    fwd = jax.jit(partial(decision_transformer_forward, params))
    action_out, reward_out = fwd(states, actions, rewards)
    action_out = jax.block_until_ready(action_out)

    ref_out, _ = ref_forward(params, states, actions, rewards)
    assert action_out.shape == (B, SEQ_LEN, ACTION_DIM)
    assert reward_out is None
    np.testing.assert_allclose(np.asarray(action_out), np.asarray(ref_out),
                               rtol=2e-2, atol=2e-2)
    print("KERNEL_OK")
</pallas_src>

<mosaic_0001>
module attributes {stable_mosaic.version = 11 : i64} {
  func.func @_fused_dt_kernel(%arg0: memref<48x64xf32, #tpu.memory_space<vmem>>, %arg1: memref<9x64x64xbf16, #tpu.memory_space<vmem>>, %arg2: memref<3x64x256xbf16, #tpu.memory_space<vmem>>, %arg3: memref<2x256x64xbf16, #tpu.memory_space<vmem>>, %arg4: memref<19x1x64xf32, #tpu.memory_space<vmem>>, %arg5: memref<3x1x256xf32, #tpu.memory_space<vmem>>, %arg6: memref<16x256xf32, #tpu.memory_space<vmem>>) attributes {dimension_semantics = [], scalar_prefetch = 0 : i64, scratch_operands = 0 : i64, tpu.core_type = #tpu.core_type<tc>} {
    %0 = tpu.iota {dimensions = array<i32: 0>} : vector<48x48xi32>
    %1 = tpu.iota {dimensions = array<i32: 1>} : vector<48x48xi32>
    %c0_i32 = arith.constant 0 : i32
    %2 = vector.broadcast %c0_i32 : i32 to vector<48x48xi32>
    %c0_i32_0 = arith.constant 0 : i32
    %3 = vector.broadcast %c0_i32_0 : i32 to vector<48x48xi32>
    %c24_i32 = arith.constant 24 : i32
    %4 = vector.broadcast %c24_i32 : i32 to vector<48x48xi32>
    %5 = arith.cmpi sge, %0, %4 : vector<48x48xi32>
    %c1_i32 = arith.constant 1 : i32
    %c0_i32_1 = arith.constant 0 : i32
    %6 = vector.broadcast %c1_i32 : i32 to vector<48x48xi32>
    %7 = vector.broadcast %c0_i32_1 : i32 to vector<48x48xi32>
    %8 = arith.select %5, %6, %7 : vector<48x48xi1>, vector<48x48xi32>
    %9 = arith.addi %2, %8 : vector<48x48xi32>
    %c24_i32_2 = arith.constant 24 : i32
    %10 = vector.broadcast %c24_i32_2 : i32 to vector<48x48xi32>
    %11 = arith.cmpi sge, %1, %10 : vector<48x48xi32>
    %c1_i32_3 = arith.constant 1 : i32
    %c0_i32_4 = arith.constant 0 : i32
    %12 = vector.broadcast %c1_i32_3 : i32 to vector<48x48xi32>
    %13 = vector.broadcast %c0_i32_4 : i32 to vector<48x48xi32>
    %14 = arith.select %11, %12, %13 : vector<48x48xi1>, vector<48x48xi32>
    %15 = arith.addi %3, %14 : vector<48x48xi32>
    %16 = arith.cmpi eq, %9, %15 : vector<48x48xi32>
    %17 = arith.cmpi sle, %1, %0 : vector<48x48xi32>
    %18 = arith.andi %16, %17 : vector<48x48xi1>
    %cst = arith.constant 0.000000e+00 : f32
    %cst_5 = arith.constant -1.000000e+30 : f32
    %19 = vector.broadcast %cst : f32 to vector<48x48xf32>
    %20 = vector.broadcast %cst_5 : f32 to vector<48x48xf32>
    %21 = arith.select %18, %19, %20 : vector<48x48xi1>, vector<48x48xf32>
    %22 = tpu.concatenate %21, %21, %21, %21 in 0 : vector<48x48xf32>, vector<48x48xf32>, vector<48x48xf32>, vector<48x48xf32> -> vector<192x48xf32>
    %23 = tpu.iota {dimensions = array<i32: 1>} : vector<48x64xi32>
    %c0_i32_6 = arith.constant 0 : i32
    %24 = vector.broadcast %c0_i32_6 : i32 to vector<48x64xi32>
    %25 = arith.cmpi sge, %23, %24 : vector<48x64xi32>
    %c16_i32 = arith.constant 16 : i32
    %26 = vector.broadcast %c16_i32 : i32 to vector<48x64xi32>
    %27 = arith.cmpi slt, %23, %26 : vector<48x64xi32>
    %28 = arith.andi %25, %27 : vector<48x64xi1>
    %cst_7 = arith.constant 1.000000e+00 : f32
    %cst_8 = arith.constant 0.000000e+00 : f32
    %29 = vector.broadcast %cst_7 : f32 to vector<48x64xf32>
    %30 = vector.broadcast %cst_8 : f32 to vector<48x64xf32>
    %31 = arith.select %28, %29, %30 : vector<48x64xi1>, vector<48x64xf32>
    %c16_i32_9 = arith.constant 16 : i32
    %32 = vector.broadcast %c16_i32_9 : i32 to vector<48x64xi32>
    %33 = arith.cmpi sge, %23, %32 : vector<48x64xi32>
    %c32_i32 = arith.constant 32 : i32
    %34 = vector.broadcast %c32_i32 : i32 to vector<48x64xi32>
    %35 = arith.cmpi slt, %23, %34 : vector<48x64xi32>
    %36 = arith.andi %33, %35 : vector<48x64xi1>
    %cst_10 = arith.constant 1.000000e+00 : f32
    %cst_11 = arith.constant 0.000000e+00 : f32
    %37 = vector.broadcast %cst_10 : f32 to vector<48x64xf32>
    %38 = vector.broadcast %cst_11 : f32 to vector<48x64xf32>
    %39 = arith.select %36, %37, %38 : vector<48x64xi1>, vector<48x64xf32>
    %c32_i32_12 = arith.constant 32 : i32
    %40 = vector.broadcast %c32_i32_12 : i32 to vector<48x64xi32>
    %41 = arith.cmpi sge, %23, %40 : vector<48x64xi32>
    %c48_i32 = arith.constant 48 : i32
    %42 = vector.broadcast %c48_i32 : i32 to vector<48x64xi32>
    %43 = arith.cmpi slt, %23, %42 : vector<48x64xi32>
    %44 = arith.andi %41, %43 : vector<48x64xi1>
    %cst_13 = arith.constant 1.000000e+00 : f32
    %cst_14 = arith.constant 0.000000e+00 : f32
    %45 = vector.broadcast %cst_13 : f32 to vector<48x64xf32>
    %46 = vector.broadcast %cst_14 : f32 to vector<48x64xf32>
    %47 = arith.select %44, %45, %46 : vector<48x64xi1>, vector<48x64xf32>
    %c48_i32_15 = arith.constant 48 : i32
    %48 = vector.broadcast %c48_i32_15 : i32 to vector<48x64xi32>
    %49 = arith.cmpi sge, %23, %48 : vector<48x64xi32>
    %c64_i32 = arith.constant 64 : i32
    %50 = vector.broadcast %c64_i32 : i32 to vector<48x64xi32>
    %51 = arith.cmpi slt, %23, %50 : vector<48x64xi32>
    %52 = arith.andi %49, %51 : vector<48x64xi1>
    %cst_16 = arith.constant 1.000000e+00 : f32
    %cst_17 = arith.constant 0.000000e+00 : f32
    %53 = vector.broadcast %cst_16 : f32 to vector<48x64xf32>
    %54 = vector.broadcast %cst_17 : f32 to vector<48x64xf32>
    %55 = arith.select %52, %53, %54 : vector<48x64xi1>, vector<48x64xf32>
    %56 = tpu.concatenate %31, %39, %47, %55 in 0 : vector<48x64xf32>, vector<48x64xf32>, vector<48x64xf32>, vector<48x64xf32> -> vector<192x64xf32>
    %c0 = arith.constant 0 : index
    %c0_18 = arith.constant 0 : index
    %57 = vector.load %arg0[%c0, %c0_18] : memref<48x64xf32, #tpu.memory_space<vmem>>, vector<48x64xf32>
    %58 = arith.truncf %57 : vector<48x64xf32> to vector<48x64xbf16>
    %c0_19 = arith.constant 0 : index
    %c0_20 = arith.constant 0 : index
    %c0_21 = arith.constant 0 : index
    %59 = vector.load %arg1[%c0_19, %c0_20, %c0_21] : memref<9x64x64xbf16, #tpu.memory_space<vmem>>, vector<1x64x64xbf16>
    %60 = vector.shape_cast %59 : vector<1x64x64xbf16> to vector<64x64xbf16>
    %cst_22 = arith.constant dense<0.000000e+00> : vector<48x64xf32>
    %61 = tpu.matmul %58, %60, %cst_22 {dimension_numbers = #tpu.dot_dimension_numbers<[1], [0], [0], [1], [0, 0, 1, 1], [], []>} : vector<48x64xbf16>, vector<64x64xbf16>, vector<48x64xf32> -> vector<48x64xf32>
    %c0_23 = arith.constant 0 : index
    %c0_24 = arith.constant 0 : index
    %c0_25 = arith.constant 0 : index
    %62 = vector.load %arg4[%c0_23, %c0_24, %c0_25] : memref<19x1x64xf32, #tpu.memory_space<vmem>>, vector<1x1x64xf32>
    %63 = vector.shape_cast %62 : vector<1x1x64xf32> to vector<1x64xf32>
    %64 = vector.broadcast %63 : vector<1x64xf32> to vector<48x64xf32>
    %65 = arith.addf %61, %64 : vector<48x64xf32>
    %66 = arith.truncf %65 : vector<48x64xf32> to vector<48x64xbf16>
    %c1 = arith.constant 1 : index
    %c0_26 = arith.constant 0 : index
    %c0_27 = arith.constant 0 : index
    %67 = vector.load %arg1[%c1, %c0_26, %c0_27] : memref<9x64x64xbf16, #tpu.memory_space<vmem>>, vector<1x64x64xbf16>
    %68 = vector.shape_cast %67 : vector<1x64x64xbf16> to vector<64x64xbf16>
    %cst_28 = arith.constant dense<0.000000e+00> : vector<48x64xf32>
    %69 = tpu.matmul %66, %68, %cst_28 {dimension_numbers = #tpu.dot_dimension_numbers<[1], [0], [0], [1], [0, 0, 1, 1], [], []>} : vector<48x64xbf16>, vector<64x64xbf16>, vector<48x64xf32> -> vector<48x64xf32>
    %c1_29 = arith.constant 1 : index
    %c0_30 = arith.constant 0 : index
    %c0_31 = arith.constant 0 : index
    %70 = vector.load %arg4[%c1_29, %c0_30, %c0_31] : memref<19x1x64xf32, #tpu.memory_space<vmem>>, vector<1x1x64xf32>
    %71 = vector.shape_cast %70 : vector<1x1x64xf32> to vector<1x64xf32>
    %72 = vector.broadcast %71 : vector<1x64xf32> to vector<48x64xf32>
    %73 = arith.addf %69, %72 : vector<48x64xf32>
    %c2 = arith.constant 2 : index
    %c0_32 = arith.constant 0 : index
    %c0_33 = arith.constant 0 : index
    %74 = vector.load %arg1[%c2, %c0_32, %c0_33] : memref<9x64x64xbf16, #tpu.memory_space<vmem>>, vector<1x64x64xbf16>
    %75 = vector.shape_cast %74 : vector<1x64x64xbf16> to vector<64x64xbf16>
    %cst_34 = arith.constant dense<0.000000e+00> : vector<48x64xf32>
    %76 = tpu.matmul %66, %75, %cst_34 {dimension_numbers = #tpu.dot_dimension_numbers<[1], [0], [0], [1], [0, 0, 1, 1], [], []>} : vector<48x64xbf16>, vector<64x64xbf16>, vector<48x64xf32> -> vector<48x64xf32>
    %c2_35 = arith.constant 2 : index
    %c0_36 = arith.constant 0 : index
    %c0_37 = arith.constant 0 : index
    %77 = vector.load %arg4[%c2_35, %c0_36, %c0_37] : memref<19x1x64xf32, #tpu.memory_space<vmem>>, vector<1x1x64xf32>
    %78 = vector.shape_cast %77 : vector<1x1x64xf32> to vector<1x64xf32>
    %79 = vector.broadcast %78 : vector<1x64xf32> to vector<48x64xf32>
    %80 = arith.addf %76, %79 : vector<48x64xf32>
    %c3 = arith.constant 3 : index
    %c0_38 = arith.constant 0 : index
    %c0_39 = arith.constant 0 : index
    %81 = vector.load %arg1[%c3, %c0_38, %c0_39] : memref<9x64x64xbf16, #tpu.memory_space<vmem>>, vector<1x64x64xbf16>
    %82 = vector.shape_cast %81 : vector<1x64x64xbf16> to vector<64x64xbf16>
    %cst_40 = arith.constant dense<0.000000e+00> : vector<48x64xf32>
    %83 = tpu.matmul %66, %82, %cst_40 {dimension_numbers = #tpu.dot_dimension_numbers<[1], [0], [0], [1], [0, 0, 1, 1], [], []>} : vector<48x64xbf16>, vector<64x64xbf16>, vector<48x64xf32> -> vector<48x64xf32>
    %c3_41 = arith.constant 3 : index
    %c0_42 = arith.constant 0 : index
    %c0_43 = arith.constant 0 : index
    %84 = vector.load %arg4[%c3_41, %c0_42, %c0_43] : memref<19x1x64xf32, #tpu.memory_space<vmem>>, vector<1x1x64xf32>
    %85 = vector.shape_cast %84 : vector<1x1x64xf32> to vector<1x64xf32>
    %86 = vector.broadcast %85 : vector<1x64xf32> to vector<48x64xf32>
    %87 = arith.addf %83, %86 : vector<48x64xf32>
    %88 = tpu.concatenate %73, %73, %73, %73 in 0 : vector<48x64xf32>, vector<48x64xf32>, vector<48x64xf32>, vector<48x64xf32> -> vector<192x64xf32>
    %89 = arith.mulf %88, %56 : vector<192x64xf32>
    %90 = arith.truncf %89 : vector<192x64xf32> to vector<192x64xbf16>
    %91 = arith.truncf %80 : vector<48x64xf32> to vector<48x64xbf16>
    %cst_44 = arith.constant dense<0.000000e+00> : vector<192x48xf32>
    %92 = tpu.matmul %90, %91, %cst_44 {dimension_numbers = #tpu.dot_dimension_numbers<[1], [1], [0], [0], [0, 0, 1, 0], [], []>} : vector<192x64xbf16>, vector<48x64xbf16>, vector<192x48xf32> -> vector<192x48xf32>
    %93 = arith.addf %92, %22 : vector<192x48xf32>
    %cst_45 = arith.constant dense<0xFF800000> : vector<192xf32>
    %94 = vector.multi_reduction <maximumf>, %93, %cst_45 [1] : vector<192x48xf32> to vector<192xf32>
    %95 = vector.shape_cast %94 : vector<192xf32> to vector<192x1xf32>
    %96 = vector.broadcast %95 : vector<192x1xf32> to vector<192x48xf32>
    %97 = arith.subf %93, %96 : vector<192x48xf32>
    %98 = math.exp %97 : vector<192x48xf32>
    %cst_46 = arith.constant dense<0.000000e+00> : vector<192xf32>
    %99 = vector.multi_reduction <add>, %98, %cst_46 [1] : vector<192x48xf32> to vector<192xf32>
    %100 = vector.shape_cast %99 : vector<192xf32> to vector<192x1xf32>
    %101 = tpu.reciprocal %100 {approx = true} : vector<192x1xf32> -> vector<192x1xf32>
    %102 = vector.broadcast %101 : vector<192x1xf32> to vector<192x48xf32>
    %103 = arith.mulf %98, %102 : vector<192x48xf32>
    %104 = arith.truncf %103 : vector<192x48xf32> to vector<192x48xbf16>
    %105 = arith.truncf %87 : vector<48x64xf32> to vector<48x64xbf16>
    %cst_47 = arith.constant dense<0.000000e+00> : vector<192x64xf32>
    %106 = tpu.matmul %104, %105, %cst_47 {dimension_numbers = #tpu.dot_dimension_numbers<[1], [0], [0], [1], [0, 0, 1, 1], [], []>} : vector<192x48xbf16>, vector<48x64xbf16>, vector<192x64xf32> -> vector<192x64xf32>
    %107 = arith.mulf %106, %56 : vector<192x64xf32>
    %108 = vector.extract_strided_slice %107 {offsets = [0, 0], sizes = [48, 64], strides = [1, 1]} : vector<192x64xf32> to vector<48x64xf32>
    %109 = vector.extract_strided_slice %107 {offsets = [48, 0], sizes = [48, 64], strides = [1, 1]} : vector<192x64xf32> to vector<48x64xf32>
    %110 = arith.addf %108, %109 : vector<48x64xf32>
    %111 = vector.extract_strided_slice %107 {offsets = [96, 0], sizes = [48, 64], strides = [1, 1]} : vector<192x64xf32> to vector<48x64xf32>
    %112 = arith.addf %110, %111 : vector<48x64xf32>
    %113 = vector.extract_strided_slice %107 {offsets = [144, 0], sizes = [48, 64], strides = [1, 1]} : vector<192x64xf32> to vector<48x64xf32>
    %114 = arith.addf %112, %113 : vector<48x64xf32>
    %115 = arith.truncf %114 : vector<48x64xf32> to vector<48x64xbf16>
    %c4 = arith.constant 4 : index
    %c0_48 = arith.constant 0 : index
    %c0_49 = arith.constant 0 : index
    %116 = vector.load %arg1[%c4, %c0_48, %c0_49] : memref<9x64x64xbf16, #tpu.memory_space<vmem>>, vector<1x64x64xbf16>
    %117 = vector.shape_cast %116 : vector<1x64x64xbf16> to vector<64x64xbf16>
    %cst_50 = arith.constant dense<0.000000e+00> : vector<48x64xf32>
    %118 = tpu.matmul %115, %117, %cst_50 {dimension_numbers = #tpu.dot_dimension_numbers<[1], [0], [0], [1], [0, 0, 1, 1], [], []>} : vector<48x64xbf16>, vector<64x64xbf16>, vector<48x64xf32> -> vector<48x64xf32>
    %c4_51 = arith.constant 4 : index
    %c0_52 = arith.constant 0 : index
    %c0_53 = arith.constant 0 : index
    %119 = vector.load %arg4[%c4_51, %c0_52, %c0_53] : memref<19x1x64xf32, #tpu.memory_space<vmem>>, vector<1x1x64xf32>
    %120 = vector.shape_cast %119 : vector<1x1x64xf32> to vector<1x64xf32>
    %121 = vector.broadcast %120 : vector<1x64xf32> to vector<48x64xf32>
    %122 = arith.addf %118, %121 : vector<48x64xf32>
    %123 = arith.addf %65, %122 : vector<48x64xf32>
    %c5 = arith.constant 5 : index
    %c0_54 = arith.constant 0 : index
    %c0_55 = arith.constant 0 : index
    %124 = vector.load %arg4[%c5, %c0_54, %c0_55] : memref<19x1x64xf32, #tpu.memory_space<vmem>>, vector<1x1x64xf32>
    %125 = vector.shape_cast %124 : vector<1x1x64xf32> to vector<1x64xf32>
    %c6 = arith.constant 6 : index
    %c0_56 = arith.constant 0 : index
    %c0_57 = arith.constant 0 : index
    %126 = vector.load %arg4[%c6, %c0_56, %c0_57] : memref<19x1x64xf32, #tpu.memory_space<vmem>>, vector<1x1x64xf32>
    %127 = vector.shape_cast %126 : vector<1x1x64xf32> to vector<1x64xf32>
    %cst_58 = arith.constant dense<0.000000e+00> : vector<48xf32>
    %128 = vector.multi_reduction <add>, %123, %cst_58 [1] : vector<48x64xf32> to vector<48xf32>
    %129 = vector.shape_cast %128 : vector<48xf32> to vector<48x1xf32>
    %cst_59 = arith.constant 6.400000e+01 : f32
    %130 = vector.broadcast %cst_59 : f32 to vector<48x1xf32>
    %131 = arith.divf %129, %130 : vector<48x1xf32>
    %132 = vector.broadcast %131 : vector<48x1xf32> to vector<48x64xf32>
    %133 = arith.subf %123, %132 : vector<48x64xf32>
    %134 = arith.mulf %133, %133 : vector<48x64xf32>
    %cst_60 = arith.constant dense<0.000000e+00> : vector<48xf32>
    %135 = vector.multi_reduction <add>, %134, %cst_60 [1] : vector<48x64xf32> to vector<48xf32>
    %136 = vector.shape_cast %135 : vector<48xf32> to vector<48x1xf32>
    %cst_61 = arith.constant 6.400000e+01 : f32
    %137 = vector.broadcast %cst_61 : f32 to vector<48x1xf32>
    %138 = arith.divf %136, %137 : vector<48x1xf32>
    %139 = vector.broadcast %131 : vector<48x1xf32> to vector<48x64xf32>
    %140 = arith.subf %123, %139 : vector<48x64xf32>
    %cst_62 = arith.constant 9.99999974E-6 : f32
    %141 = vector.broadcast %cst_62 : f32 to vector<48x1xf32>
    %142 = arith.addf %138, %141 : vector<48x1xf32>
    %143 = math.rsqrt %142 : vector<48x1xf32>
    %144 = vector.broadcast %143 : vector<48x1xf32> to vector<48x64xf32>
    %145 = arith.mulf %140, %144 : vector<48x64xf32>
    %146 = vector.broadcast %125 : vector<1x64xf32> to vector<48x64xf32>
    %147 = arith.mulf %145, %146 : vector<48x64xf32>
    %148 = vector.broadcast %127 : vector<1x64xf32> to vector<48x64xf32>
    %149 = arith.addf %147, %148 : vector<48x64xf32>
    %150 = arith.truncf %149 : vector<48x64xf32> to vector<48x64xbf16>
    %c0_63 = arith.constant 0 : index
    %c0_64 = arith.constant 0 : index
    %c0_65 = arith.constant 0 : index
    %151 = vector.load %arg2[%c0_63, %c0_64, %c0_65] : memref<3x64x256xbf16, #tpu.memory_space<vmem>>, vector<1x64x256xbf16>
    %152 = vector.shape_cast %151 : vector<1x64x256xbf16> to vector<64x256xbf16>
    %cst_66 = arith.constant dense<0.000000e+00> : vector<48x256xf32>
    %153 = tpu.matmul %150, %152, %cst_66 {dimension_numbers = #tpu.dot_dimension_numbers<[1], [0], [0], [1], [0, 0, 1, 1], [], []>} : vector<48x64xbf16>, vector<64x256xbf16>, vector<48x256xf32> -> vector<48x256xf32>
    %c0_67 = arith.constant 0 : index
    %c0_68 = arith.constant 0 : index
    %c0_69 = arith.constant 0 : index
    %154 = vector.load %arg5[%c0_67, %c0_68, %c0_69] : memref<3x1x256xf32, #tpu.memory_space<vmem>>, vector<1x1x256xf32>
    %155 = vector.shape_cast %154 : vector<1x1x256xf32> to vector<1x256xf32>
    %156 = vector.broadcast %155 : vector<1x256xf32> to vector<48x256xf32>
    %157 = arith.addf %153, %156 : vector<48x256xf32>
    %cst_70 = arith.constant 5.000000e-01 : f32
    %158 = vector.broadcast %cst_70 : f32 to vector<48x256xf32>
    %159 = arith.mulf %158, %157 : vector<48x256xf32>
    %cst_71 = arith.constant 4.471500e-02 : f32
    %160 = vector.broadcast %cst_71 : f32 to vector<48x256xf32>
    %161 = arith.mulf %160, %157 : vector<48x256xf32>
    %162 = arith.mulf %161, %157 : vector<48x256xf32>
    %163 = arith.mulf %162, %157 : vector<48x256xf32>
    %164 = arith.addf %157, %163 : vector<48x256xf32>
    %cst_72 = arith.constant 0.797884583 : f32
    %165 = vector.broadcast %cst_72 : f32 to vector<48x256xf32>
    %166 = arith.mulf %165, %164 : vector<48x256xf32>
    %167 = math.tanh %166 : vector<48x256xf32>
    %cst_73 = arith.constant 1.000000e+00 : f32
    %168 = vector.broadcast %cst_73 : f32 to vector<48x256xf32>
    %169 = arith.addf %168, %167 : vector<48x256xf32>
    %170 = arith.mulf %159, %169 : vector<48x256xf32>
    %171 = arith.truncf %170 : vector<48x256xf32> to vector<48x256xbf16>
    %c0_74 = arith.constant 0 : index
    %c0_75 = arith.constant 0 : index
    %c0_76 = arith.constant 0 : index
    %172 = vector.load %arg3[%c0_74, %c0_75, %c0_76] : memref<2x256x64xbf16, #tpu.memory_space<vmem>>, vector<1x256x64xbf16>
    %173 = vector.shape_cast %172 : vector<1x256x64xbf16> to vector<256x64xbf16>
    %cst_77 = arith.constant dense<0.000000e+00> : vector<48x64xf32>
    %174 = tpu.matmul %171, %173, %cst_77 {dimension_numbers = #tpu.dot_dimension_numbers<[1], [0], [0], [1], [0, 0, 1, 1], [], []>} : vector<48x256xbf16>, vector<256x64xbf16>, vector<48x64xf32> -> vector<48x64xf32>
    %c7 = arith.constant 7 : index
    %c0_78 = arith.constant 0 : index
    %c0_79 = arith.constant 0 : index
    %175 = vector.load %arg4[%c7, %c0_78, %c0_79] : memref<19x1x64xf32, #tpu.memory_space<vmem>>, vector<1x1x64xf32>
    %176 = vector.shape_cast %175 : vector<1x1x64xf32> to vector<1x64xf32>
    %177 = vector.broadcast %176 : vector<1x64xf32> to vector<48x64xf32>
    %178 = arith.addf %174, %177 : vector<48x64xf32>
    %179 = arith.addf %149, %178 : vector<48x64xf32>
    %c8 = arith.constant 8 : index
    %c0_80 = arith.constant 0 : index
    %c0_81 = arith.constant 0 : index
    %180 = vector.load %arg4[%c8, %c0_80, %c0_81] : memref<19x1x64xf32, #tpu.memory_space<vmem>>, vector<1x1x64xf32>
    %181 = vector.shape_cast %180 : vector<1x1x64xf32> to vector<1x64xf32>
    %c9 = arith.constant 9 : index
    %c0_82 = arith.constant 0 : index
    %c0_83 = arith.constant 0 : index
    %182 = vector.load %arg4[%c9, %c0_82, %c0_83] : memref<19x1x64xf32, #tpu.memory_space<vmem>>, vector<1x1x64xf32>
    %183 = vector.shape_cast %182 : vector<1x1x64xf32> to vector<1x64xf32>
    %cst_84 = arith.constant dense<0.000000e+00> : vector<48xf32>
    %184 = vector.multi_reduction <add>, %179, %cst_84 [1] : vector<48x64xf32> to vector<48xf32>
    %185 = vector.shape_cast %184 : vector<48xf32> to vector<48x1xf32>
    %cst_85 = arith.constant 6.400000e+01 : f32
    %186 = vector.broadcast %cst_85 : f32 to vector<48x1xf32>
    %187 = arith.divf %185, %186 : vector<48x1xf32>
    %188 = vector.broadcast %187 : vector<48x1xf32> to vector<48x64xf32>
    %189 = arith.subf %179, %188 : vector<48x64xf32>
    %190 = arith.mulf %189, %189 : vector<48x64xf32>
    %cst_86 = arith.constant dense<0.000000e+00> : vector<48xf32>
    %191 = vector.multi_reduction <add>, %190, %cst_86 [1] : vector<48x64xf32> to vector<48xf32>
    %192 = vector.shape_cast %191 : vector<48xf32> to vector<48x1xf32>
    %cst_87 = arith.constant 6.400000e+01 : f32
    %193 = vector.broadcast %cst_87 : f32 to vector<48x1xf32>
    %194 = arith.divf %192, %193 : vector<48x1xf32>
    %195 = vector.broadcast %187 : vector<48x1xf32> to vector<48x64xf32>
    %196 = arith.subf %179, %195 : vector<48x64xf32>
    %cst_88 = arith.constant 9.99999974E-6 : f32
    %197 = vector.broadcast %cst_88 : f32 to vector<48x1xf32>
    %198 = arith.addf %194, %197 : vector<48x1xf32>
    %199 = math.rsqrt %198 : vector<48x1xf32>
    %200 = vector.broadcast %199 : vector<48x1xf32> to vector<48x64xf32>
    %201 = arith.mulf %196, %200 : vector<48x64xf32>
    %202 = vector.broadcast %181 : vector<1x64xf32> to vector<48x64xf32>
    %203 = arith.mulf %201, %202 : vector<48x64xf32>
    %204 = vector.broadcast %183 : vector<1x64xf32> to vector<48x64xf32>
    %205 = arith.addf %203, %204 : vector<48x64xf32>
    %206 = arith.truncf %205 : vector<48x64xf32> to vector<48x64xbf16>
    %c5_89 = arith.constant 5 : index
    %c0_90 = arith.constant 0 : index
    %c0_91 = arith.constant 0 : index
    %207 = vector.load %arg1[%c5_89, %c0_90, %c0_91] : memref<9x64x64xbf16, #tpu.memory_space<vmem>>, vector<1x64x64xbf16>
    %208 = vector.shape_cast %207 : vector<1x64x64xbf16> to vector<64x64xbf16>
    %cst_92 = arith.constant dense<0.000000e+00> : vector<48x64xf32>
    %209 = tpu.matmul %206, %208, %cst_92 {dimension_numbers = #tpu.dot_dimension_numbers<[1], [0], [0], [1], [0, 0, 1, 1], [], []>} : vector<48x64xbf16>, vector<64x64xbf16>, vector<48x64xf32> -> vector<48x64xf32>
    %c10 = arith.constant 10 : index
    %c0_93 = arith.constant 0 : index
    %c0_94 = arith.constant 0 : index
    %210 = vector.load %arg4[%c10, %c0_93, %c0_94] : memref<19x1x64xf32, #tpu.memory_space<vmem>>, vector<1x1x64xf32>
    %211 = vector.shape_cast %210 : vector<1x1x64xf32> to vector<1x64xf32>
    %212 = vector.broadcast %211 : vector<1x64xf32> to vector<48x64xf32>
    %213 = arith.addf %209, %212 : vector<48x64xf32>
    %c6_95 = arith.constant 6 : index
    %c0_96 = arith.constant 0 : index
    %c0_97 = arith.constant 0 : index
    %214 = vector.load %arg1[%c6_95, %c0_96, %c0_97] : memref<9x64x64xbf16, #tpu.memory_space<vmem>>, vector<1x64x64xbf16>
    %215 = vector.shape_cast %214 : vector<1x64x64xbf16> to vector<64x64xbf16>
    %cst_98 = arith.constant dense<0.000000e+00> : vector<48x64xf32>
    %216 = tpu.matmul %206, %215, %cst_98 {dimension_numbers = #tpu.dot_dimension_numbers<[1], [0], [0], [1], [0, 0, 1, 1], [], []>} : vector<48x64xbf16>, vector<64x64xbf16>, vector<48x64xf32> -> vector<48x64xf32>
    %c11 = arith.constant 11 : index
    %c0_99 = arith.constant 0 : index
    %c0_100 = arith.constant 0 : index
    %217 = vector.load %arg4[%c11, %c0_99, %c0_100] : memref<19x1x64xf32, #tpu.memory_space<vmem>>, vector<1x1x64xf32>
    %218 = vector.shape_cast %217 : vector<1x1x64xf32> to vector<1x64xf32>
    %219 = vector.broadcast %218 : vector<1x64xf32> to vector<48x64xf32>
    %220 = arith.addf %216, %219 : vector<48x64xf32>
    %c7_101 = arith.constant 7 : index
    %c0_102 = arith.constant 0 : index
    %c0_103 = arith.constant 0 : index
    %221 = vector.load %arg1[%c7_101, %c0_102, %c0_103] : memref<9x64x64xbf16, #tpu.memory_space<vmem>>, vector<1x64x64xbf16>
    %222 = vector.shape_cast %221 : vector<1x64x64xbf16> to vector<64x64xbf16>
    %cst_104 = arith.constant dense<0.000000e+00> : vector<48x64xf32>
    %223 = tpu.matmul %206, %222, %cst_104 {dimension_numbers = #tpu.dot_dimension_numbers<[1], [0], [0], [1], [0, 0, 1, 1], [], []>} : vector<48x64xbf16>, vector<64x64xbf16>, vector<48x64xf32> -> vector<48x64xf32>
    %c12 = arith.constant 12 : index
    %c0_105 = arith.constant 0 : index
    %c0_106 = arith.constant 0 : index
    %224 = vector.load %arg4[%c12, %c0_105, %c0_106] : memref<19x1x64xf32, #tpu.memory_space<vmem>>, vector<1x1x64xf32>
    %225 = vector.shape_cast %224 : vector<1x1x64xf32> to vector<1x64xf32>
    %226 = vector.broadcast %225 : vector<1x64xf32> to vector<48x64xf32>
    %227 = arith.addf %223, %226 : vector<48x64xf32>
    %228 = tpu.concatenate %213, %213, %213, %213 in 0 : vector<48x64xf32>, vector<48x64xf32>, vector<48x64xf32>, vector<48x64xf32> -> vector<192x64xf32>
    %229 = arith.mulf %228, %56 : vector<192x64xf32>
    %230 = arith.truncf %229 : vector<192x64xf32> to vector<192x64xbf16>
    %231 = arith.truncf %220 : vector<48x64xf32> to vector<48x64xbf16>
    %cst_107 = arith.constant dense<0.000000e+00> : vector<192x48xf32>
    %232 = tpu.matmul %230, %231, %cst_107 {dimension_numbers = #tpu.dot_dimension_numbers<[1], [1], [0], [0], [0, 0, 1, 0], [], []>} : vector<192x64xbf16>, vector<48x64xbf16>, vector<192x48xf32> -> vector<192x48xf32>
    %233 = arith.addf %232, %22 : vector<192x48xf32>
    %cst_108 = arith.constant dense<0xFF800000> : vector<192xf32>
    %234 = vector.multi_reduction <maximumf>, %233, %cst_108 [1] : vector<192x48xf32> to vector<192xf32>
    %235 = vector.shape_cast %234 : vector<192xf32> to vector<192x1xf32>
    %236 = vector.broadcast %235 : vector<192x1xf32> to vector<192x48xf32>
    %237 = arith.subf %233, %236 : vector<192x48xf32>
    %238 = math.exp %237 : vector<192x48xf32>
    %cst_109 = arith.constant dense<0.000000e+00> : vector<192xf32>
    %239 = vector.multi_reduction <add>, %238, %cst_109 [1] : vector<192x48xf32> to vector<192xf32>
    %240 = vector.shape_cast %239 : vector<192xf32> to vector<192x1xf32>
    %241 = tpu.reciprocal %240 {approx = true} : vector<192x1xf32> -> vector<192x1xf32>
    %242 = vector.broadcast %241 : vector<192x1xf32> to vector<192x48xf32>
    %243 = arith.mulf %238, %242 : vector<192x48xf32>
    %244 = arith.truncf %243 : vector<192x48xf32> to vector<192x48xbf16>
    %245 = arith.truncf %227 : vector<48x64xf32> to vector<48x64xbf16>
    %cst_110 = arith.constant dense<0.000000e+00> : vector<192x64xf32>
    %246 = tpu.matmul %244, %245, %cst_110 {dimension_numbers = #tpu.dot_dimension_numbers<[1], [0], [0], [1], [0, 0, 1, 1], [], []>} : vector<192x48xbf16>, vector<48x64xbf16>, vector<192x64xf32> -> vector<192x64xf32>
    %247 = arith.mulf %246, %56 : vector<192x64xf32>
    %248 = vector.extract_strided_slice %247 {offsets = [0, 0], sizes = [48, 64], strides = [1, 1]} : vector<192x64xf32> to vector<48x64xf32>
    %249 = vector.extract_strided_slice %247 {offsets = [48, 0], sizes = [48, 64], strides = [1, 1]} : vector<192x64xf32> to vector<48x64xf32>
    %250 = arith.addf %248, %249 : vector<48x64xf32>
    %251 = vector.extract_strided_slice %247 {offsets = [96, 0], sizes = [48, 64], strides = [1, 1]} : vector<192x64xf32> to vector<48x64xf32>
    %252 = arith.addf %250, %251 : vector<48x64xf32>
    %253 = vector.extract_strided_slice %247 {offsets = [144, 0], sizes = [48, 64], strides = [1, 1]} : vector<192x64xf32> to vector<48x64xf32>
    %254 = arith.addf %252, %253 : vector<48x64xf32>
    %255 = arith.truncf %254 : vector<48x64xf32> to vector<48x64xbf16>
    %c8_111 = arith.constant 8 : index
    %c0_112 = arith.constant 0 : index
    %c0_113 = arith.constant 0 : index
    %256 = vector.load %arg1[%c8_111, %c0_112, %c0_113] : memref<9x64x64xbf16, #tpu.memory_space<vmem>>, vector<1x64x64xbf16>
    %257 = vector.shape_cast %256 : vector<1x64x64xbf16> to vector<64x64xbf16>
    %cst_114 = arith.constant dense<0.000000e+00> : vector<48x64xf32>
    %258 = tpu.matmul %255, %257, %cst_114 {dimension_numbers = #tpu.dot_dimension_numbers<[1], [0], [0], [1], [0, 0, 1, 1], [], []>} : vector<48x64xbf16>, vector<64x64xbf16>, vector<48x64xf32> -> vector<48x64xf32>
    %c13 = arith.constant 13 : index
    %c0_115 = arith.constant 0 : index
    %c0_116 = arith.constant 0 : index
    %259 = vector.load %arg4[%c13, %c0_115, %c0_116] : memref<19x1x64xf32, #tpu.memory_space<vmem>>, vector<1x1x64xf32>
    %260 = vector.shape_cast %259 : vector<1x1x64xf32> to vector<1x64xf32>
    %261 = vector.broadcast %260 : vector<1x64xf32> to vector<48x64xf32>
    %262 = arith.addf %258, %261 : vector<48x64xf32>
    %263 = arith.addf %205, %262 : vector<48x64xf32>
    %c14 = arith.constant 14 : index
    %c0_117 = arith.constant 0 : index
    %c0_118 = arith.constant 0 : index
    %264 = vector.load %arg4[%c14, %c0_117, %c0_118] : memref<19x1x64xf32, #tpu.memory_space<vmem>>, vector<1x1x64xf32>
    %265 = vector.shape_cast %264 : vector<1x1x64xf32> to vector<1x64xf32>
    %c15 = arith.constant 15 : index
    %c0_119 = arith.constant 0 : index
    %c0_120 = arith.constant 0 : index
    %266 = vector.load %arg4[%c15, %c0_119, %c0_120] : memref<19x1x64xf32, #tpu.memory_space<vmem>>, vector<1x1x64xf32>
    %267 = vector.shape_cast %266 : vector<1x1x64xf32> to vector<1x64xf32>
    %cst_121 = arith.constant dense<0.000000e+00> : vector<48xf32>
    %268 = vector.multi_reduction <add>, %263, %cst_121 [1] : vector<48x64xf32> to vector<48xf32>
    %269 = vector.shape_cast %268 : vector<48xf32> to vector<48x1xf32>
    %cst_122 = arith.constant 6.400000e+01 : f32
    %270 = vector.broadcast %cst_122 : f32 to vector<48x1xf32>
    %271 = arith.divf %269, %270 : vector<48x1xf32>
    %272 = vector.broadcast %271 : vector<48x1xf32> to vector<48x64xf32>
    %273 = arith.subf %263, %272 : vector<48x64xf32>
    %274 = arith.mulf %273, %273 : vector<48x64xf32>
    %cst_123 = arith.constant dense<0.000000e+00> : vector<48xf32>
    %275 = vector.multi_reduction <add>, %274, %cst_123 [1] : vector<48x64xf32> to vector<48xf32>
    %276 = vector.shape_cast %275 : vector<48xf32> to vector<48x1xf32>
    %cst_124 = arith.constant 6.400000e+01 : f32
    %277 = vector.broadcast %cst_124 : f32 to vector<48x1xf32>
    %278 = arith.divf %276, %277 : vector<48x1xf32>
    %279 = vector.broadcast %271 : vector<48x1xf32> to vector<48x64xf32>
    %280 = arith.subf %263, %279 : vector<48x64xf32>
    %cst_125 = arith.constant 9.99999974E-6 : f32
    %281 = vector.broadcast %cst_125 : f32 to vector<48x1xf32>
    %282 = arith.addf %278, %281 : vector<48x1xf32>
    %283 = math.rsqrt %282 : vector<48x1xf32>
    %284 = vector.broadcast %283 : vector<48x1xf32> to vector<48x64xf32>
    %285 = arith.mulf %280, %284 : vector<48x64xf32>
    %286 = vector.broadcast %265 : vector<1x64xf32> to vector<48x64xf32>
    %287 = arith.mulf %285, %286 : vector<48x64xf32>
    %288 = vector.broadcast %267 : vector<1x64xf32> to vector<48x64xf32>
    %289 = arith.addf %287, %288 : vector<48x64xf32>
    %290 = arith.truncf %289 : vector<48x64xf32> to vector<48x64xbf16>
    %c1_126 = arith.constant 1 : index
    %c0_127 = arith.constant 0 : index
    %c0_128 = arith.constant 0 : index
    %291 = vector.load %arg2[%c1_126, %c0_127, %c0_128] : memref<3x64x256xbf16, #tpu.memory_space<vmem>>, vector<1x64x256xbf16>
    %292 = vector.shape_cast %291 : vector<1x64x256xbf16> to vector<64x256xbf16>
    %cst_129 = arith.constant dense<0.000000e+00> : vector<48x256xf32>
    %293 = tpu.matmul %290, %292, %cst_129 {dimension_numbers = #tpu.dot_dimension_numbers<[1], [0], [0], [1], [0, 0, 1, 1], [], []>} : vector<48x64xbf16>, vector<64x256xbf16>, vector<48x256xf32> -> vector<48x256xf32>
    %c1_130 = arith.constant 1 : index
    %c0_131 = arith.constant 0 : index
    %c0_132 = arith.constant 0 : index
    %294 = vector.load %arg5[%c1_130, %c0_131, %c0_132] : memref<3x1x256xf32, #tpu.memory_space<vmem>>, vector<1x1x256xf32>
    %295 = vector.shape_cast %294 : vector<1x1x256xf32> to vector<1x256xf32>
    %296 = vector.broadcast %295 : vector<1x256xf32> to vector<48x256xf32>
    %297 = arith.addf %293, %296 : vector<48x256xf32>
    %cst_133 = arith.constant 5.000000e-01 : f32
    %298 = vector.broadcast %cst_133 : f32 to vector<48x256xf32>
    %299 = arith.mulf %298, %297 : vector<48x256xf32>
    %cst_134 = arith.constant 4.471500e-02 : f32
    %300 = vector.broadcast %cst_134 : f32 to vector<48x256xf32>
    %301 = arith.mulf %300, %297 : vector<48x256xf32>
    %302 = arith.mulf %301, %297 : vector<48x256xf32>
    %303 = arith.mulf %302, %297 : vector<48x256xf32>
    %304 = arith.addf %297, %303 : vector<48x256xf32>
    %cst_135 = arith.constant 0.797884583 : f32
    %305 = vector.broadcast %cst_135 : f32 to vector<48x256xf32>
    %306 = arith.mulf %305, %304 : vector<48x256xf32>
    %307 = math.tanh %306 : vector<48x256xf32>
    %cst_136 = arith.constant 1.000000e+00 : f32
    %308 = vector.broadcast %cst_136 : f32 to vector<48x256xf32>
    %309 = arith.addf %308, %307 : vector<48x256xf32>
    %310 = arith.mulf %299, %309 : vector<48x256xf32>
    %311 = arith.truncf %310 : vector<48x256xf32> to vector<48x256xbf16>
    %c1_137 = arith.constant 1 : index
    %c0_138 = arith.constant 0 : index
    %c0_139 = arith.constant 0 : index
    %312 = vector.load %arg3[%c1_137, %c0_138, %c0_139] : memref<2x256x64xbf16, #tpu.memory_space<vmem>>, vector<1x256x64xbf16>
    %313 = vector.shape_cast %312 : vector<1x256x64xbf16> to vector<256x64xbf16>
    %cst_140 = arith.constant dense<0.000000e+00> : vector<48x64xf32>
    %314 = tpu.matmul %311, %313, %cst_140 {dimension_numbers = #tpu.dot_dimension_numbers<[1], [0], [0], [1], [0, 0, 1, 1], [], []>} : vector<48x256xbf16>, vector<256x64xbf16>, vector<48x64xf32> -> vector<48x64xf32>
    %c16 = arith.constant 16 : index
    %c0_141 = arith.constant 0 : index
    %c0_142 = arith.constant 0 : index
    %315 = vector.load %arg4[%c16, %c0_141, %c0_142] : memref<19x1x64xf32, #tpu.memory_space<vmem>>, vector<1x1x64xf32>
    %316 = vector.shape_cast %315 : vector<1x1x64xf32> to vector<1x64xf32>
    %317 = vector.broadcast %316 : vector<1x64xf32> to vector<48x64xf32>
    %318 = arith.addf %314, %317 : vector<48x64xf32>
    %319 = arith.addf %289, %318 : vector<48x64xf32>
    %c17 = arith.constant 17 : index
    %c0_143 = arith.constant 0 : index
    %c0_144 = arith.constant 0 : index
    %320 = vector.load %arg4[%c17, %c0_143, %c0_144] : memref<19x1x64xf32, #tpu.memory_space<vmem>>, vector<1x1x64xf32>
    %321 = vector.shape_cast %320 : vector<1x1x64xf32> to vector<1x64xf32>
    %c18 = arith.constant 18 : index
    %c0_145 = arith.constant 0 : index
    %c0_146 = arith.constant 0 : index
    %322 = vector.load %arg4[%c18, %c0_145, %c0_146] : memref<19x1x64xf32, #tpu.memory_space<vmem>>, vector<1x1x64xf32>
    %323 = vector.shape_cast %322 : vector<1x1x64xf32> to vector<1x64xf32>
    %cst_147 = arith.constant dense<0.000000e+00> : vector<48xf32>
    %324 = vector.multi_reduction <add>, %319, %cst_147 [1] : vector<48x64xf32> to vector<48xf32>
    %325 = vector.shape_cast %324 : vector<48xf32> to vector<48x1xf32>
    %cst_148 = arith.constant 6.400000e+01 : f32
    %326 = vector.broadcast %cst_148 : f32 to vector<48x1xf32>
    %327 = arith.divf %325, %326 : vector<48x1xf32>
    %328 = vector.broadcast %327 : vector<48x1xf32> to vector<48x64xf32>
    %329 = arith.subf %319, %328 : vector<48x64xf32>
    %330 = arith.mulf %329, %329 : vector<48x64xf32>
    %cst_149 = arith.constant dense<0.000000e+00> : vector<48xf32>
    %331 = vector.multi_reduction <add>, %330, %cst_149 [1] : vector<48x64xf32> to vector<48xf32>
    %332 = vector.shape_cast %331 : vector<48xf32> to vector<48x1xf32>
    %cst_150 = arith.constant 6.400000e+01 : f32
    %333 = vector.broadcast %cst_150 : f32 to vector<48x1xf32>
    %334 = arith.divf %332, %333 : vector<48x1xf32>
    %335 = vector.broadcast %327 : vector<48x1xf32> to vector<48x64xf32>
    %336 = arith.subf %319, %335 : vector<48x64xf32>
    %cst_151 = arith.constant 9.99999974E-6 : f32
    %337 = vector.broadcast %cst_151 : f32 to vector<48x1xf32>
    %338 = arith.addf %334, %337 : vector<48x1xf32>
    %339 = math.rsqrt %338 : vector<48x1xf32>
    %340 = vector.broadcast %339 : vector<48x1xf32> to vector<48x64xf32>
    %341 = arith.mulf %336, %340 : vector<48x64xf32>
    %342 = vector.broadcast %321 : vector<1x64xf32> to vector<48x64xf32>
    %343 = arith.mulf %341, %342 : vector<48x64xf32>
    %344 = vector.broadcast %323 : vector<1x64xf32> to vector<48x64xf32>
    %345 = arith.addf %343, %344 : vector<48x64xf32>
    %346 = tpu.iota {dimensions = array<i32: 0>} : vector<16x48xi32>
    %347 = tpu.iota {dimensions = array<i32: 1>} : vector<16x48xi32>
    %c3_i32 = arith.constant 3 : i32
    %348 = vector.broadcast %c3_i32 : i32 to vector<16x48xi32>
    %349 = arith.muli %348, %346 : vector<16x48xi32>
    %350 = arith.cmpi eq, %347, %349 : vector<16x48xi32>
    %cst_152 = arith.constant 1.000000e+00 : f32
    %cst_153 = arith.constant 0.000000e+00 : f32
    %351 = vector.broadcast %cst_152 : f32 to vector<16x48xf32>
    %352 = vector.broadcast %cst_153 : f32 to vector<16x48xf32>
    %353 = arith.select %350, %351, %352 : vector<16x48xi1>, vector<16x48xf32>
    %354 = arith.truncf %353 : vector<16x48xf32> to vector<16x48xbf16>
    %355 = arith.truncf %345 : vector<48x64xf32> to vector<48x64xbf16>
    %cst_154 = arith.constant dense<0.000000e+00> : vector<16x64xf32>
    %356 = tpu.matmul %354, %355, %cst_154 {dimension_numbers = #tpu.dot_dimension_numbers<[1], [0], [0], [1], [0, 0, 1, 1], [], []>} : vector<16x48xbf16>, vector<48x64xbf16>, vector<16x64xf32> -> vector<16x64xf32>
    %357 = arith.truncf %356 : vector<16x64xf32> to vector<16x64xbf16>
    %c2_155 = arith.constant 2 : index
    %c0_156 = arith.constant 0 : index
    %c0_157 = arith.constant 0 : index
    %358 = vector.load %arg2[%c2_155, %c0_156, %c0_157] : memref<3x64x256xbf16, #tpu.memory_space<vmem>>, vector<1x64x256xbf16>
    %359 = vector.shape_cast %358 : vector<1x64x256xbf16> to vector<64x256xbf16>
    %cst_158 = arith.constant dense<0.000000e+00> : vector<16x256xf32>
    %360 = tpu.matmul %357, %359, %cst_158 {dimension_numbers = #tpu.dot_dimension_numbers<[1], [0], [0], [1], [0, 0, 1, 1], [], []>} : vector<16x64xbf16>, vector<64x256xbf16>, vector<16x256xf32> -> vector<16x256xf32>
    %c2_159 = arith.constant 2 : index
    %c0_160 = arith.constant 0 : index
    %c0_161 = arith.constant 0 : index
    %361 = vector.load %arg5[%c2_159, %c0_160, %c0_161] : memref<3x1x256xf32, #tpu.memory_space<vmem>>, vector<1x1x256xf32>
    %362 = vector.shape_cast %361 : vector<1x1x256xf32> to vector<1x256xf32>
    %363 = vector.broadcast %362 : vector<1x256xf32> to vector<16x256xf32>
    %364 = arith.addf %360, %363 : vector<16x256xf32>
    %c0_162 = arith.constant 0 : index
    %c0_163 = arith.constant 0 : index
    %365 = vector.load %arg6[%c0_162, %c0_163] : memref<16x256xf32, #tpu.memory_space<vmem>>, vector<16x256xf32>
    tpu.vector_store %arg6[%c0_162, %c0_163], %364 {strides = array<i32>} : memref<16x256xf32, #tpu.memory_space<vmem>>, vector<16x256xf32>,
    return
  }
}

</mosaic_0001>

<bundles_post_ra>
// kernel: decision_transformer_forward.1
= control target key start
LH: loop header
LB: loop body
LE: loop exit
PB: predicated region body
PF: predicated region fallthrough
CT: control target
= control target key end

     0   :  { %v5182_v0 = vmov 0.0   ;;  %vm5183_vm0 = vmmov 0   ;;  %vm135_vm1 = vcmask 523264   ;;  %v24_v48 = vlaneseq  ;;  %s7030_s1 = inlined_call_operand.vmem [shape: bf16[9,64,64], index: 1, kind: input, shape index: {}]   ;;  %s7031_s0 = inlined_call_operand.vmem [shape: f32[48,64], index: 0, kind: input, shape index: {}]   ;;  %s7032_s4 = inlined_call_operand.vmem [shape: f32[19,1,64], index: 4, kind: input, shape index: {}]   ;;  %s7033_s2 = inlined_call_operand.vmem [shape: bf16[3,64,256], index: 2, kind: input, shape index: {}]   ;;  %s7034_s3 = inlined_call_operand.vmem [shape: bf16[2,256,64], index: 3, kind: input, shape index: {}]   ;;  %s7035_s5 = inlined_call_operand.vmem [shape: f32[3,1,256], index: 5, kind: input, shape index: {}]   ;;  %s7036_s6 = inlined_call_operand.vmem [shape: f32[16,256], index: 6, kind: output, shape index: {}]  }
   0x1   :  { %4470 = vmatprep.subr.bf16.mxu0 %v5182_v0  ;;  %v4790_v1 = vld [vmem:[%s7030_s1 + $0x18] sm:$0xff]   ;;  %4478 = vmatprep.mubr.msk.bf16.mxu0 %vm5183_vm0, %v5182_v0  ;;  %v4791_v2 = vld [vmem:[%s7030_s1 + $0x10] sm:$0xff]   ;;  %v4792_v3 = vld [vmem:[%s7030_s1 + $0x8] sm:$0xff]  }
   0x2   :  { %4490 = vmatprep.subr.bf16.mxu1 %v5182_v0  ;;  %4498 = vmatprep.mubr.msk.bf16.mxu1 %vm5183_vm0, %v5182_v0  ;;  %v4794_v4 = vld [vmem:[%s7030_s1 + $0x38] sm:$0xff]   ;;  %v4793_v5 = vld [vmem:[%s7030_s1] sm:$0xff]   ;;  %v4796_v6 = vld [vmem:[%s7030_s1 + $0x30] sm:$0xff]   ;;  %v5361_v49 = vand.u32 127, %v24_v48 }
   0x3   :  { %4471 = vmatpush3.bf16.msra.mxu0 %v4790_v1  ;;  %4491 = vmatpush3.bf16.msra.mxu1 %v4794_v4  ;;  %v87_v7 = vld [vmem:[%s7031_s0] sm:$0xff]  ;;  %v88_v8 = vld [vmem:[%s7031_s0 + $0x8] sm:$0xff]  ;;  %v4795_v9 = vld [vmem:[%s7030_s1 + $0x58] sm:$0xff]  }
   0x4   :  { %4472 = vmatprep.subr.bf16.mxu0 %v5182_v0  ;;  %4492 = vmatprep.subr.bf16.mxu1 %v5182_v0  ;;  %v93_v10 = vpack.c.bf16 %v88_v8, %v87_v7  ;;  %v89_v11 = vld [vmem:[%s7031_s0 + $0x10] sm:$0xff]  ;;  %v90_v12 = vld [vmem:[%s7031_s0 + $0x18] sm:$0xff]  ;;  %v91_v15 = vld [vmem:[%s7031_s0 + $0x20] sm:$0xff]  ;;  %vm83_vm2 = vcmp.ge.s32.totalorder %v5361_v49, 48  ;;  %vm84_vm3 = vcmp.lt.s32.totalorder %v5361_v49, 64  ;;  %vm72_vm4 = vcmp.lt.s32.totalorder %v5361_v49, 16 }
   0x5   :  { %v4797_v13 = vld [vmem:[%s7030_s1 + $0x50] sm:$0xff]   ;;  %v94_v14 = vpack.c.bf16 %v90_v12, %v89_v11  ;;  %v92_v16 = vld [vmem:[%s7031_s0 + $0x28] sm:$0xff]  ;;  %v4800_v20 = vld [vmem:[%s7030_s1 + $0x20] sm:$0xff]   ;;  %v5375_v56 = vsel %vm72_vm4, 1.0, %v5182_v0  ;;  %vm75_vm6 = vcmp.ge.s32.totalorder %v5361_v49, 16  ;;  %vm76_vm7 = vcmp.lt.s32.totalorder %v5361_v49, 32 }
   0x6   :  { %v95_v17 = vpack.c.bf16 %v92_v16, %v91_v15  ;;  %v4798_v18 = vld [vmem:[%s7030_s1 + $0x28] sm:$0xff]   ;;  %v4801_v21 = vld [vmem:[%s7030_s1 + $0x40] sm:$0xff]   ;;  %v4802_v30 = vld [vmem:[%s7030_s1 + $0x78] sm:$0xff]   ;;  %vm79_vm9 = vcmp.ge.s32.totalorder %v5361_v49, 32  ;;  %vm80_vm10 = vcmp.lt.s32.totalorder %v5361_v49, 48  ;;  %vm45_vm12 = vcmp.ge.s32.totalorder %v5361_v49, 24 }
   0x7   :  { %4473 = vmatpush3.bf16.msra.mxu0 %v4791_v2  ;;  %4493 = vmatpush3.bf16.msra.mxu1 %v4796_v6  ;;  %v4799_v19 = vld [vmem:[%s7030_s1 + $0x48] sm:$0xff]   ;;  %v3946_v23 = vld [vmem:[%s7032_s4] ss:$0 sm:$0xff]  ;;  %v4803_v33 = vld [vmem:[%s7030_s1 + $0x70] sm:$0xff]  }
   0x8   :  { %4474 = vmatprep.subr.bf16.mxu0 %v5182_v0  ;;  %4494 = vmatprep.subr.bf16.mxu1 %v5182_v0  ;;  %v4804_v39 = vld [vmem:[%s7030_s1 + $0x68] sm:$0xff]   ;;  %v4805_v42 = vld [vmem:[%s7030_s1 + $0x60] sm:$0xff]   ;;  %vm85_vm5 = vmand %vm83_vm2, %vm84_vm3 }
   0x9   :  { %v5368_v50 = vld [vmem:[%s7032_s4 + $0x1] ss:$0 sm:$0xff]  ;;  %v5378_v59 = vsel %vm85_vm5, 1.0, %v5182_v0  ;;  %vm77_vm8 = vmand %vm75_vm6, %vm76_vm7  ;;  %vm721_vm7 = vcmask 392192  }
   0xa   :  { %vm81_vm11 = vmand %vm79_vm9, %vm80_vm10 }
   0xb   :  { %4475 = vmatpush3.bf16.msra.mxu0 %v4792_v3  ;;  %4495 = vmatpush3.bf16.msra.mxu1 %v4798_v18  ;;  %v3980_v18 = vld [vmem:[%s7032_s4 + $0x2] ss:$0 sm:$0xff]  ;;  %vm5498_vm13 = vmneg %vm45_vm12 }
   0xc   :  { %4476 = vmatprep.subr.bf16.mxu0 %v5182_v0  ;;  %4496 = vmatprep.subr.bf16.mxu1 %v5182_v0 }
   0xf   :  { %4477 = vmatpush3.bf16.msra.mxu0 %v4793_v5  ;;  %4497 = vmatpush3.bf16.msra.mxu1 %v4800_v20 }
  0x10   :  { %4510 = vmatprep.subr.bf16.mxu0 %v5182_v0  ;;  %4530 = vmatprep.subr.bf16.mxu1 %v5182_v0 }
  0x12   :  { %4479 = vmatmul.mubr.msk.bf16.vlgmr.msra.gmra.mxu0 %vm135_vm1, %v93_v10 }
  0x13   :  { %4482 = vmatprep.mubr.msk.bf16.mxu0 %vm5183_vm0, %v5182_v0  ;;  %4511 = vmatpush3.bf16.msra.mxu0 %v4795_v9 }
  0x14   :  { %4512 = vmatprep.subr.bf16.mxu0 %v5182_v0 }
  0x17   :  { %4513 = vmatpush3.bf16.msra.mxu0 %v4797_v13 }
  0x18   :  { %4514 = vmatprep.subr.bf16.mxu0 %v5182_v0 }
  0x1a   :  { %4483 = vmatmul.mubr.msk.bf16.gmra.mxu0 %vm135_vm1, %v94_v14 }
  0x1b   :  { %4486 = vmatprep.mubr.msk.bf16.mxu0 %vm5183_vm0, %v5182_v0  ;;  %4515 = vmatpush3.bf16.msra.mxu0 %v4799_v19 }
  0x1c   :  { %4516 = vmatprep.subr.bf16.mxu0 %v5182_v0 }
  0x1f   :  { %4517 = vmatpush3.bf16.msra.mxu0 %v4801_v21 }
  0x22   :  { %4487 = vmatmul.mubr.msk.bf16.gmra.mxu0 %vm135_vm1, %v95_v17 }
  0x23   :  { %4518 = vmatprep.mubr.msk.bf16.mxu0 %vm5183_vm0, %v5182_v0 }
  0xd2   :  { %v179_v22 = vpop.f32.mrf.mxu0 }
  0xd3   :  { %v5304_v26 = vadd.f32 %v3946_v23, %v179_v22 }
  0xd4   :  { %v4480_v24 = vpop.f32.mrf.mxu0 }
  0xd6   :  { %v182_v25 = vpop.f32.mrf.mxu0 }
  0xd7   :  { %v5306_v27 = vadd.f32 %v3946_v23, %v182_v25 }
  0xd8   :  { %v4481_v28 = vpop.f32.mrf.mxu0 }
  0xd9   :  { %v202_v29 = vpack.c.bf16 %v5306_v27, %v5304_v26 }
  0xda   :  { %v187_v31 = vpop.f32.mrf.mxu0 }
  0xdb   :  { %4499 = vmatmul.mubr.msk.bf16.vlgmr.msra.gmra.mxu1 %vm135_vm1, %v202_v29  ;;  %4519 = vmatmul.mubr.msk.bf16.vlgmr.msra.gmra.mxu0 %vm135_vm1, %v202_v29  ;;  %v5323_v35 = vadd.f32 %v3946_v23, %v187_v31 }
  0xdc   :  { %v4484_v32 = vpop.f32.mrf.mxu0  ;;  %4502 = vmatprep.mubr.msk.bf16.mxu1 %vm5183_vm0, %v5182_v0  ;;  %4522 = vmatprep.mubr.msk.bf16.mxu0 %vm5183_vm0, %v5182_v0 }
  0xdd   :  { %4531 = vmatpush3.bf16.msra.mxu1 %v4802_v30 }
  0xde   :  { %v190_v34 = vpop.f32.mrf.mxu0  ;;  %4532 = vmatprep.subr.bf16.mxu1 %v5182_v0 }
  0xdf   :  { %v5325_v36 = vadd.f32 %v3946_v23, %v190_v34 }
  0xe0   :  { %v4485_v37 = vpop.f32.mrf.mxu0 }
  0xe1   :  { %v203_v38 = vpack.c.bf16 %v5325_v36, %v5323_v35  ;;  %4533 = vmatpush3.bf16.msra.mxu1 %v4803_v33 }
  0xe2   :  { %v195_v40 = vpop.f32.mrf.mxu0  ;;  %4534 = vmatprep.subr.bf16.mxu1 %v5182_v0 }
  0xe3   :  { %4503 = vmatmul.mubr.msk.bf16.gmra.mxu1 %vm135_vm1, %v203_v38  ;;  %4523 = vmatmul.mubr.msk.bf16.gmra.mxu0 %vm135_vm1, %v203_v38  ;;  %v5343_v44 = vadd.f32 %v3946_v23, %v195_v40 }
  0xe4   :  { %v4488_v41 = vpop.f32.mrf.mxu0  ;;  %4506 = vmatprep.mubr.msk.bf16.mxu1 %vm5183_vm0, %v5182_v0  ;;  %4526 = vmatprep.mubr.msk.bf16.mxu0 %vm5183_vm0, %v5182_v0 }
  0xe5   :  { %4535 = vmatpush3.bf16.msra.mxu1 %v4804_v39 }
  0xe6   :  { %v198_v43 = vpop.f32.mrf.mxu0  ;;  %4536 = vmatprep.subr.bf16.mxu1 %v5182_v0 }
  0xe7   :  { %v5345_v45 = vadd.f32 %v3946_v23, %v198_v43 }
  0xe8   :  { %v4489_v46 = vpop.f32.mrf.mxu0 }
  0xe9   :  { %v204_v47 = vpack.c.bf16 %v5345_v45, %v5343_v44  ;;  %4537 = vmatpush3.bf16.msra.mxu1 %v4805_v42 }
  0xeb   :  { %4507 = vmatmul.mubr.msk.bf16.gmra.mxu1 %vm135_vm1, %v204_v47  ;;  %4527 = vmatmul.mubr.msk.bf16.gmra.mxu0 %vm135_vm1, %v204_v47 }
  0xec   :  { %4538 = vmatprep.mubr.msk.bf16.mxu1 %vm5183_vm0, %v5182_v0 }
  0xf3   :  { %4539 = vmatmul.mubr.msk.bf16.vlgmr.msra.gmra.mxu1 %vm135_vm1, %v202_v29 }
  0xf4   :  { %4542 = vmatprep.mubr.msk.bf16.mxu1 %vm5183_vm0, %v5182_v0 }
  0xfb   :  { %4543 = vmatmul.mubr.msk.bf16.gmra.mxu1 %vm135_vm1, %v203_v38 }
  0xfc   :  { %4546 = vmatprep.mubr.msk.bf16.mxu1 %vm5183_vm0, %v5182_v0 }
 0x103   :  { %4547 = vmatmul.mubr.msk.bf16.gmra.mxu1 %vm135_vm1, %v204_v47 }
 0x19b   :  { %v289_v51 = vpop.f32.mrf.mxu1  ;;  %v387_v52 = vpop.f32.mrf.mxu0 }
 0x19c   :  { %v5372_v55 = vadd.f32 %v5368_v50, %v289_v51  ;;  %v388_v39 = vadd.f32 %v3980_v18, %v387_v52 }
 0x19d   :  { %v4500_v53 = vpop.f32.mrf.mxu1  ;;  %v4520_v54 = vpop.f32.mrf.mxu0 }
 0x19e   :  { %v508_v63 = vmul.f32 %v5372_v55, %v5375_v56  ;;  %v5393_v3 = vmul.f32 %v5372_v55, %v5378_v59 }
 0x19f   :  { %v292_v57 = vpop.f32.mrf.mxu1  ;;  %v390_v58 = vpop.f32.mrf.mxu0 }
 0x1a0   :  { %v5381_v60 = vadd.f32 %v5368_v50, %v292_v57  ;;  %v391_v37 = vadd.f32 %v3980_v18, %v390_v58 }
 0x1a1   :  { %v4501_v61 = vpop.f32.mrf.mxu1  ;;  %v4521_v62 = vpop.f32.mrf.mxu0 }
 0x1a2   :  { %v509_v1 = vmul.f32 %v5381_v60, %v5375_v56  ;;  %v5389_v2 = vmul.f32 %v5381_v60, %v5378_v59  ;;  %v544_v41 = vpack.c.bf16 %v391_v37, %v388_v39 }
 0x1a3   :  { %v297_v4 = vpop.f32.mrf.mxu1  ;;  %v395_v5 = vpop.f32.mrf.mxu0 }
 0x1a4   :  { %v532_v6 = vpack.c.bf16 %v509_v1, %v508_v63  ;;  %v541_v9 = vpack.c.bf16 %v5389_v2, %v5393_v3  ;;  %v396_v28 = vadd.f32 %v3980_v18, %v395_v5  ;;  %v5413_v57 = vadd.f32 %v5368_v50, %v297_v4  ;;  %v3997_v63 = vld [vmem:[%s7032_s4 + $0x3] ss:$0 sm:$0xff] }
 0x1a5   :  { %v4504_v7 = vpop.f32.mrf.mxu1  ;;  %v4524_v8 = vpop.f32.mrf.mxu0  ;;  %v584_v58 = vsel %vm135_vm1, %v544_v41, 0 }
 0x1a6   :  { %4556 = vmatprep.mubr.msk.bf16.mxu0 %vm135_vm1, %v532_v6  ;;  %v510_v7 = vmul.f32 %v5413_v57, %v5375_v56 }
 0x1a7   :  { %v300_v10 = vpop.f32.mrf.mxu1  ;;  %v398_v11 = vpop.f32.mrf.mxu0 }
 0x1a8   :  { %v399_v22 = vadd.f32 %v3980_v18, %v398_v11  ;;  %v5407_v51 = vadd.f32 %v5368_v50, %v300_v10 }
 0x1a9   :  { %v4505_v12 = vpop.f32.mrf.mxu1  ;;  %v4525_v13 = vpop.f32.mrf.mxu0 }
 0x1aa   :  { %v545_v31 = vpack.c.bf16 %v399_v22, %v396_v28  ;;  %v511_v62 = vmul.f32 %v5407_v51, %v5375_v56  ;;  %v5453_v28 = vsel %vm81_vm11, 1.0, %v5182_v0 }
 0x1ab   :  { %v305_v14 = vpop.f32.mrf.mxu1  ;;  %v403_v15 = vpop.f32.mrf.mxu0  ;;  %v523_v37 = vmul.f32 %v5407_v51, %v5453_v28 }
 0x1ac   :  { %v404_v23 = vadd.f32 %v3980_v18, %v403_v15  ;;  %v587_v43 = vsel %vm135_vm1, %v545_v31, 0  ;;  %v5417_v61 = vadd.f32 %v5368_v50, %v305_v14  ;;  %v533_v13 = vpack.c.bf16 %v511_v62, %v510_v7 }
 0x1ad   :  { %v4508_v16 = vpop.f32.mrf.mxu1  ;;  %v4528_v17 = vpop.f32.mrf.mxu0 }
 0x1ae   :  { %v512_v10 = vmul.f32 %v5417_v61, %v5375_v56  ;;  %v5437_v17 = vsel %vm77_vm8, 1.0, %v5182_v0  ;;  %v524_v39 = vmul.f32 %v5417_v61, %v5453_v28 }
 0x1af   :  { %v308_v19 = vpop.f32.mrf.mxu1  ;;  %v406_v20 = vpop.f32.mrf.mxu0  ;;  %v514_v22 = vmul.f32 %v5372_v55, %v5437_v17 }
 0x1b0   :  { %v407_v21 = vadd.f32 %v3980_v18, %v406_v20  ;;  %v5410_v54 = vadd.f32 %v5368_v50, %v308_v19  ;;  %v515_v19 = vmul.f32 %v5381_v60, %v5437_v17  ;;  %v517_v20 = vmul.f32 %v5407_v51, %v5437_v17 }
 0x1b1   :  { %v4509_v24 = vpop.f32.mrf.mxu1  ;;  %v4529_v25 = vpop.f32.mrf.mxu0 }
 0x1b2   :  { %v546_v29 = vpack.c.bf16 %v407_v21, %v404_v23  ;;  %v513_v4 = vmul.f32 %v5410_v54, %v5375_v56  ;;  %v516_v23 = vmul.f32 %v5413_v57, %v5437_v17  ;;  %v535_v24 = vpack.c.bf16 %v515_v19, %v514_v22 }
 0x1b3   :  { %v485_v30 = vpop.f32.mrf.mxu1 }
 0x1b4   :  { %4780 = vmatprep.subr.msk.bf16.mxu0 %vm135_vm1, %v546_v29  ;;  %v590_v33 = vsel %vm135_vm1, %v546_v29, 0  ;;  %v534_v16 = vpack.c.bf16 %v513_v4, %v512_v10  ;;  %v486_v18 = vadd.f32 %v3997_v63, %v485_v30  ;;  %v536_v25 = vpack.c.bf16 %v517_v20, %v516_v23 }
 0x1b5   :  { %v4540_v32 = vpop.f32.mrf.mxu1  ;;  %4551 = vmatpush3.bf16.xpose.msra.mxu0 %v590_v33  ;;  %v519_v29 = vmul.f32 %v5410_v54, %v5437_v17  ;;  %v521_v30 = vmul.f32 %v5381_v60, %v5453_v28  ;;  %v522_v60 = vmul.f32 %v5413_v57, %v5453_v28 }
 0x1b6   :  { %4781 = vmatprep.subr.msk.bf16.mxu0 %vm135_vm1, %v545_v31  ;;  %v518_v31 = vmul.f32 %v5417_v61, %v5437_v17  ;;  %v520_v32 = vmul.f32 %v5372_v55, %v5453_v28 }
 0x1b7   :  { %v488_v34 = vpop.f32.mrf.mxu1 }
 0x1b8   :  { %v489_v14 = vadd.f32 %v3997_v63, %v488_v34  ;;  %v537_v33 = vpack.c.bf16 %v519_v29, %v518_v31  ;;  %v538_v34 = vpack.c.bf16 %v521_v30, %v520_v32 }
 0x1b9   :  { %v4541_v38 = vpop.f32.mrf.mxu1 }
 0x1ba   :  { %v998_v21 = vpack.c.bf16 %v489_v14, %v486_v18  ;;  %v525_v38 = vmul.f32 %v5410_v54, %v5453_v28 }
 0x1bb   :  { %v493_v40 = vpop.f32.mrf.mxu1 }
 0x1bc   :  { %v494_v11 = vadd.f32 %v3997_v63, %v493_v40  ;;  %v539_v40 = vpack.c.bf16 %v523_v37, %v522_v60  ;;  %v540_v55 = vpack.c.bf16 %v525_v38, %v524_v39 }
 0x1bd   :  { %v4544_v42 = vpop.f32.mrf.mxu1  ;;  %4553 = vmatpush3.bf16.xpose.msra.mxu0 %v587_v43 }
 0x1be   :  { %4782 = vmatprep.subr.msk.bf16.mxu0 %vm135_vm1, %v544_v41  ;;  %v529_v41 = vmul.f32 %v5407_v51, %v5378_v59  ;;  %v528_v42 = vmul.f32 %v5413_v57, %v5378_v59  ;;  %v5492_v51 = vshrl.u32 %v24_v48, 7 }
 0x1bf   :  { %v496_v46 = vpop.f32.mrf.mxu1 }
 0x1c0   :  { %v497_v50 = vadd.f32 %v3997_v63, %v496_v46  ;;  %v542_v43 = vpack.c.bf16 %v529_v41, %v528_v42  ;;  %v531_v46 = vmul.f32 %v5410_v54, %v5378_v59  ;;  %v27_v2 = vadd.s32 16, %v5492_v51 }
 0x1c1   :  { %v4545_v47 = vpop.f32.mrf.mxu1  ;;  %vm53_vm15 = vcmp.le.s32.totalorder %v5361_v49, %v5492_v51  ;;  %v5507_v48 = vadd.s32 8, %v5492_v51  ;;  %v5184_v54 = vmov -1e+30   ;;  %v30_v4 = vadd.s32 40, %v5492_v51 }
 0x1c2   :  { %v999_v15 = vpack.c.bf16 %v497_v50, %v494_v11  ;;  %v530_v47 = vmul.f32 %v5417_v61, %v5378_v59  ;;  %vm55_vm14 = vcmp.le.s32.totalorder %v5361_v49, %v27_v2  ;;  %vm59_vm4 = vmand %vm5498_vm13, %vm53_vm15 }
 0x1c3   :  { %v501_v53 = vpop.f32.mrf.mxu1  ;;  %vm61_vm2 = vmand %vm5498_vm13, %vm55_vm14  ;;  %vm54_vm5 = vcmp.le.s32.totalorder %v5361_v49, %v5507_v48  ;;  %v5521_v61 = vsel %vm59_vm4, 0.0, %v5184_v54  ;;  %vm58_vm11 = vcmp.le.s32.totalorder %v5361_v49, %v30_v4 }
 0x1c4   :  { %v502_v5 = vadd.f32 %v3997_v63, %v501_v53  ;;  %v543_v53 = vpack.c.bf16 %v531_v46, %v530_v47  ;;  %v5514_v57 = vsel %vm61_vm2, 0.0, %v5184_v54  ;;  %vm60_vm8 = vmand %vm5498_vm13, %vm54_vm5 }
 0x1c5   :  { %v4548_v52 = vpop.f32.mrf.mxu1  ;;  %4555 = vmatpush3.bf16.xpose.msra.mxu0 %v584_v58  ;;  %v5537_v7 = vsel %vm60_vm8, 0.0, %v5184_v54  ;;  %vm64_vm13 = vmand %vm45_vm12, %vm58_vm11 }
 0x1c6   :  { %4610 = vmatprep.subr.bf16.mxu0 %v5182_v0  ;;  %v29_v52 = vadd.s32 32, %v5492_v51 }
 0x1c7   :  { %v504_v1 = vpop.f32.mrf.mxu1 }
 0x1c8   :  { %v505_v6 = vadd.f32 %v3997_v63, %v504_v1  ;;  %vm57_vm9 = vcmp.le.s32.totalorder %v5361_v49, %v29_v52 }
 0x1c9   :  { %v4549_v8 = vpop.f32.mrf.mxu1  ;;  %vm63_vm10 = vmand %vm45_vm12, %vm57_vm9 }
 0x1ca   :  { %v1000_v12 = vpack.c.bf16 %v505_v6, %v502_v5 }
 0x1cc   :  { %4580 = vmatprep.subr.bf16.mxu1 %v1000_v12  ;;  %4557 = vmatmul.mubr.msk.bf16.vlgmr.msra.gmra.mxu0 %vm135_vm1, %v533_v13 }
 0x1cd   :  { %4581 = vmatpush3.bf16.msra.mxu1 %v1000_v12  ;;  %4560 = vmatprep.mubr.msk.bf16.mxu0 %vm135_vm1, %v534_v16 }
 0x1ce   :  { %4582 = vmatprep.subr.bf16.mxu1 %v999_v15 }
 0x1d1   :  { %4583 = vmatpush3.bf16.msra.mxu1 %v999_v15  ;;  %v5552_v15 = vsel %vm63_vm10, 0.0, %v5184_v54 }
 0x1d2   :  { %4584 = vmatprep.subr.bf16.mxu1 %v998_v21 }
 0x1d4   :  { %4561 = vmatmul.mubr.msk.bf16.gmra.mxu0 %vm135_vm1, %v535_v24 }
 0x1d5   :  { %4585 = vmatpush3.bf16.msra.mxu1 %v998_v21  ;;  %4564 = vmatprep.mubr.msk.bf16.mxu0 %vm135_vm1, %v536_v25  ;;  %v5561_v21 = vsel %vm64_vm13, 0.0, %v5184_v54 }
 0x1dc   :  { %4565 = vmatmul.mubr.msk.bf16.gmra.mxu0 %vm135_vm1, %v537_v33 }
 0x1dd   :  { %4568 = vmatprep.mubr.msk.bf16.mxu0 %vm135_vm1, %v538_v34 }
 0x1e4   :  { %4569 = vmatmul.mubr.msk.bf16.gmra.mxu0 %vm135_vm1, %v539_v40 }
 0x1e5   :  { %4572 = vmatprep.mubr.msk.bf16.mxu0 %vm135_vm1, %v540_v55 }
 0x1ec   :  { %4573 = vmatmul.mubr.msk.bf16.gmra.mxu0 %vm135_vm1, %v541_v9  ;;  %v28_v9 = vadd.s32 24, %v5492_v51 }
 0x1ed   :  { %4576 = vmatprep.mubr.msk.bf16.mxu0 %vm135_vm1, %v542_v43 }
 0x1ee   :  { %vm56_vm3 = vcmp.le.s32.totalorder %v5361_v49, %v28_v9 }
 0x1ef   :  { %vm62_vm6 = vmand %vm45_vm12, %vm56_vm3 }
 0x1f0   :  { %v5528_v1 = vsel %vm62_vm6, 0.0, %v5184_v54 }
 0x1f4   :  { %4577 = vmatmul.mubr.msk.bf16.gmra.mxu0 %vm135_vm1, %v543_v53 }
 0x1f5   :  { %4618 = vmatprep.mubr.msk.bf16.mxu0 %vm5183_vm0, %v5182_v0 }
 0x28c   :  { %v4558_v58 = vpop.f32.mrf.mxu0 }
 0x28d   :  { %v5524_v62 = vadd.f32 %v4558_v58, %v5514_v57 }
 0x28e   :  { %v626_v63 = vpop.f32.mrf.mxu0 }
 0x28f   :  { %v5533_v50 = vadd.f32 %v626_v63, %v5521_v61  ;;  %v728_v5 = vsel %vm721_vm7, %v5524_v62, -inf }
 0x290   :  { %729 = vmax.xlane.f32.xlu1 %v728_v5  ;;  %v4559_v6 = vpop.f32.mrf.mxu0 }
 0x291   :  { %v5540_v8 = vadd.f32 %v4559_v6, %v5528_v1  ;;  %v722_v10 = vsel %vm721_vm7, %v5533_v50, -inf }
 0x292   :  { %v629_v11 = vpop.f32.mrf.mxu0  ;;  %723 = vmax.xlane.f32.xlu0 %v722_v10 }
 0x293   :  { %v5548_v12 = vadd.f32 %v629_v11, %v5537_v7  ;;  %v731_v13 = vsel %vm721_vm7, %v5540_v8, -inf }
 0x294   :  { %732 = vmax.xlane.f32.xlu1 %v731_v13  ;;  %v4562_v14 = vpop.f32.mrf.mxu0 }
 0x295   :  { %v725_v16 = vsel %vm721_vm7, %v5548_v12, -inf  ;;  %v5564_v22 = vadd.f32 %v4562_v14, %v5521_v61 }
 0x296   :  { %v642_v18 = vpop.f32.mrf.mxu0  ;;  %726 = vmax.xlane.f32.xlu0 %v725_v16 }
 0x297   :  { %v5559_v19 = vadd.f32 %v642_v18, %v5552_v15  ;;  %v740_v32 = vsel %vm721_vm7, %v5564_v22, -inf }
 0x298   :  { %v4563_v20 = vpop.f32.mrf.mxu0 }
 0x299   :  { %v734_v23 = vsel %vm721_vm7, %v5559_v19, -inf  ;;  %v5572_v30 = vadd.f32 %v4563_v20, %v5537_v7 }
 0x29a   :  { %v645_v24 = vpop.f32.mrf.mxu0  ;;  %735 = vmax.xlane.f32.xlu0 %v734_v23 }
 0x29b   :  { %v5569_v25 = vadd.f32 %v645_v24, %v5561_v21  ;;  %v743_v60 = vsel %vm721_vm7, %v5572_v30, -inf }
 0x29c   :  { %v4566_v29 = vpop.f32.mrf.mxu0 }
 0x29d   :  { %v737_v31 = vsel %vm721_vm7, %v5569_v25, -inf  ;;  %v5582_v38 = vadd.f32 %v4566_v29, %v5552_v15 }
 0x29e   :  { %v658_v33 = vpop.f32.mrf.mxu0  ;;  %738 = vmax.xlane.f32.xlu1 %v737_v31  ;;  %741 = vmax.xlane.f32.xlu0 %v740_v32 }
 0x29f   :  { %v5579_v34 = vadd.f32 %v658_v33, %v5514_v57  ;;  %v752_v46 = vsel %vm721_vm7, %v5582_v38, -inf }
 0x2a0   :  { %v4567_v37 = vpop.f32.mrf.mxu0 }
 0x2a1   :  { %v746_v39 = vsel %vm721_vm7, %v5579_v34, -inf  ;;  %v5592_v42 = vadd.f32 %v4567_v37, %v5561_v21 }
 0x2a2   :  { %v661_v40 = vpop.f32.mrf.mxu0  ;;  %744 = vmax.xlane.f32.xlu1 %v743_v60  ;;  %747 = vmax.xlane.f32.xlu0 %v746_v39 }
 0x2a3   :  { %v5589_v55 = vadd.f32 %v661_v40, %v5528_v1  ;;  %v755_v9 = vsel %vm721_vm7, %v5592_v42, -inf }
 0x2a4   :  { %v4570_v41 = vpop.f32.mrf.mxu0 }
 0x2a5   :  { %v749_v43 = vsel %vm721_vm7, %v5589_v55, -inf  ;;  %v5602_v3 = vadd.f32 %v4570_v41, %v5514_v57 }
 0x2a6   :  { %v674_v47 = vpop.f32.mrf.mxu0  ;;  %750 = vmax.xlane.f32.xlu1 %v749_v43  ;;  %753 = vmax.xlane.f32.xlu0 %v752_v46 }
 0x2a7   :  { %v5599_v53 = vadd.f32 %v674_v47, %v5521_v61  ;;  %v764_v6 = vsel %vm721_vm7, %v5602_v3, -inf }
 0x2a8   :  { %v4571_v2 = vpop.f32.mrf.mxu0 }
 0x2a9   :  { %v758_v54 = vsel %vm721_vm7, %v5599_v53, -inf  ;;  %v5612_v4 = vadd.f32 %v4571_v2, %v5528_v1 }
 0x2aa   :  { %v677_v52 = vpop.f32.mrf.mxu0  ;;  %756 = vmax.xlane.f32.xlu1 %v755_v9  ;;  %759 = vmax.xlane.f32.xlu0 %v758_v54 }
 0x2ab   :  { %v5609_v58 = vadd.f32 %v677_v52, %v5537_v7  ;;  %v767_v16 = vsel %vm721_vm7, %v5612_v4, -inf }
 0x2ac   :  { %v4574_v63 = vpop.f32.mrf.mxu0 }
 0x2ad   :  { %v761_v5 = vsel %vm721_vm7, %v5609_v58, -inf  ;;  %v5622_v14 = vadd.f32 %v4574_v63, %v5521_v61 }
 0x2ae   :  { %v690_v10 = vpop.f32.mrf.mxu0  ;;  %762 = vmax.xlane.f32.xlu1 %v761_v5  ;;  %765 = vmax.xlane.f32.xlu0 %v764_v6 }
 0x2af   :  { %v5619_v11 = vadd.f32 %v690_v10, %v5552_v15  ;;  %v776_v32 = vsel %vm721_vm7, %v5622_v14, -inf }
 0x2b0   :  { %v4575_v13 = vpop.f32.mrf.mxu0 }
 0x2b1   :  { %v770_v18 = vsel %vm721_vm7, %v5619_v11, -inf  ;;  %v5632_v29 = vadd.f32 %v4575_v13, %v5537_v7 }
 0x2b2   :  { %v693_v20 = vpop.f32.mrf.mxu0  ;;  %768 = vmax.xlane.f32.xlu1 %v767_v16  ;;  %771 = vmax.xlane.f32.xlu0 %v770_v18 }
 0x2b3   :  { %v5629_v23 = vadd.f32 %v693_v20, %v5561_v21  ;;  %v779_v40 = vsel %vm721_vm7, %v5632_v29, -inf }
 0x2b4   :  { %v4578_v24 = vpop.f32.mrf.mxu0 }
 0x2b5   :  { %v773_v31 = vsel %vm721_vm7, %v5629_v23, -inf  ;;  %v5642_v39 = vadd.f32 %v4578_v24, %v5552_v15 }
 0x2b6   :  { %v706_v33 = vpop.f32.mrf.mxu0  ;;  %774 = vmax.xlane.f32.xlu1 %v773_v31  ;;  %777 = vmax.xlane.f32.xlu0 %v776_v32 }
 0x2b7   :  { %v5639_v37 = vadd.f32 %v706_v33, %v5514_v57  ;;  %v788_v9 = vsel %vm721_vm7, %v5642_v39, -inf }
 0x2b8   :  { %v4579_v60 = vpop.f32.mrf.mxu0 }
 0x2b9   :  { %v782_v41 = vsel %vm721_vm7, %v5639_v37, -inf  ;;  %v5652_v47 = vadd.f32 %v4579_v60, %v5561_v21 }
 0x2ba   :  { %v709_v43 = vpop.f32.mrf.mxu0  ;;  %780 = vmax.xlane.f32.xlu1 %v779_v40  ;;  %783 = vmax.xlane.f32.xlu0 %v782_v41 }
 0x2bb   :  { %v5649_v46 = vadd.f32 %v709_v43, %v5528_v1  ;;  %v791_v54 = vsel %vm721_vm7, %v5652_v47, -inf }
 0x2bd   :  { %v785_v2 = vsel %vm721_vm7, %v5649_v46, -inf }
 0x2be   :  { %786 = vmax.xlane.f32.xlu1 %v785_v2  ;;  %789 = vmax.xlane.f32.xlu0 %v788_v9 }
 0x2c2   :  { %792 = vmax.xlane.f32.xlu1 %v791_v54 }
 0x319   :  { %v730_v52 = vpop.xlane.xlu1 %729 }
 0x31a   :  { %v796_v63 = vsub.f32 %v5524_v62, %v730_v52 }
 0x31b   :  { %v724_v5 = vpop.xlane.xlu0 %723 }
 0x31c   :  { %v794_v6 = vsub.f32 %v5533_v50, %v724_v5  ;;  %v822_v13 = vmul.f32 1.442695, %v796_v63 }
 0x31d   :  { %v733_v10 = vpop.xlane.xlu1 %732 }
 0x31e   :  { %v818_v16 = vmul.f32 1.442695, %v794_v6  ;;  %v797_v18 = vsub.f32 %v5540_v8, %v733_v10 }
 0x31f   :  { %v727_v20 = vpop.xlane.xlu0 %726 }
 0x320   :  { %4894 = vpow2.f32 %v818_v16  ;;  %v795_v24 = vsub.f32 %v5548_v12, %v727_v20  ;;  %v824_v31 = vmul.f32 1.442695, %v797_v18 }
 0x321   :  { %4896 = vpow2.f32 %v822_v13 }
 0x322   :  { %v820_v32 = vmul.f32 1.442695, %v795_v24 }
 0x323   :  { %v736_v33 = vpop.xlane.xlu0 %735 }
 0x324   :  { %4898 = vpow2.f32 %v820_v32  ;;  %v798_v60 = vsub.f32 %v5559_v19, %v736_v33 }
 0x325   :  { %4900 = vpow2.f32 %v824_v31 }
 0x326   :  { %v826_v62 = vmul.f32 1.442695, %v798_v60 }
 0x327   :  { %v739_v40 = vpop.xlane.xlu1 %738  ;;  %v742_v50 = vpop.xlane.xlu0 %741 }
 0x328   :  { %4902 = vpow2.f32 %v826_v62  ;;  %v799_v41 = vsub.f32 %v5569_v25, %v739_v40  ;;  %v800_v8 = vsub.f32 %v5564_v22, %v742_v50 }
 0x32a   :  { %v828_v43 = vmul.f32 1.442695, %v799_v41  ;;  %v830_v2 = vmul.f32 1.442695, %v800_v8 }
 0x32b   :  { %v745_v9 = vpop.xlane.xlu1 %744  ;;  %v748_v12 = vpop.xlane.xlu0 %747 }
 0x32c   :  { %4904 = vpow2.f32 %v828_v43  ;;  %v801_v54 = vsub.f32 %v5572_v30, %v745_v9  ;;  %v802_v52 = vsub.f32 %v5579_v34, %v748_v12 }
 0x32d   :  { %v5669_v63 = vpop.eup %4894  ;;  %4906 = vpow2.f32 %v830_v2 }
 0x32e   :  { %v832_v19 = vmul.f32 1.442695, %v801_v54  ;;  %v834_v5 = vmul.f32 1.442695, %v802_v52  ;;  %v866_v6 = vsel %vm721_vm7, %v5669_v63, 0.0  ;;  %v5673_v25 = vpop.eup %4896 }
 0x32f   :  { %v751_v22 = vpop.xlane.xlu1 %750  ;;  %867 = vadd.xlane.f32.xlu0 %v866_v6  ;;  %v754_v10 = vpop.xlane.xlu0 %753  ;;  %v872_v20 = vsel %vm721_vm7, %v5673_v25, 0.0 }
 0x330   :  { %4908 = vpow2.f32 %v832_v19  ;;  %v803_v13 = vsub.f32 %v5589_v55, %v751_v22  ;;  %v804_v30 = vsub.f32 %v5582_v38, %v754_v10 }
 0x331   :  { %v5677_v16 = vpop.eup %4898  ;;  %4910 = vpow2.f32 %v834_v5 }
 0x332   :  { %v836_v34 = vmul.f32 1.442695, %v803_v13  ;;  %v838_v18 = vmul.f32 1.442695, %v804_v30  ;;  %v869_v24 = vsel %vm721_vm7, %v5677_v16, 0.0  ;;  %v5683_v31 = vpop.eup %4900 }
 0x333   :  { %v757_v32 = vpop.xlane.xlu1 %756  ;;  %873 = vadd.xlane.f32.xlu0 %v872_v20  ;;  %870 = vadd.xlane.f32.xlu1 %v869_v24  ;;  %v760_v33 = vpop.xlane.xlu0 %759  ;;  %v875_v50 = vsel %vm721_vm7, %v5683_v31, 0.0 }
 0x334   :  { %4912 = vpow2.f32 %v836_v34  ;;  %v805_v38 = vsub.f32 %v5592_v42, %v757_v32  ;;  %v806_v55 = vsub.f32 %v5599_v53, %v760_v33 }
 0x335   :  { %v5687_v60 = vpop.eup %4902  ;;  %4914 = vpow2.f32 %v838_v18 }
 0x336   :  { %v840_v62 = vmul.f32 1.442695, %v805_v38  ;;  %v842_v40 = vmul.f32 1.442695, %v806_v55  ;;  %v878_v41 = vsel %vm721_vm7, %v5687_v60, 0.0 }
 0x337   :  { %v763_v8 = vpop.xlane.xlu1 %762  ;;  %876 = vadd.xlane.f32.xlu1 %v875_v50  ;;  %879 = vadd.xlane.f32.xlu0 %v878_v41  ;;  %v766_v43 = vpop.xlane.xlu0 %765 }
 0x338   :  { %4916 = vpow2.f32 %v840_v62  ;;  %v807_v42 = vsub.f32 %v5609_v58, %v763_v8  ;;  %v808_v53 = vsub.f32 %v5602_v3, %v766_v43 }
 0x339   :  { %v5695_v2 = vpop.eup %4904  ;;  %4918 = vpow2.f32 %v842_v40 }
 0x33a   :  { %v5697_v9 = vpop.eup %4906  ;;  %v844_v12 = vmul.f32 1.442695, %v807_v42  ;;  %v846_v54 = vmul.f32 1.442695, %v808_v53  ;;  %v881_v52 = vsel %vm721_vm7, %v5695_v2, 0.0 }
 0x33b   :  { %v769_v19 = vpop.xlane.xlu1 %768  ;;  %882 = vadd.xlane.f32.xlu1 %v881_v52  ;;  %v884_v5 = vsel %vm721_vm7, %v5697_v9, 0.0  ;;  %v772_v6 = vpop.xlane.xlu0 %771 }
 0x33c   :  { %4920 = vpow2.f32 %v844_v12  ;;  %v809_v58 = vsub.f32 %v5612_v4, %v769_v19  ;;  %885 = vadd.xlane.f32.xlu0 %v884_v5  ;;  %v810_v3 = vsub.f32 %v5619_v11, %v772_v6 }
 0x33d   :  { %v5705_v22 = vpop.eup %4908  ;;  %4922 = vpow2.f32 %v846_v54 }
 0x33e   :  { %v5707_v10 = vpop.eup %4910  ;;  %v848_v13 = vmul.f32 1.442695, %v809_v58  ;;  %v850_v30 = vmul.f32 1.442695, %v810_v3  ;;  %v887_v34 = vsel %vm721_vm7, %v5705_v22, 0.0 }
 0x33f   :  { %v775_v18 = vpop.xlane.xlu1 %774  ;;  %888 = vadd.xlane.f32.xlu1 %v887_v34  ;;  %v890_v20 = vsel %vm721_vm7, %v5707_v10, 0.0  ;;  %v778_v24 = vpop.xlane.xlu0 %777 }
 0x340   :  { %4924 = vpow2.f32 %v848_v13  ;;  %v811_v4 = vsub.f32 %v5629_v23, %v775_v18  ;;  %891 = vadd.xlane.f32.xlu0 %v890_v20  ;;  %v812_v11 = vsub.f32 %v5622_v14, %v778_v24 }
 0x341   :  { %v5715_v32 = vpop.eup %4912  ;;  %4926 = vpow2.f32 %v850_v30 }
 0x342   :  { %v5717_v33 = vpop.eup %4914  ;;  %v852_v38 = vmul.f32 1.442695, %v811_v4  ;;  %v854_v55 = vmul.f32 1.442695, %v812_v11  ;;  %v893_v62 = vsel %vm721_vm7, %v5715_v32, 0.0 }
 0x343   :  { %v781_v40 = vpop.xlane.xlu1 %780  ;;  %894 = vadd.xlane.f32.xlu1 %v893_v62  ;;  %v896_v50 = vsel %vm721_vm7, %v5717_v33, 0.0  ;;  %v784_v41 = vpop.xlane.xlu0 %783 }
 0x344   :  { %4928 = vpow2.f32 %v852_v38  ;;  %v813_v23 = vsub.f32 %v5632_v29, %v781_v40  ;;  %897 = vadd.xlane.f32.xlu0 %v896_v50  ;;  %v814_v14 = vsub.f32 %v5639_v37, %v784_v41 }
 0x345   :  { %v5725_v8 = vpop.eup %4916  ;;  %4930 = vpow2.f32 %v854_v55 }
 0x346   :  { %v5727_v43 = vpop.eup %4918  ;;  %v856_v42 = vmul.f32 1.442695, %v813_v23  ;;  %v858_v53 = vmul.f32 1.442695, %v814_v14  ;;  %v899_v12 = vsel %vm721_vm7, %v5725_v8, 0.0 }
 0x347   :  { %v787_v54 = vpop.xlane.xlu1 %786  ;;  %900 = vadd.xlane.f32.xlu1 %v899_v12  ;;  %v902_v52 = vsel %vm721_vm7, %v5727_v43, 0.0  ;;  %v790_v19 = vpop.xlane.xlu0 %789 }
 0x348   :  { %4932 = vpow2.f32 %v856_v42  ;;  %v815_v29 = vsub.f32 %v5649_v46, %v787_v54  ;;  %903 = vadd.xlane.f32.xlu0 %v902_v52  ;;  %v816_v37 = vsub.f32 %v5642_v39, %v790_v19 }
 0x349   :  { %v5735_v5 = vpop.eup %4920  ;;  %4934 = vpow2.f32 %v858_v53 }
 0x34a   :  { %v5737_v6 = vpop.eup %4922  ;;  %v860_v58 = vmul.f32 1.442695, %v815_v29  ;;  %v862_v3 = vmul.f32 1.442695, %v816_v37  ;;  %v905_v13 = vsel %vm721_vm7, %v5735_v5, 0.0 }
 0x34b   :  { %v793_v30 = vpop.xlane.xlu1 %792  ;;  %906 = vadd.xlane.f32.xlu1 %v905_v13  ;;  %v908_v34 = vsel %vm721_vm7, %v5737_v6, 0.0 }
 0x34c   :  { %4936 = vpow2.f32 %v860_v58  ;;  %v817_v46 = vsub.f32 %v5652_v47, %v793_v30  ;;  %909 = vadd.xlane.f32.xlu0 %v908_v34 }
 0x34d   :  { %v5744_v39 = vpop.eup %4924  ;;  %4938 = vpow2.f32 %v862_v3 }
 0x34e   :  { %v5746_v18 = vpop.eup %4926  ;;  %v864_v20 = vmul.f32 1.442695, %v817_v46  ;;  %v911_v24 = vsel %vm721_vm7, %v5744_v39, 0.0 }
 0x34f   :  { %912 = vadd.xlane.f32.xlu1 %v911_v24  ;;  %v914_v4 = vsel %vm721_vm7, %v5746_v18, 0.0 }
 0x350   :  { %4940 = vpow2.f32 %v864_v20  ;;  %915 = vadd.xlane.f32.xlu0 %v914_v4 }
 0x351   :  { %v5752_v11 = vpop.eup %4928 }
 0x352   :  { %v5754_v38 = vpop.eup %4930  ;;  %v917_v47 = vsel %vm721_vm7, %v5752_v11, 0.0 }
 0x353   :  { %918 = vadd.xlane.f32.xlu1 %v917_v47  ;;  %v920_v55 = vsel %vm721_vm7, %v5754_v38, 0.0 }
 0x354   :  { %921 = vadd.xlane.f32.xlu0 %v920_v55 }
 0x355   :  { %v5760_v62 = vpop.eup %4932 }
 0x356   :  { %v5762_v40 = vpop.eup %4934  ;;  %v923_v50 = vsel %vm721_vm7, %v5760_v62, 0.0 }
 0x357   :  { %924 = vadd.xlane.f32.xlu1 %v923_v50  ;;  %v926_v41 = vsel %vm721_vm7, %v5762_v40, 0.0 }
 0x358   :  { %927 = vadd.xlane.f32.xlu0 %v926_v41 }
 0x359   :  { %v5768_v23 = vpop.eup %4936 }
 0x35a   :  { %v5770_v14 = vpop.eup %4938  ;;  %v929_v42 = vsel %vm721_vm7, %v5768_v23, 0.0 }
 0x35b   :  { %930 = vadd.xlane.f32.xlu1 %v929_v42  ;;  %v932_v53 = vsel %vm721_vm7, %v5770_v14, 0.0 }
 0x35c   :  { %933 = vadd.xlane.f32.xlu0 %v932_v53 }
 0x35d   :  { %v5776_v12 = vpop.eup %4940 }
 0x35e   :  { %v935_v54 = vsel %vm721_vm7, %v5776_v12, 0.0 }
 0x35f   :  { %936 = vadd.xlane.f32.xlu1 %v935_v54 }
 0x3b8   :  { %v868_v52 = vpop.xlane.xlu0 %867 }
 0x3b9   :  { %4942 = vrcp.f32 %v868_v52 }
 0x3bc   :  { %v871_v19 = vpop.xlane.xlu1 %870  ;;  %v874_v29 = vpop.xlane.xlu0 %873 }
 0x3bd   :  { %4944 = vrcp.f32 %v871_v19 }
 0x3be   :  { %4946 = vrcp.f32 %v874_v29 }
 0x3c0   :  { %v877_v37 = vpop.xlane.xlu1 %876  ;;  %v880_v58 = vpop.xlane.xlu0 %879 }
 0x3c1   :  { %4948 = vrcp.f32 %v877_v37 }
 0x3c2   :  { %4950 = vrcp.f32 %v880_v58 }
 0x3c4   :  { %v883_v3 = vpop.xlane.xlu1 %882 }
 0x3c5   :  { %4952 = vrcp.f32 %v883_v3  ;;  %v886_v13 = vpop.xlane.xlu0 %885 }
 0x3c6   :  { %4954 = vrcp.f32 %v886_v13  ;;  %v4943_v30 = vpop.eup %4942 }
 0x3c7   :  { %v962_v24 = vmul.f32 %v4943_v30, %v5669_v63 }
 0x3c8   :  { %v889_v34 = vpop.xlane.xlu1 %888 }
 0x3c9   :  { %4956 = vrcp.f32 %v889_v34  ;;  %v892_v46 = vpop.xlane.xlu0 %891 }
 0x3ca   :  { %v4945_v20 = vpop.eup %4944  ;;  %4958 = vrcp.f32 %v892_v46 }
 0x3cb   :  { %v963_v4 = vmul.f32 %v4945_v20, %v5677_v16  ;;  %v4947_v47 = vpop.eup %4946 }
 0x3cc   :  { %v895_v55 = vpop.xlane.xlu1 %894  ;;  %v964_v53 = vmul.f32 %v4947_v47, %v5673_v25 }
 0x3cd   :  { %4960 = vrcp.f32 %v895_v55  ;;  %v898_v50 = vpop.xlane.xlu0 %897  ;;  %v986_v41 = vpack.c.bf16 %v963_v4, %v962_v24 }
 0x3ce   :  { %v4949_v42 = vpop.eup %4948  ;;  %4962 = vrcp.f32 %v898_v50 }
 0x3cf   :  { %v965_v54 = vmul.f32 %v4949_v42, %v5683_v31  ;;  %4586 = vmatprep.mubr.msk.bf16.mxu1 %vm721_vm7, %v986_v41  ;;  %v4951_v52 = vpop.eup %4950 }
 0x3d0   :  { %v901_v19 = vpop.xlane.xlu1 %900  ;;  %v966_v16 = vmul.f32 %v4951_v52, %v5687_v60 }
 0x3d1   :  { %4964 = vrcp.f32 %v901_v19  ;;  %v904_v29 = vpop.xlane.xlu0 %903  ;;  %v987_v63 = vpack.c.bf16 %v965_v54, %v964_v53 }
 0x3d2   :  { %v4953_v37 = vpop.eup %4952  ;;  %4966 = vrcp.f32 %v904_v29 }
 0x3d3   :  { %4587 = vmatmul.mubr.msk.bf16.vlgmr.msra.gmra.mxu1 %vm721_vm7, %v987_v63  ;;  %v967_v58 = vmul.f32 %v4953_v37, %v5695_v2  ;;  %v4955_v3 = vpop.eup %4954 }
 0x3d4   :  { %v907_v25 = vpop.xlane.xlu1 %906  ;;  %v968_v34 = vmul.f32 %v4955_v3, %v5697_v9 }
 0x3d5   :  { %4968 = vrcp.f32 %v907_v25  ;;  %v910_v31 = vpop.xlane.xlu0 %909  ;;  %v988_v13 = vpack.c.bf16 %v967_v58, %v966_v16 }
 0x3d6   :  { %v4957_v30 = vpop.eup %4956  ;;  %4970 = vrcp.f32 %v910_v31 }
 0x3d7   :  { %4590 = vmatprep.mubr.msk.bf16.mxu1 %vm721_vm7, %v988_v13  ;;  %v969_v46 = vmul.f32 %v4957_v30, %v5705_v22  ;;  %v4959_v20 = vpop.eup %4958 }
 0x3d8   :  { %v913_v24 = vpop.xlane.xlu1 %912  ;;  %v970_v2 = vmul.f32 %v4959_v20, %v5707_v10 }
 0x3d9   :  { %4972 = vrcp.f32 %v913_v24  ;;  %v916_v4 = vpop.xlane.xlu0 %915  ;;  %v989_v60 = vpack.c.bf16 %v969_v46, %v968_v34 }
 0x3da   :  { %v4961_v47 = vpop.eup %4960  ;;  %4974 = vrcp.f32 %v916_v4 }
 0x3db   :  { %4591 = vmatmul.mubr.msk.bf16.gmra.mxu1 %vm721_vm7, %v989_v60  ;;  %v971_v55 = vmul.f32 %v4961_v47, %v5715_v32  ;;  %v4963_v50 = vpop.eup %4962 }
 0x3dc   :  { %v919_v41 = vpop.xlane.xlu1 %918  ;;  %v972_v22 = vmul.f32 %v4963_v50, %v5717_v33 }
 0x3dd   :  { %4976 = vrcp.f32 %v919_v41  ;;  %v922_v42 = vpop.xlane.xlu0 %921  ;;  %v990_v9 = vpack.c.bf16 %v971_v55, %v970_v2 }
 0x3de   :  { %v4965_v53 = vpop.eup %4964  ;;  %4978 = vrcp.f32 %v922_v42 }
 0x3df   :  { %4594 = vmatprep.mubr.msk.bf16.mxu1 %vm721_vm7, %v990_v9  ;;  %v973_v54 = vmul.f32 %v4965_v53, %v5725_v8  ;;  %v4967_v52 = vpop.eup %4966 }
 0x3e0   :  { %v925_v19 = vpop.xlane.xlu1 %924  ;;  %v974_v32 = vmul.f32 %v4967_v52, %v5727_v43 }
 0x3e1   :  { %4980 = vrcp.f32 %v925_v19  ;;  %v928_v29 = vpop.xlane.xlu0 %927  ;;  %v991_v10 = vpack.c.bf16 %v973_v54, %v972_v22 }
 0x3e2   :  { %v4969_v63 = vpop.eup %4968  ;;  %4982 = vrcp.f32 %v928_v29 }
 0x3e3   :  { %4595 = vmatmul.mubr.msk.bf16.gmra.mxu1 %vm721_vm7, %v991_v10  ;;  %v975_v37 = vmul.f32 %v4969_v63, %v5735_v5  ;;  %v4971_v16 = vpop.eup %4970 }
 0x3e4   :  { %v931_v58 = vpop.xlane.xlu1 %930  ;;  %v976_v8 = vmul.f32 %v4971_v16, %v5737_v6 }
 0x3e5   :  { %4984 = vrcp.f32 %v931_v58  ;;  %v934_v3 = vpop.xlane.xlu0 %933  ;;  %v992_v33 = vpack.c.bf16 %v975_v37, %v974_v32 }
 0x3e6   :  { %v4973_v25 = vpop.eup %4972  ;;  %4986 = vrcp.f32 %v934_v3 }
 0x3e7   :  { %4598 = vmatprep.mubr.msk.bf16.mxu1 %vm721_vm7, %v992_v33  ;;  %v977_v31 = vmul.f32 %v4973_v25, %v5744_v39  ;;  %v4975_v13 = vpop.eup %4974 }
 0x3e8   :  { %v937_v30 = vpop.xlane.xlu1 %936  ;;  %v978_v5 = vmul.f32 %v4975_v13, %v5746_v18 }
 0x3e9   :  { %4988 = vrcp.f32 %v937_v30  ;;  %v993_v34 = vpack.c.bf16 %v977_v31, %v976_v8 }
 0x3ea   :  { %v4977_v43 = vpop.eup %4976 }
 0x3eb   :  { %4599 = vmatmul.mubr.msk.bf16.gmra.mxu1 %vm721_vm7, %v993_v34  ;;  %v979_v46 = vmul.f32 %v4977_v43, %v5752_v11  ;;  %v4979_v20 = vpop.eup %4978 }
 0x3ec   :  { %v980_v6 = vmul.f32 %v4979_v20, %v5754_v38 }
 0x3ed   :  { %v994_v24 = vpack.c.bf16 %v979_v46, %v978_v5 }
 0x3ee   :  { %v4981_v4 = vpop.eup %4980 }
 0x3ef   :  { %4602 = vmatprep.mubr.msk.bf16.mxu1 %vm721_vm7, %v994_v24  ;;  %v981_v39 = vmul.f32 %v4981_v4, %v5760_v62  ;;  %v4983_v60 = vpop.eup %4982  ;;  %v4806_v62 = vld [vmem:[%s7030_s1 + $0x98] sm:$0xff]  }
 0x3f0   :  { %v982_v55 = vmul.f32 %v4983_v60, %v5762_v40  ;;  %4611 = vmatpush3.bf16.msra.mxu0 %v4806_v62  ;;  %v4807_v40 = vld [vmem:[%s7030_s1 + $0x90] sm:$0xff]  }
 0x3f1   :  { %v995_v47 = vpack.c.bf16 %v981_v39, %v980_v6  ;;  %4612 = vmatprep.subr.bf16.mxu0 %v5182_v0 }
 0x3f2   :  { %v4985_v2 = vpop.eup %4984 }
 0x3f3   :  { %4603 = vmatmul.mubr.msk.bf16.gmra.mxu1 %vm721_vm7, %v995_v47  ;;  %v983_v18 = vmul.f32 %v4985_v2, %v5768_v23  ;;  %v4987_v50 = vpop.eup %4986  ;;  %v4808_v23 = vld [vmem:[%s7030_s1 + $0x88] sm:$0xff]  }
 0x3f4   :  { %v984_v42 = vmul.f32 %v4987_v50, %v5770_v14  ;;  %4613 = vmatpush3.bf16.msra.mxu0 %v4807_v40  ;;  %v4809_v14 = vld [vmem:[%s7030_s1 + $0x80] sm:$0xff]  }
 0x3f5   :  { %v996_v11 = vpack.c.bf16 %v983_v18, %v982_v55  ;;  %4614 = vmatprep.subr.bf16.mxu0 %v5182_v0 }
 0x3f6   :  { %v4989_v41 = vpop.eup %4988 }
 0x3f7   :  { %4606 = vmatprep.mubr.msk.bf16.mxu1 %vm721_vm7, %v996_v11  ;;  %v985_v38 = vmul.f32 %v4989_v41, %v5776_v12 }
 0x3f8   :  { %4615 = vmatpush3.bf16.msra.mxu0 %v4808_v23 }
 0x3f9   :  { %v997_v9 = vpack.c.bf16 %v985_v38, %v984_v42  ;;  %4616 = vmatprep.subr.bf16.mxu0 %v5182_v0 }
 0x3fb   :  { %4607 = vmatmul.mubr.msk.bf16.gmra.mxu1 %vm721_vm7, %v997_v9 }
 0x3fc   :  { %4617 = vmatpush3.bf16.msra.mxu0 %v4809_v14 }
 0x493   :  { %v4588_v12 = vpop.f32.mrf.mxu1 }
 0x494   :  { %v1168_v9 = vmul.f32 %v4588_v12, %v5375_v56 }
 0x495   :  { %v1071_v53 = vpop.f32.mrf.mxu1 }
 0x496   :  { %v1166_v30 = vmul.f32 %v1071_v53, %v5375_v56 }
 0x497   :  { %v4589_v22 = vpop.f32.mrf.mxu1 }
 0x498   :  { %v1169_v62 = vmul.f32 %v4589_v22, %v5375_v56 }
 0x499   :  { %v1074_v54 = vpop.f32.mrf.mxu1 }
 0x49a   :  { %v1167_v34 = vmul.f32 %v1074_v54, %v5375_v56 }
 0x49b   :  { %v4592_v52 = vpop.f32.mrf.mxu1 }
 0x49c   :  { %v1172_v8 = vmul.f32 %v4592_v52, %v5437_v17 }
 0x49d   :  { %v1087_v19 = vpop.f32.mrf.mxu1 }
 0x49e   :  { %v1190_v20 = vadd.f32 %v1172_v8, %v1166_v30 }
 0x49f   :  { %v4593_v29 = vpop.f32.mrf.mxu1 }
 0x4a0   :  { %v1173_v31 = vmul.f32 %v4593_v29, %v5437_v17 }
 0x4a1   :  { %v1090_v10 = vpop.f32.mrf.mxu1 }
 0x4a2   :  { %v1191_v24 = vadd.f32 %v1173_v31, %v1167_v34  ;;  %v1170_v31 = vmul.f32 %v1087_v19, %v5375_v56  ;;  %v4038_v19 = vld [vmem:[%s7032_s4 + $0x4] ss:$0 sm:$0xff] }
 0x4a3   :  { %v4596_v63 = vpop.f32.mrf.mxu1 }
 0x4a5   :  { %v1103_v32 = vpop.f32.mrf.mxu1 }
 0x4a6   :  { %v1174_v11 = vmul.f32 %v1103_v32, %v5437_v17 }
 0x4a7   :  { %v4597_v37 = vpop.f32.mrf.mxu1 }
 0x4a8   :  { %v1192_v53 = vadd.f32 %v1174_v11, %v1168_v9  ;;  %v1177_v32 = vmul.f32 %v4597_v37, %v5437_v17 }
 0x4a9   :  { %v1106_v16 = vpop.f32.mrf.mxu1 }
 0x4aa   :  { %v1175_v41 = vmul.f32 %v1106_v16, %v5437_v17 }
 0x4ab   :  { %v4600_v58 = vpop.f32.mrf.mxu1 }
 0x4ac   :  { %v1180_v40 = vmul.f32 %v4600_v58, %v5453_v28  ;;  %v1193_v54 = vadd.f32 %v1175_v41, %v1169_v62  ;;  %v1171_v58 = vmul.f32 %v1090_v10, %v5375_v56 }
 0x4ad   :  { %v1119_v3 = vpop.f32.mrf.mxu1 }
 0x4ae   :  { %v1178_v43 = vmul.f32 %v1119_v3, %v5453_v28  ;;  %v1198_v12 = vadd.f32 %v1192_v53, %v1180_v40  ;;  %v1176_v3 = vmul.f32 %v4596_v63, %v5437_v17 }
 0x4af   :  { %v4601_v33 = vpop.f32.mrf.mxu1 }
 0x4b0   :  { %v1196_v39 = vadd.f32 %v1190_v20, %v1178_v43  ;;  %v1181_v23 = vmul.f32 %v4601_v33, %v5453_v28  ;;  %v1194_v43 = vadd.f32 %v1176_v3, %v1170_v31  ;;  %v4812_v3 = vld [vmem:[%s7033_s2 + $0x34] ss:$8 sps:$4 sm:$0xff]  }
 0x4b1   :  { %v1122_v25 = vpop.f32.mrf.mxu1  ;;  %1511 = vmatprep.subr.bf16.mxu1 %v4812_v3 }
 0x4b2   :  { %v1179_v5 = vmul.f32 %v1122_v25, %v5453_v28  ;;  %v1199_v16 = vadd.f32 %v1193_v54, %v1181_v23 }
 0x4b3   :  { %v4604_v13 = vpop.f32.mrf.mxu1 }
 0x4b4   :  { %v1184_v4 = vmul.f32 %v4604_v13, %v5378_v59  ;;  %v1197_v60 = vadd.f32 %v1191_v24, %v1179_v5  ;;  %v1195_v13 = vadd.f32 %v1177_v32, %v1171_v58 }
 0x4b5   :  { %v1135_v46 = vpop.f32.mrf.mxu1 }
 0x4b6   :  { %v1202_v55 = vadd.f32 %v1196_v39, %v1184_v4  ;;  %v1182_v30 = vmul.f32 %v1135_v46, %v5453_v28 }
 0x4b7   :  { %v4605_v6 = vpop.f32.mrf.mxu1 }
 0x4b8   :  { %v1185_v47 = vmul.f32 %v4605_v6, %v5378_v59  ;;  %v1200_v10 = vadd.f32 %v1194_v43, %v1182_v30 }
 0x4b9   :  { %v1138_v2 = vpop.f32.mrf.mxu1 }
 0x4ba   :  { %v1203_v18 = vadd.f32 %v1197_v60, %v1185_v47  ;;  %v1183_v33 = vmul.f32 %v1138_v2, %v5453_v28 }
 0x4bb   :  { %v4608_v50 = vpop.f32.mrf.mxu1 }
 0x4bc   :  { %v1208_v42 = vpack.c.bf16 %v1203_v18, %v1202_v55  ;;  %v1201_v5 = vadd.f32 %v1195_v13, %v1183_v33  ;;  %v1188_v20 = vmul.f32 %v4608_v50, %v5378_v59 }
 0x4bd   :  { %v1151_v38 = vpop.f32.mrf.mxu1 }
 0x4be   :  { %4619 = vmatmul.mubr.msk.bf16.vlgmr.msra.gmra.mxu0 %vm135_vm1, %v1208_v42  ;;  %v1186_v52 = vmul.f32 %v1151_v38, %v5378_v59  ;;  %v1206_v24 = vadd.f32 %v1200_v10, %v1188_v20 }
 0x4bf   :  { %v4609_v14 = vpop.f32.mrf.mxu1  ;;  %4622 = vmatprep.mubr.msk.bf16.mxu0 %vm5183_vm0, %v5182_v0 }
 0x4c0   :  { %v1204_v25 = vadd.f32 %v1198_v12, %v1186_v52  ;;  %v1189_v34 = vmul.f32 %v4609_v14, %v5378_v59 }
 0x4c1   :  { %v1154_v29 = vpop.f32.mrf.mxu1 }
 0x4c2   :  { %v1187_v22 = vmul.f32 %v1154_v29, %v5378_v59  ;;  %v1207_v63 = vadd.f32 %v1201_v5, %v1189_v34 }
 0x4c4   :  { %v1205_v8 = vadd.f32 %v1199_v16, %v1187_v22  ;;  %v1210_v4 = vpack.c.bf16 %v1207_v63, %v1206_v24 }
 0x4c6   :  { %v1209_v37 = vpack.c.bf16 %v1205_v8, %v1204_v25 }
 0x4c8   :  { %4623 = vmatmul.mubr.msk.bf16.gmra.mxu0 %vm135_vm1, %v1209_v37 }
 0x4c9   :  { %4626 = vmatprep.mubr.msk.bf16.mxu0 %vm5183_vm0, %v5182_v0 }
 0x4d0   :  { %4627 = vmatmul.mubr.msk.bf16.gmra.mxu0 %vm135_vm1, %v1210_v4 }
 0x57e   :  { %v1295_v46 = vpop.f32.mrf.mxu0 }
 0x57f   :  { %v1296_v6 = vadd.f32 %v4038_v19, %v1295_v46 }
 0x580   :  { %v4620_v39 = vpop.f32.mrf.mxu0 }
 0x581   :  { %v1318_v60 = vadd.f32 %v1296_v6, %v5304_v26 }
 0x582   :  { %v1298_v47 = vpop.f32.mrf.mxu0 }
 0x583   :  { %v1299_v2 = vadd.f32 %v4038_v19, %v1298_v47  ;;  %v1328_v55 = vsel %vm135_vm1, %v1318_v60, 0.0 }
 0x584   :  { %1329 = vadd.xlane.f32.xlu0 %v1328_v55  ;;  %v4621_v18 = vpop.f32.mrf.mxu0 }
 0x585   :  { %v1319_v50 = vadd.f32 %v1299_v2, %v5306_v27 }
 0x587   :  { %v1331_v11 = vsel %vm135_vm1, %v1319_v50, 0.0 }
 0x588   :  { %1332 = vadd.xlane.f32.xlu1 %v1331_v11  ;;  %v1303_v41 = vpop.f32.mrf.mxu0 }
 0x589   :  { %v1304_v42 = vadd.f32 %v4038_v19, %v1303_v41 }
 0x58a   :  { %v4624_v38 = vpop.f32.mrf.mxu0 }
 0x58b   :  { %v1320_v9 = vadd.f32 %v1304_v42, %v5323_v35  ;;  %v4815_v38 = vld [vmem:[%s7033_s2 + $0x24] ss:$8 sps:$4 sm:$0xff]  }
 0x58c   :  { %v1306_v62 = vpop.f32.mrf.mxu0 }
 0x58d   :  { %v1307_v40 = vadd.f32 %v4038_v19, %v1306_v62  ;;  %v1334_v26 = vsel %vm135_vm1, %v1320_v9, 0.0  ;;  %v4818_v62 = vld [vmem:[%s7033_s2 + $0x14] ss:$8 sps:$4 sm:$0xff]  }
 0x58e   :  { %1335 = vadd.xlane.f32.xlu0 %v1334_v26  ;;  %v4625_v23 = vpop.f32.mrf.mxu0  ;;  %v4821_v26 = vld [vmem:[%s7033_s2 + $0x4] ss:$8 sps:$4 sm:$0xff]  }
 0x58f   :  { %v1321_v14 = vadd.f32 %v1307_v40, %v5325_v36  ;;  %v4810_v36 = vld [vmem:[%s7033_s2 + $0x30] ss:$8 sps:$4 sm:$0xff]   ;;  %v4819_v23 = vld [vmem:[%s7033_s2] ss:$8 sps:$4 sm:$0xff]  }
 0x590   :  { %v1311_v53 = vpop.f32.mrf.mxu0  ;;  %1512 = vmatpush1.bf16.msra.mxu1 %v4810_v36  ;;  %v4816_v40 = vld [vmem:[%s7033_s2 + $0x10] ss:$8 sps:$4 sm:$0xff]  }
 0x591   :  { %v1312_v54 = vadd.f32 %v4038_v19, %v1311_v53  ;;  %v1337_v27 = vsel %vm135_vm1, %v1321_v14, 0.0  ;;  %1513 = vmatprep.subr.bf16.mxu1 %v4815_v38 }
 0x592   :  { %1338 = vadd.xlane.f32.xlu1 %v1337_v27  ;;  %v4628_v52 = vpop.f32.mrf.mxu0 }
 0x593   :  { %v1322_v29 = vadd.f32 %v1312_v54, %v5343_v44 }
 0x594   :  { %v1314_v32 = vpop.f32.mrf.mxu0 }
 0x595   :  { %v1315_v12 = vadd.f32 %v4038_v19, %v1314_v32  ;;  %v1340_v35 = vsel %vm135_vm1, %v1322_v29, 0.0 }
 0x596   :  { %1341 = vadd.xlane.f32.xlu0 %v1340_v35  ;;  %v4629_v16 = vpop.f32.mrf.mxu0 }
 0x597   :  { %v1323_v22 = vadd.f32 %v1315_v12, %v5345_v45 }
 0x599   :  { %v1343_v58 = vsel %vm135_vm1, %v1323_v22, 0.0 }
 0x59a   :  { %1344 = vadd.xlane.f32.xlu1 %v1343_v58 }
 0x60d   :  { %v1330_v44 = vpop.xlane.xlu0 %1329 }
 0x60e   :  { %v1347_v33 = vmul.f32 0.015625, %v1330_v44 }
 0x610   :  { %v5883_v25 = vsub.f32 %v1318_v60, %v1347_v33 }
 0x611   :  { %v1333_v8 = vpop.xlane.xlu1 %1332 }
 0x612   :  { %v1348_v31 = vmul.f32 0.015625, %v1333_v8  ;;  %v1359_v45 = vmul.f32 %v5883_v25, %v5883_v25 }
 0x614   :  { %v5887_v13 = vsub.f32 %v1319_v50, %v1348_v31  ;;  %v1365_v30 = vsel %vm135_vm1, %v1359_v45, 0.0  ;;  %v4048_v31 = vld [vmem:[%s7032_s4 + $0x5] ss:$0 sm:$0xff] }
 0x615   :  { %1366 = vadd.xlane.f32.xlu0 %v1365_v30 }
 0x616   :  { %v1360_v34 = vmul.f32 %v5887_v13, %v5887_v13 }
 0x617   :  { %v1336_v37 = vpop.xlane.xlu0 %1335 }
 0x618   :  { %v1349_v43 = vmul.f32 0.015625, %v1336_v37  ;;  %v1368_v5 = vsel %vm135_vm1, %v1360_v34, 0.0 }
 0x619   :  { %1369 = vadd.xlane.f32.xlu1 %v1368_v5 }
 0x61a   :  { %v5893_v20 = vsub.f32 %v1320_v9, %v1349_v43  ;;  %v4813_v9 = vld [vmem:[%s7033_s2 + $0x20] ss:$8 sps:$4 sm:$0xff]  }
 0x61b   :  { %v1339_v10 = vpop.xlane.xlu1 %1338  ;;  %1514 = vmatpush1.bf16.msra.mxu1 %v4813_v9 }
 0x61c   :  { %v1350_v63 = vmul.f32 0.015625, %v1339_v10  ;;  %v1361_v24 = vmul.f32 %v5893_v20, %v5893_v20  ;;  %1515 = vmatprep.subr.bf16.mxu1 %v4818_v62  ;;  %v4049_v10 = vld [vmem:[%s7032_s4 + $0x6] ss:$0 sm:$0xff] }
 0x61e   :  { %v5897_v4 = vsub.f32 %v1321_v14, %v1350_v63  ;;  %v1371_v19 = vsel %vm135_vm1, %v1361_v24, 0.0  ;;  %v5185_v14 = vmov 0  }
 0x61f   :  { %1372 = vadd.xlane.f32.xlu0 %v1371_v19  ;;  %v1342_v46 = vpop.xlane.xlu0 %1341  ;;  %1516 = vmatpush1.bf16.msra.mxu1 %v4816_v40 }
 0x620   :  { %v1351_v6 = vmul.f32 0.015625, %v1342_v46  ;;  %v1362_v39 = vmul.f32 %v5897_v4, %v5897_v4  ;;  %1517 = vmatprep.subr.bf16.mxu1 %v4821_v26  ;;  %1535 = vmatprep.mubr.bf16.mxu1 %v5185_v14 }
 0x622   :  { %v5902_v60 = vsub.f32 %v1322_v29, %v1351_v6  ;;  %v1374_v47 = vsel %vm135_vm1, %v1362_v39, 0.0 }
 0x623   :  { %1375 = vadd.xlane.f32.xlu1 %v1374_v47  ;;  %v1345_v2 = vpop.xlane.xlu1 %1344  ;;  %1518 = vmatpush1.bf16.msra.mxu1 %v4819_v23 }
 0x624   :  { %v1352_v55 = vmul.f32 0.015625, %v1345_v2  ;;  %v1363_v18 = vmul.f32 %v5902_v60, %v5902_v60  ;;  %4630 = vmatprep.subr.bf16.mxu1 %v5182_v0 }
 0x626   :  { %v5907_v50 = vsub.f32 %v1323_v22, %v1352_v55  ;;  %v1377_v11 = vsel %vm135_vm1, %v1363_v18, 0.0 }
 0x627   :  { %1378 = vadd.xlane.f32.xlu0 %v1377_v11 }
 0x628   :  { %v1364_v41 = vmul.f32 %v5907_v50, %v5907_v50 }
 0x62a   :  { %v1380_v42 = vsel %vm135_vm1, %v1364_v41, 0.0 }
 0x62b   :  { %1381 = vadd.xlane.f32.xlu1 %v1380_v42 }
 0x69e   :  { %v1367_v53 = vpop.xlane.xlu0 %1366 }
 0x69f   :  { %v1383_v54 = vmul.f32 0.015625, %v1367_v53  ;;  %v4824_v53 = vld [vmem:[%s7034_s3 + $0x70] sm:$0xff]  }
 0x6a1   :  { %v1389_v27 = vadd.f32 1e-05, %v1383_v54  ;;  %v4825_v54 = vld [vmem:[%s7034_s3 + $0x30] sm:$0xff]  }
 0x6a2   :  { %v1370_v52 = vpop.xlane.xlu1 %1369 }
 0x6a3   :  { %4990 = vrsqrt.f32 %v1389_v27  ;;  %v1384_v29 = vmul.f32 0.015625, %v1370_v52  ;;  %v4826_v27 = vld [vmem:[%s7034_s3 + $0x68] sm:$0xff]  }
 0x6a4   :  { %v4827_v52 = vld [vmem:[%s7034_s3 + $0x28] sm:$0xff]  }
 0x6a5   :  { %v1390_v32 = vadd.f32 1e-05, %v1384_v29  ;;  %v4828_v29 = vld [vmem:[%s7034_s3 + $0x60] sm:$0xff]  }
 0x6a7   :  { %4992 = vrsqrt.f32 %v1390_v32  ;;  %v4829_v32 = vld [vmem:[%s7034_s3 + $0x20] sm:$0xff]  }
 0x6a8   :  { %v1373_v12 = vpop.xlane.xlu0 %1372 }
 0x6a9   :  { %v1385_v35 = vmul.f32 0.015625, %v1373_v12  ;;  %v4830_v12 = vld [vmem:[%s7034_s3 + $0x58] sm:$0xff]  }
 0x6ab   :  { %v1391_v16 = vadd.f32 1e-05, %v1385_v35  ;;  %v4831_v35 = vld [vmem:[%s7034_s3 + $0x18] sm:$0xff]  }
 0x6ac   :  { %v1376_v22 = vpop.xlane.xlu1 %1375 }
 0x6ad   :  { %4994 = vrsqrt.f32 %v1391_v16  ;;  %v1386_v58 = vmul.f32 0.015625, %v1376_v22  ;;  %v4832_v16 = vld [vmem:[%s7034_s3 + $0x50] sm:$0xff]  }
 0x6ae   :  { %v4833_v22 = vld [vmem:[%s7034_s3 + $0x10] sm:$0xff]  }
 0x6af   :  { %v1392_v36 = vadd.f32 1e-05, %v1386_v58  ;;  %v4834_v58 = vld [vmem:[%s7034_s3 + $0x48] sm:$0xff]  }
 0x6b0   :  { %v4991_v3 = vpop.eup %4990  ;;  %v1379_v44 = vpop.xlane.xlu0 %1378 }
 0x6b1   :  { %v1401_v33 = vmul.f32 %v4991_v3, %v5883_v25  ;;  %4996 = vrsqrt.f32 %v1392_v36  ;;  %v1387_v8 = vmul.f32 0.015625, %v1379_v44  ;;  %v4835_v36 = vld [vmem:[%s7034_s3 + $0x8] sm:$0xff]   ;;  %v4836_v3 = vld [vmem:[%s7034_s3 + $0x40] sm:$0xff]  }
 0x6b2   :  { %v4837_v44 = vld [vmem:[%s7034_s3] sm:$0xff]  }
 0x6b3   :  { %v1393_v45 = vadd.f32 1e-05, %v1387_v8  ;;  %v1413_v37 = vmul.f32 %v4048_v31, %v1401_v33  ;;  %v6020_v33 = vsub.s32 0, %v5492_v51  ;;  %v1442_v8 = vld [vmem:[%s7035_s5] sm:$0x3] }
 0x6b4   :  { %v4993_v30 = vpop.eup %4992  ;;  %v1382_v34 = vpop.xlane.xlu1 %1381 }
 0x6b5   :  { %v1402_v43 = vmul.f32 %v4993_v30, %v5887_v13  ;;  %4998 = vrsqrt.f32 %v1393_v45  ;;  %v1388_v5 = vmul.f32 0.015625, %v1382_v34  ;;  %v5941_v24 = vadd.f32 %v4049_v10, %v1413_v37 }
 0x6b6   :  { %v6029_v45 = vrot.slane %v1442_v8, %v6020_v33 }
 0x6b7   :  { %v1414_v63 = vmul.f32 %v4048_v31, %v1402_v43  ;;  %v1394_v25 = vadd.f32 1e-05, %v1388_v5 }
 0x6b9   :  { %5000 = vrsqrt.f32 %v1394_v25  ;;  %v5943_v19 = vadd.f32 %v4049_v10, %v1414_v63 }
 0x6ba   :  { %v4995_v46 = vpop.eup %4994 }
 0x6bb   :  { %v1431_v6 = vpack.c.bf16 %v5943_v19, %v5941_v24  ;;  %v1403_v39 = vmul.f32 %v4995_v46, %v5893_v20 }
 0x6bd   :  { %4058 = vmatmul.mubr.msk.bf16.vlgmr.msra.gmra.mxu1 %vm135_vm1, %v1431_v6  ;;  %v1415_v2 = vmul.f32 %v4048_v31, %v1403_v39 }
 0x6be   :  { %v4997_v13 = vpop.eup %4996  ;;  %1545 = vmatprep.mubr.bf16.mxu1 %v5185_v14 }
 0x6bf   :  { %v1404_v47 = vmul.f32 %v4997_v13, %v5897_v4  ;;  %v5951_v11 = vadd.f32 %v4049_v10, %v1415_v2 }
 0x6c1   :  { %v1416_v55 = vmul.f32 %v4048_v31, %v1404_v47 }
 0x6c2   :  { %v4999_v18 = vpop.eup %4998 }
 0x6c3   :  { %v5953_v41 = vadd.f32 %v4049_v10, %v1416_v55  ;;  %v1405_v42 = vmul.f32 %v4999_v18, %v5902_v60  ;;  %v4822_v60 = vld [vmem:[%s7034_s3 + $0x78] sm:$0xff]  }
 0x6c4   :  { %4340 = vmatprep.subr.bf16.mxu0 %v4822_v60 }
 0x6c5   :  { %v1432_v38 = vpack.c.bf16 %v5953_v41, %v5951_v11  ;;  %v1417_v62 = vmul.f32 %v4048_v31, %v1405_v42 }
 0x6c6   :  { %v5001_v20 = vpop.eup %5000 }
 0x6c7   :  { %4059 = vmatmul.mubr.msk.bf16.gmra.mxu1 %vm135_vm1, %v1432_v38  ;;  %v1406_v9 = vmul.f32 %v5001_v20, %v5907_v50  ;;  %v5961_v40 = vadd.f32 %v4049_v10, %v1417_v62  ;;  %v4823_v50 = vld [vmem:[%s7034_s3 + $0x38] sm:$0xff]  }
 0x6c8   :  { %1555 = vmatprep.mubr.bf16.mxu1 %v5185_v14  ;;  %4341 = vmatpush3.bf16.msra.mxu0 %v4823_v50 }
 0x6c9   :  { %v1418_v4 = vmul.f32 %v4048_v31, %v1406_v9  ;;  %4342 = vmatprep.subr.bf16.mxu0 %v4824_v53  ;;  %v6026_v31 = vsub.s32 1, %v5492_v51 }
 0x6cb   :  { %v5963_v26 = vadd.f32 %v4049_v10, %v1418_v4  ;;  %v6032_v30 = vrot.slane %v1442_v8, %v6026_v31 }
 0x6cc   :  { %4343 = vmatpush3.bf16.msra.mxu0 %v4825_v54 }
 0x6cd   :  { %v1433_v23 = vpack.c.bf16 %v5963_v26, %v5961_v40  ;;  %4344 = vmatprep.subr.bf16.mxu0 %v4826_v27 }
 0x6cf   :  { %4060 = vmatmul.mubr.msk.bf16.gmra.mxu1 %vm135_vm1, %v1433_v23 }
 0x6d0   :  { %4638 = vmatprep.mubr.msk.bf16.mxu1 %vm5183_vm0, %v5182_v0  ;;  %4345 = vmatpush3.bf16.msra.mxu0 %v4827_v52 }
 0x6d1   :  { %4346 = vmatprep.subr.bf16.mxu0 %v4828_v29 }
 0x6d4   :  { %4347 = vmatpush3.bf16.msra.mxu0 %v4829_v32 }
 0x6d5   :  { %4348 = vmatprep.subr.bf16.mxu0 %v4830_v12 }
 0x6d8   :  { %4349 = vmatpush3.bf16.msra.mxu0 %v4831_v35 }
 0x6d9   :  { %4350 = vmatprep.subr.bf16.mxu0 %v4832_v16 }
 0x6dc   :  { %4351 = vmatpush3.bf16.msra.mxu0 %v4833_v22 }
 0x6dd   :  { %4352 = vmatprep.subr.bf16.mxu0 %v4834_v58 }
 0x6e0   :  { %4353 = vmatpush3.bf16.msra.mxu0 %v4835_v36 }
 0x6e1   :  { %4354 = vmatprep.subr.bf16.mxu0 %v4836_v3 }
 0x6e4   :  { %4355 = vmatpush3.bf16.msra.mxu0 %v4837_v44 }
 0x6e5   :  { %4670 = vmatprep.subr.bf16.mxu0 %v5182_v0 }
 0x77d   :  { %v1537_v34 = vpop.f32.mrf.mxu1 }
 0x77e   :  { %v6035_v37 = vadd.f32 %v1537_v34, %v6029_v45 }
 0x77f   :  { %v1539_v43 = vpop.f32.mrf.mxu1 }
 0x780   :  { %v1578_v5 = vmul.f32 0.044715, %v6035_v37  ;;  %v6039_v10 = vadd.f32 %v1539_v43, %v6032_v30 }
 0x781   :  { %v1541_v63 = vpop.f32.mrf.mxu1 }
 0x782   :  { %v1590_v25 = vmul.f32 %v1578_v5, %v6035_v37  ;;  %v1579_v46 = vmul.f32 0.044715, %v6039_v10  ;;  %v6044_v6 = vadd.f32 %v1541_v63, %v6029_v45 }
 0x783   :  { %v1543_v39 = vpop.f32.mrf.mxu1 }
 0x784   :  { %v1602_v13 = vmul.f32 %v1590_v25, %v6035_v37  ;;  %v1591_v47 = vmul.f32 %v1579_v46, %v6039_v10  ;;  %v1580_v2 = vmul.f32 0.044715, %v6044_v6  ;;  %v6050_v55 = vadd.f32 %v1543_v39, %v6032_v30 }
 0x786   :  { %v1614_v18 = vadd.f32 %v1602_v13, %v6035_v37  ;;  %v1603_v42 = vmul.f32 %v1591_v47, %v6039_v10  ;;  %v1592_v38 = vmul.f32 %v1580_v2, %v6044_v6  ;;  %v1581_v20 = vmul.f32 0.044715, %v6050_v55 }
 0x787   :  { %v1547_v9 = vpop.f32.mrf.mxu1 }
 0x788   :  { %v1626_v62 = vmul.f32 0.7978846, %v1614_v18  ;;  %v1604_v4 = vmul.f32 %v1592_v38, %v6044_v6  ;;  %v6058_v23 = vadd.f32 %v1547_v9, %v6029_v45  ;;  %v1615_v60 = vadd.f32 %v1603_v42, %v6039_v10 }
 0x789   :  { %v1593_v50 = vmul.f32 %v1581_v20, %v6050_v55  ;;  %v1549_v53 = vpop.f32.mrf.mxu1 }
 0x78a   :  { %v1616_v54 = vadd.f32 %v1604_v4, %v6044_v6  ;;  %v1582_v27 = vmul.f32 0.044715, %v6058_v23  ;;  %v6065_v52 = vadd.f32 %v1549_v53, %v6032_v30  ;;  %5002 = vtanh.f32 %v1626_v62 }
 0x78b   :  { %v1605_v29 = vmul.f32 %v1593_v50, %v6050_v55  ;;  %v1551_v32 = vpop.f32.mrf.mxu1  ;;  %v1627_v12 = vmul.f32 0.7978846, %v1615_v60 }
 0x78c   :  { %v1628_v35 = vmul.f32 0.7978846, %v1616_v54  ;;  %v1594_v16 = vmul.f32 %v1582_v27, %v6058_v23  ;;  %v1583_v22 = vmul.f32 0.044715, %v6065_v52  ;;  %v6071_v58 = vadd.f32 %v1551_v32, %v6029_v45 }
 0x78d   :  { %v1553_v36 = vpop.f32.mrf.mxu1  ;;  %v1617_v3 = vadd.f32 %v1605_v29, %v6050_v55  ;;  %5004 = vtanh.f32 %v1627_v12 }
 0x78e   :  { %5006 = vtanh.f32 %v1628_v35  ;;  %v1606_v44 = vmul.f32 %v1594_v16, %v6058_v23  ;;  %v1595_v8 = vmul.f32 %v1583_v22, %v6065_v52  ;;  %v1584_v34 = vmul.f32 0.044715, %v6071_v58 }
 0x78f   :  { %v6078_v43 = vadd.f32 %v1553_v36, %v6032_v30  ;;  %v1557_v5 = vpop.f32.mrf.mxu1  ;;  %v1629_v63 = vmul.f32 0.7978846, %v1617_v3 }
 0x790   :  { %v1607_v25 = vmul.f32 %v1595_v8, %v6065_v52  ;;  %v1596_v46 = vmul.f32 %v1584_v34, %v6071_v58  ;;  %v6083_v39 = vadd.f32 %v1557_v5, %v6029_v45  ;;  %v1618_v13 = vadd.f32 %v1606_v44, %v6058_v23 }
 0x791   :  { %v1585_v47 = vmul.f32 0.044715, %v6078_v43  ;;  %v1559_v2 = vpop.f32.mrf.mxu1  ;;  %5008 = vtanh.f32 %v1629_v63 }
 0x792   :  { %v1608_v18 = vmul.f32 %v1596_v46, %v6071_v58  ;;  %v1586_v42 = vmul.f32 0.044715, %v6083_v39  ;;  %v6090_v38 = vadd.f32 %v1559_v2, %v6032_v30  ;;  %v1619_v20 = vadd.f32 %v1607_v25, %v6065_v52 }
 0x793   :  { %v1597_v9 = vmul.f32 %v1585_v47, %v6078_v43  ;;  %v1561_v62 = vpop.f32.mrf.mxu1  ;;  %v1630_v4 = vmul.f32 0.7978846, %v1618_v13 }
 0x794   :  { %v1598_v60 = vmul.f32 %v1586_v42, %v6083_v39  ;;  %v1587_v50 = vmul.f32 0.044715, %v6090_v38  ;;  %v6097_v53 = vadd.f32 %v1561_v62, %v6029_v45  ;;  %v1631_v54 = vmul.f32 0.7978846, %v1619_v20 }
 0x795   :  { %v1609_v27 = vmul.f32 %v1597_v9, %v6078_v43  ;;  %v1563_v29 = vpop.f32.mrf.mxu1  ;;  %v1620_v32 = vadd.f32 %v1608_v18, %v6071_v58  ;;  %v1568_v62 = vmul.f32 0.5, %v6044_v6 }
 0x796   :  { %v1610_v12 = vmul.f32 %v1598_v60, %v6083_v39  ;;  %v1599_v35 = vmul.f32 %v1587_v50, %v6090_v38  ;;  %v1588_v16 = vmul.f32 0.044715, %v6097_v53  ;;  %v6105_v22 = vadd.f32 %v1563_v29, %v6032_v30 }
 0x797   :  { %v1621_v36 = vadd.f32 %v1609_v27, %v6078_v43  ;;  %5010 = vtanh.f32 %v1631_v54  ;;  %v1632_v45 = vmul.f32 0.7978846, %v1620_v32  ;;  %v5003_v3 = vpop.eup %5002  ;;  %v1567_v29 = vmul.f32 0.5, %v6039_v10 }
 0x798   :  { %v1611_v44 = vmul.f32 %v1599_v35, %v6090_v38  ;;  %v1600_v8 = vmul.f32 %v1588_v16, %v6097_v53  ;;  %v1589_v34 = vmul.f32 0.044715, %v6105_v22  ;;  %5012 = vtanh.f32 %v1630_v4 }
 0x799   :  { %v1633_v5 = vmul.f32 0.7978846, %v1621_v36  ;;  %5014 = vtanh.f32 %v1632_v45  ;;  %v1622_v63 = vadd.f32 %v1610_v12, %v6083_v39  ;;  %v1650_v50 = vadd.f32 1.0, %v5003_v3 }
 0x79a   :  { %v5005_v25 = vpop.eup %5004  ;;  %v1612_v30 = vmul.f32 %v1600_v8, %v6097_v53  ;;  %v1601_v46 = vmul.f32 %v1589_v34, %v6105_v22  ;;  %v1623_v13 = vadd.f32 %v1611_v44, %v6090_v38  ;;  %v1569_v32 = vmul.f32 0.5, %v6050_v55 }
 0x79b   :  { %v5007_v47 = vpop.eup %5006  ;;  %5016 = vtanh.f32 %v1633_v5  ;;  %v1634_v2 = vmul.f32 0.7978846, %v1622_v63  ;;  %v1651_v4 = vadd.f32 1.0, %v5005_v25  ;;  %v1566_v35 = vmul.f32 0.5, %v6035_v37 }
 0x79c   :  { %v1613_v18 = vmul.f32 %v1601_v46, %v6105_v22  ;;  %v1652_v42 = vadd.f32 1.0, %v5007_v47  ;;  %v1635_v20 = vmul.f32 0.7978846, %v1623_v13  ;;  %v1624_v9 = vadd.f32 %v1612_v30, %v6097_v53 }
 0x79d   :  { %v1663_v45 = vmul.f32 %v1651_v4, %v1567_v29  ;;  %v1662_v44 = vmul.f32 %v1650_v50, %v1566_v35  ;;  %v1572_v30 = vmul.f32 0.5, %v6071_v58  ;;  %v1571_v46 = vmul.f32 0.5, %v6065_v52 }
 0x79e   :  { %v5009_v60 = vpop.eup %5008  ;;  %v1625_v54 = vadd.f32 %v1613_v18, %v6105_v22  ;;  %5018 = vtanh.f32 %v1635_v20  ;;  %v1636_v27 = vmul.f32 0.7978846, %v1624_v9  ;;  %v1664_v16 = vmul.f32 %v1652_v42, %v1568_v62 }
 0x79f   :  { %v1653_v12 = vadd.f32 1.0, %v5009_v60  ;;  %5020 = vtanh.f32 %v1634_v2  ;;  %v1573_v13 = vmul.f32 0.5, %v6078_v43  ;;  %v1570_v2 = vmul.f32 0.5, %v6058_v23 }
 0x7a0   :  { %v1637_v36 = vmul.f32 0.7978846, %v1625_v54  ;;  %5022 = vtanh.f32 %v1636_v27  ;;  %v1674_v34 = vpack.c.bf16 %v1664_v16, %v1662_v44  ;;  %v1575_v52 = vmul.f32 0.5, %v6090_v38 }
 0x7a1   :  { %v1665_v6 = vmul.f32 %v1653_v12, %v1569_v32  ;;  %v1577_v43 = vmul.f32 0.5, %v6105_v22  ;;  %v1576_v23 = vmul.f32 0.5, %v6097_v53  ;;  %v4062_v22 = vld [vmem:[%s7032_s4 + $0x7] ss:$0 sm:$0xff] }
 0x7a2   :  { %5024 = vtanh.f32 %v1637_v36  ;;  %v1574_v36 = vmul.f32 0.5, %v6083_v39 }
 0x7a3   :  { %v1675_v3 = vpack.c.bf16 %v1665_v6, %v1663_v45 }
 0x7a4   :  { %v5011_v8 = vpop.eup %5010 }
 0x7a5   :  { %v5013_v5 = vpop.eup %5012  ;;  %1848 = vmatprep.mubr.bf16.mxu0 %v1675_v3  ;;  %v1655_v10 = vadd.f32 1.0, %v5011_v8 }
 0x7a6   :  { %v5015_v63 = vpop.eup %5014  ;;  %1849 = vmatmul.mubr.bf16.vlgmr.msra.gmra.mxu0 %v1674_v34  ;;  %v1654_v37 = vadd.f32 1.0, %v5013_v5 }
 0x7a7   :  { %v1656_v55 = vadd.f32 1.0, %v5015_v63  ;;  %v1667_v20 = vmul.f32 %v1655_v10, %v1571_v46 }
 0x7a8   :  { %v5017_v25 = vpop.eup %5016  ;;  %v1666_v4 = vmul.f32 %v1654_v37, %v1570_v2 }
 0x7a9   :  { %v1657_v47 = vadd.f32 1.0, %v5017_v25  ;;  %v1668_v18 = vmul.f32 %v1656_v55, %v1572_v30 }
 0x7ab   :  { %v5019_v42 = vpop.eup %5018  ;;  %v1669_v9 = vmul.f32 %v1657_v47, %v1573_v13  ;;  %v1676_v54 = vpack.c.bf16 %v1668_v18, %v1666_v4 }
 0x7ac   :  { %v5021_v62 = vpop.eup %5020  ;;  %v1659_v27 = vadd.f32 1.0, %v5019_v42 }
 0x7ad   :  { %v5023_v60 = vpop.eup %5022  ;;  %v1677_v50 = vpack.c.bf16 %v1669_v9, %v1667_v20  ;;  %v1658_v12 = vadd.f32 1.0, %v5021_v62 }
 0x7ae   :  { %v1660_v29 = vadd.f32 1.0, %v5023_v60  ;;  %v1671_v35 = vmul.f32 %v1659_v27, %v1575_v52 }
 0x7af   :  { %v5025_v58 = vpop.eup %5024  ;;  %1856 = vmatprep.mubr.bf16.mxu0 %v1677_v50  ;;  %v1670_v44 = vmul.f32 %v1658_v12, %v1574_v36 }
 0x7b0   :  { %1857 = vmatmul.mubr.bf16.gmra.mxu0 %v1676_v54  ;;  %v1661_v32 = vadd.f32 1.0, %v5025_v58  ;;  %v1672_v45 = vmul.f32 %v1660_v29, %v1576_v23 }
 0x7b2   :  { %v1673_v16 = vmul.f32 %v1661_v32, %v1577_v43  ;;  %v1678_v3 = vpack.c.bf16 %v1672_v45, %v1670_v44 }
 0x7b4   :  { %v1679_v6 = vpack.c.bf16 %v1673_v16, %v1671_v35 }
 0x7b6   :  { %1864 = vmatprep.mubr.bf16.mxu0 %v1679_v6 }
 0x7b8   :  { %1865 = vmatmul.mubr.bf16.gmra.mxu0 %v1678_v3 }
 0x7b9   :  { %4678 = vmatprep.mubr.msk.bf16.mxu0 %vm5183_vm0, %v5182_v0 }
 0x866   :  { %v4356_v38 = vpop.f32.mrf.mxu0 }
 0x868   :  { %v4357_v53 = vpop.f32.mrf.mxu0 }
 0x869   :  { %v4358_v8 = vadd.f32 %v4357_v53, %v4356_v38 }
 0x86a   :  { %v4359_v34 = vpop.f32.mrf.mxu0 }
 0x86b   :  { %v1851_v5 = vadd.f32 %v4358_v8, %v4062_v22 }
 0x86c   :  { %v4360_v63 = vpop.f32.mrf.mxu0 }
 0x86d   :  { %v4361_v39 = vadd.f32 %v4360_v63, %v4359_v34  ;;  %v1873_v10 = vadd.f32 %v1851_v5, %v5941_v24 }
 0x86f   :  { %v1854_v55 = vadd.f32 %v4361_v39, %v4062_v22  ;;  %v1883_v25 = vsel %vm135_vm1, %v1873_v10, 0.0 }
 0x870   :  { %1884 = vadd.xlane.f32.xlu0 %v1883_v25  ;;  %v4362_v30 = vpop.f32.mrf.mxu0 }
 0x871   :  { %v1874_v37 = vadd.f32 %v1854_v55, %v5943_v19 }
 0x872   :  { %v4363_v46 = vpop.f32.mrf.mxu0 }
 0x873   :  { %v4364_v13 = vadd.f32 %v4363_v46, %v4362_v30  ;;  %v1886_v47 = vsel %vm135_vm1, %v1874_v37, 0.0 }
 0x874   :  { %1887 = vadd.xlane.f32.xlu1 %v1886_v47  ;;  %v4365_v2 = vpop.f32.mrf.mxu0 }
 0x875   :  { %v1859_v18 = vadd.f32 %v4364_v13, %v4062_v22 }
 0x876   :  { %v4366_v42 = vpop.f32.mrf.mxu0 }
 0x877   :  { %v4367_v20 = vadd.f32 %v4366_v42, %v4365_v2  ;;  %v1875_v9 = vadd.f32 %v1859_v18, %v5951_v11 }
 0x878   :  { %v4368_v62 = vpop.f32.mrf.mxu0 }
 0x879   :  { %v1862_v24 = vadd.f32 %v4367_v20, %v4062_v22  ;;  %v1889_v4 = vsel %vm135_vm1, %v1875_v9, 0.0 }
 0x87a   :  { %1890 = vadd.xlane.f32.xlu0 %v1889_v4  ;;  %v4369_v60 = vpop.f32.mrf.mxu0  ;;  %v4841_v4 = vld [vmem:[%s7030_s1 + $0xf0] sm:$0xff]  }
 0x87b   :  { %v4370_v50 = vadd.f32 %v4369_v60, %v4368_v62  ;;  %v1876_v19 = vadd.f32 %v1862_v24, %v5953_v41  ;;  %v4839_v62 = vld [vmem:[%s7030_s1 + $0xf8] sm:$0xff]   ;;  %v4840_v24 = vld [vmem:[%s7030_s1 + $0xb0] sm:$0xff]   ;;  %v4842_v60 = vld [vmem:[%s7030_s1 + $0xa8] sm:$0xff]  }
 0x87c   :  { %v4371_v54 = vpop.f32.mrf.mxu0  ;;  %4671 = vmatpush3.bf16.msra.mxu0 %v4839_v62 }
 0x87d   :  { %v1867_v27 = vadd.f32 %v4370_v50, %v4062_v22  ;;  %v1892_v29 = vsel %vm135_vm1, %v1876_v19, 0.0  ;;  %4672 = vmatprep.subr.bf16.mxu0 %v5182_v0  ;;  %v4843_v50 = vld [vmem:[%s7030_s1 + $0xe8] sm:$0xff]  }
 0x87e   :  { %1893 = vadd.xlane.f32.xlu1 %v1892_v29  ;;  %v4372_v58 = vpop.f32.mrf.mxu0 }
 0x87f   :  { %v4373_v52 = vadd.f32 %v4372_v58, %v4371_v54  ;;  %v1877_v43 = vadd.f32 %v1867_v27, %v5961_v40  ;;  %v4845_v54 = vld [vmem:[%s7030_s1 + $0xe0] sm:$0xff]  }
 0x880   :  { %4673 = vmatpush3.bf16.msra.mxu0 %v4841_v4 }
 0x881   :  { %v1870_v32 = vadd.f32 %v4373_v52, %v4062_v22  ;;  %v1895_v11 = vsel %vm135_vm1, %v1877_v43, 0.0  ;;  %4674 = vmatprep.subr.bf16.mxu0 %v5182_v0 }
 0x882   :  { %1896 = vadd.xlane.f32.xlu0 %v1895_v11 }
 0x883   :  { %v1878_v23 = vadd.f32 %v1870_v32, %v5963_v26 }
 0x884   :  { %4675 = vmatpush3.bf16.msra.mxu0 %v4843_v50  ;;  %v4848_v50 = vld [vmem:[%s7030_s1 + $0xc8] sm:$0xff]  }
 0x885   :  { %v1898_v12 = vsel %vm135_vm1, %v1878_v23, 0.0  ;;  %4676 = vmatprep.subr.bf16.mxu0 %v5182_v0 }
 0x886   :  { %1899 = vadd.xlane.f32.xlu1 %v1898_v12 }
 0x888   :  { %4677 = vmatpush3.bf16.msra.mxu0 %v4845_v54 }
 0x8f9   :  { %v1885_v35 = vpop.xlane.xlu0 %1884 }
 0x8fa   :  { %v1901_v41 = vmul.f32 0.015625, %v1885_v35 }
 0x8fc   :  { %v6147_v16 = vsub.f32 %v1873_v10, %v1901_v41 }
 0x8fd   :  { %v1888_v36 = vpop.xlane.xlu1 %1887 }
 0x8fe   :  { %v1902_v45 = vmul.f32 0.015625, %v1888_v36  ;;  %v1913_v6 = vmul.f32 %v6147_v16, %v6147_v16 }
 0x900   :  { %v6151_v44 = vsub.f32 %v1874_v37, %v1902_v45  ;;  %v1919_v40 = vsel %vm135_vm1, %v1913_v6, 0.0 }
 0x901   :  { %1920 = vadd.xlane.f32.xlu0 %v1919_v40 }
 0x902   :  { %v1914_v26 = vmul.f32 %v6151_v44, %v6151_v44 }
 0x903   :  { %v1891_v3 = vpop.xlane.xlu0 %1890 }
 0x904   :  { %v1903_v38 = vmul.f32 0.015625, %v1891_v3  ;;  %v1922_v22 = vsel %vm135_vm1, %v1914_v26, 0.0  ;;  %v4081_v3 = vld [vmem:[%s7032_s4 + $0x8] ss:$0 sm:$0xff] }
 0x905   :  { %1923 = vadd.xlane.f32.xlu1 %v1922_v22 }
 0x906   :  { %v6157_v53 = vsub.f32 %v1875_v9, %v1903_v38  ;;  %v4838_v9 = vld [vmem:[%s7030_s1 + $0xb8] sm:$0xff]  }
 0x907   :  { %v1894_v8 = vpop.xlane.xlu1 %1893  ;;  %4631 = vmatpush3.bf16.msra.mxu1 %v4838_v9 }
 0x908   :  { %v1904_v34 = vmul.f32 0.015625, %v1894_v8  ;;  %v1915_v5 = vmul.f32 %v6157_v53, %v6157_v53  ;;  %4632 = vmatprep.subr.bf16.mxu1 %v5182_v0 }
 0x90a   :  { %v6161_v63 = vsub.f32 %v1876_v19, %v1904_v34  ;;  %v1925_v39 = vsel %vm135_vm1, %v1915_v5, 0.0  ;;  %v4844_v19 = vld [vmem:[%s7030_s1 + $0xa0] sm:$0xff]  }
 0x90b   :  { %1926 = vadd.xlane.f32.xlu0 %v1925_v39  ;;  %v1897_v10 = vpop.xlane.xlu0 %1896  ;;  %4633 = vmatpush3.bf16.msra.mxu1 %v4840_v24 }
 0x90c   :  { %v1905_v55 = vmul.f32 0.015625, %v1897_v10  ;;  %v1916_v25 = vmul.f32 %v6161_v63, %v6161_v63  ;;  %4634 = vmatprep.subr.bf16.mxu1 %v5182_v0  ;;  %v4082_v10 = vld [vmem:[%s7032_s4 + $0x9] ss:$0 sm:$0xff] }
 0x90e   :  { %v6166_v30 = vsub.f32 %v1877_v43, %v1905_v55  ;;  %v1928_v37 = vsel %vm135_vm1, %v1916_v25, 0.0 }
 0x90f   :  { %1929 = vadd.xlane.f32.xlu1 %v1928_v37  ;;  %v1900_v46 = vpop.xlane.xlu1 %1899  ;;  %4635 = vmatpush3.bf16.msra.mxu1 %v4842_v60 }
 0x910   :  { %v1906_v13 = vmul.f32 0.015625, %v1900_v46  ;;  %v1917_v47 = vmul.f32 %v6166_v30, %v6166_v30  ;;  %4636 = vmatprep.subr.bf16.mxu1 %v5182_v0 }
 0x912   :  { %v6171_v2 = vsub.f32 %v1878_v23, %v1906_v13  ;;  %v1931_v18 = vsel %vm135_vm1, %v1917_v47, 0.0 }
 0x913   :  { %1932 = vadd.xlane.f32.xlu0 %v1931_v18  ;;  %4637 = vmatpush3.bf16.msra.mxu1 %v4844_v19 }
 0x914   :  { %v1918_v42 = vmul.f32 %v6171_v2, %v6171_v2  ;;  %4650 = vmatprep.subr.bf16.mxu1 %v5182_v0 }
 0x916   :  { %v1934_v20 = vsel %vm135_vm1, %v1918_v42, 0.0 }
 0x917   :  { %1935 = vadd.xlane.f32.xlu1 %v1934_v20 }
 0x98a   :  { %v1921_v27 = vpop.xlane.xlu0 %1920 }
 0x98b   :  { %v1937_v29 = vmul.f32 0.015625, %v1921_v27 }
 0x98d   :  { %v1943_v58 = vadd.f32 1e-05, %v1937_v29  ;;  %v4849_v29 = vld [vmem:[%s7030_s1 + $0xc0] sm:$0xff]  }
 0x98e   :  { %v1924_v52 = vpop.xlane.xlu1 %1923 }
 0x98f   :  { %5026 = vrsqrt.f32 %v1943_v58  ;;  %v1938_v43 = vmul.f32 0.015625, %v1924_v52 }
 0x991   :  { %v1944_v32 = vadd.f32 1e-05, %v1938_v43  ;;  %v6279_v43 = vld [vmem:[%s7032_s4 + $0xa] ss:$0 sm:$0xff] }
 0x993   :  { %5028 = vrsqrt.f32 %v1944_v32 }
 0x994   :  { %v1927_v11 = vpop.xlane.xlu0 %1926 }
 0x995   :  { %v1939_v23 = vmul.f32 0.015625, %v1927_v11 }
 0x997   :  { %v1945_v12 = vadd.f32 1e-05, %v1939_v23 }
 0x998   :  { %v1930_v35 = vpop.xlane.xlu1 %1929 }
 0x999   :  { %5030 = vrsqrt.f32 %v1945_v12  ;;  %v1940_v41 = vmul.f32 0.015625, %v1930_v35 }
 0x99b   :  { %v1946_v36 = vadd.f32 1e-05, %v1940_v41 }
 0x99c   :  { %v5027_v45 = vpop.eup %5026  ;;  %v1933_v6 = vpop.xlane.xlu0 %1932 }
 0x99d   :  { %v1955_v40 = vmul.f32 %v5027_v45, %v6147_v16  ;;  %5032 = vrsqrt.f32 %v1946_v36  ;;  %v1941_v26 = vmul.f32 0.015625, %v1933_v6 }
 0x99f   :  { %v1947_v38 = vadd.f32 1e-05, %v1941_v26  ;;  %v1967_v34 = vmul.f32 %v4081_v3, %v1955_v40 }
 0x9a0   :  { %v5029_v22 = vpop.eup %5028  ;;  %v1936_v8 = vpop.xlane.xlu1 %1935 }
 0x9a1   :  { %v1956_v5 = vmul.f32 %v5029_v22, %v6151_v44  ;;  %5034 = vrsqrt.f32 %v1947_v38  ;;  %v1942_v39 = vmul.f32 0.015625, %v1936_v8  ;;  %v6216_v25 = vadd.f32 %v4082_v10, %v1967_v34  ;;  %v4846_v44 = vld [vmem:[%s7030_s1 + $0xd8] sm:$0xff]  }
 0x9a3   :  { %v1968_v55 = vmul.f32 %v4081_v3, %v1956_v5  ;;  %v1948_v16 = vadd.f32 1e-05, %v1942_v39 }
 0x9a5   :  { %5036 = vrsqrt.f32 %v1948_v16  ;;  %v6218_v37 = vadd.f32 %v4082_v10, %v1968_v55 }
 0x9a6   :  { %v5031_v46 = vpop.eup %5030 }
 0x9a7   :  { %v1985_v13 = vpack.c.bf16 %v6218_v37, %v6216_v25  ;;  %v1957_v47 = vmul.f32 %v5031_v46, %v6157_v53  ;;  %v4847_v53 = vld [vmem:[%s7030_s1 + $0xd0] sm:$0xff]  }
 0x9a9   :  { %4639 = vmatmul.mubr.msk.bf16.vlgmr.msra.gmra.mxu1 %vm135_vm1, %v1985_v13  ;;  %4679 = vmatmul.mubr.msk.bf16.vlgmr.msra.gmra.mxu0 %vm135_vm1, %v1985_v13  ;;  %v1969_v20 = vmul.f32 %v4081_v3, %v1957_v47 }
 0x9aa   :  { %v5033_v18 = vpop.eup %5032  ;;  %4642 = vmatprep.mubr.msk.bf16.mxu1 %vm5183_vm0, %v5182_v0  ;;  %4682 = vmatprep.mubr.msk.bf16.mxu0 %vm5183_vm0, %v5182_v0 }
 0x9ab   :  { %v1958_v42 = vmul.f32 %v5033_v18, %v6161_v63  ;;  %4651 = vmatpush3.bf16.msra.mxu1 %v4846_v44  ;;  %v6237_v24 = vadd.f32 %v4082_v10, %v1969_v20 }
 0x9ac   :  { %4652 = vmatprep.subr.bf16.mxu1 %v5182_v0 }
 0x9ad   :  { %v1970_v9 = vmul.f32 %v4081_v3, %v1958_v42 }
 0x9ae   :  { %v5035_v62 = vpop.eup %5034 }
 0x9af   :  { %v6239_v4 = vadd.f32 %v4082_v10, %v1970_v9  ;;  %4653 = vmatpush3.bf16.msra.mxu1 %v4847_v53  ;;  %v1959_v60 = vmul.f32 %v5035_v62, %v6166_v30 }
 0x9b0   :  { %4654 = vmatprep.subr.bf16.mxu1 %v5182_v0 }
 0x9b1   :  { %v1986_v63 = vpack.c.bf16 %v6239_v4, %v6237_v24  ;;  %v1971_v27 = vmul.f32 %v4081_v3, %v1959_v60 }
 0x9b2   :  { %v5037_v19 = vpop.eup %5036 }
 0x9b3   :  { %4643 = vmatmul.mubr.msk.bf16.gmra.mxu1 %vm135_vm1, %v1986_v63  ;;  %4683 = vmatmul.mubr.msk.bf16.gmra.mxu0 %vm135_vm1, %v1986_v63  ;;  %v1960_v54 = vmul.f32 %v5037_v19, %v6171_v2  ;;  %v6259_v58 = vadd.f32 %v4082_v10, %v1971_v27  ;;  %v4126_v19 = vld [vmem:[%s7032_s4 + $0xc] ss:$0 sm:$0xff] }
 0x9b4   :  { %4646 = vmatprep.mubr.msk.bf16.mxu1 %vm5183_vm0, %v5182_v0  ;;  %4686 = vmatprep.mubr.msk.bf16.mxu0 %vm5183_vm0, %v5182_v0 }
 0x9b5   :  { %v1972_v30 = vmul.f32 %v4081_v3, %v1960_v54  ;;  %4655 = vmatpush3.bf16.msra.mxu1 %v4848_v50 }
 0x9b6   :  { %4656 = vmatprep.subr.bf16.mxu1 %v5182_v0 }
 0x9b7   :  { %v6261_v52 = vadd.f32 %v4082_v10, %v1972_v30 }
 0x9b9   :  { %v1987_v2 = vpack.c.bf16 %v6261_v52, %v6259_v58  ;;  %4657 = vmatpush3.bf16.msra.mxu1 %v4849_v29 }
 0x9bb   :  { %4647 = vmatmul.mubr.msk.bf16.gmra.mxu1 %vm135_vm1, %v1987_v2  ;;  %4687 = vmatmul.mubr.msk.bf16.gmra.mxu0 %vm135_vm1, %v1987_v2 }
 0x9bc   :  { %4658 = vmatprep.mubr.msk.bf16.mxu1 %vm5183_vm0, %v5182_v0 }
 0x9c3   :  { %4659 = vmatmul.mubr.msk.bf16.vlgmr.msra.gmra.mxu1 %vm135_vm1, %v1985_v13 }
 0x9c4   :  { %4662 = vmatprep.mubr.msk.bf16.mxu1 %vm5183_vm0, %v5182_v0 }
 0x9cb   :  { %4663 = vmatmul.mubr.msk.bf16.gmra.mxu1 %vm135_vm1, %v1986_v63 }
 0x9cc   :  { %4666 = vmatprep.mubr.msk.bf16.mxu1 %vm5183_vm0, %v5182_v0 }
 0x9d3   :  { %4667 = vmatmul.mubr.msk.bf16.gmra.mxu1 %vm135_vm1, %v1987_v2 }
 0xa69   :  { %v2072_v32 = vpop.f32.mrf.mxu1  ;;  %v2268_v11 = vpop.f32.mrf.mxu0 }
 0xa6a   :  { %v2073_v23 = vadd.f32 %v6279_v43, %v2072_v32 }
 0xa6b   :  { %v4640_v12 = vpop.f32.mrf.mxu1  ;;  %v4680_v35 = vpop.f32.mrf.mxu0 }
 0xa6c   :  { %v2291_v6 = vmul.f32 %v2073_v23, %v5375_v56  ;;  %v6285_v40 = vmul.f32 %v2073_v23, %v5437_v17  ;;  %v6288_v26 = vmul.f32 %v2073_v23, %v5453_v28  ;;  %v6291_v3 = vmul.f32 %v2073_v23, %v5378_v59 }
 0xa6d   :  { %v2075_v41 = vpop.f32.mrf.mxu1  ;;  %v2271_v36 = vpop.f32.mrf.mxu0 }
 0xa6e   :  { %v2076_v45 = vadd.f32 %v6279_v43, %v2075_v41 }
 0xa6f   :  { %v4641_v38 = vpop.f32.mrf.mxu1  ;;  %v4681_v22 = vpop.f32.mrf.mxu0 }
 0xa70   :  { %v2292_v8 = vmul.f32 %v2076_v45, %v5375_v56  ;;  %v6295_v34 = vmul.f32 %v2076_v45, %v5437_v17  ;;  %v6298_v5 = vmul.f32 %v2076_v45, %v5453_v28  ;;  %v6301_v39 = vmul.f32 %v2076_v45, %v5378_v59 }
 0xa71   :  { %v2272_v45 = vadd.f32 %v4126_v19, %v2271_v36  ;;  %v2269_v22 = vadd.f32 %v4126_v19, %v2268_v11  ;;  %v4109_v36 = vld [vmem:[%s7032_s4 + $0xb] ss:$0 sm:$0xff] }
 0xa72   :  { %v2315_v10 = vpack.c.bf16 %v2292_v8, %v2291_v6  ;;  %v2318_v55 = vpack.c.bf16 %v6295_v34, %v6285_v40  ;;  %v2321_v16 = vpack.c.bf16 %v6298_v5, %v6288_v26  ;;  %v2324_v46 = vpack.c.bf16 %v6301_v39, %v6291_v3 }
 0xa73   :  { %v6309_v13 = vpop.f32.mrf.mxu1  ;;  %v2276_v47 = vpop.f32.mrf.mxu0 }
 0xa74   :  { %4696 = vmatprep.mubr.msk.bf16.mxu1 %vm135_vm1, %v2315_v10  ;;  %v2277_v12 = vadd.f32 %v4126_v19, %v2276_v47  ;;  %v2780_v10 = vpack.c.bf16 %v2272_v45, %v2269_v22  ;;  %v2081_v22 = vadd.f32 %v6279_v43, %v6309_v13 }
 0xa75   :  { %v4644_v44 = vpop.f32.mrf.mxu1  ;;  %v4684_v18 = vpop.f32.mrf.mxu0 }
 0xa76   :  { %v2305_v34 = vmul.f32 %v2081_v22, %v5453_v28  ;;  %v2311_v26 = vmul.f32 %v2081_v22, %v5378_v59 }
 0xa77   :  { %v2083_v42 = vpop.f32.mrf.mxu1  ;;  %v2279_v20 = vpop.f32.mrf.mxu0 }
 0xa78   :  { %v2280_v29 = vadd.f32 %v4126_v19, %v2279_v20 }
 0xa79   :  { %v4645_v53 = vpop.f32.mrf.mxu1  ;;  %v4685_v9 = vpop.f32.mrf.mxu0 }
 0xa7a   :  { %v2781_v6 = vpack.c.bf16 %v2280_v29, %v2277_v12 }
 0xa7b   :  { %v2088_v62 = vpop.f32.mrf.mxu1  ;;  %v2284_v60 = vpop.f32.mrf.mxu0 }
 0xa7c   :  { %v2285_v2 = vadd.f32 %v4126_v19, %v2284_v60 }
 0xa7d   :  { %v4648_v63 = vpop.f32.mrf.mxu1  ;;  %v4688_v50 = vpop.f32.mrf.mxu0 }
 0xa7f   :  { %v2091_v54 = vpop.f32.mrf.mxu1  ;;  %v2287_v27 = vpop.f32.mrf.mxu0 }
 0xa80   :  { %v2288_v30 = vadd.f32 %v4126_v19, %v2287_v27 }
 0xa81   :  { %v4649_v32 = vpop.f32.mrf.mxu1  ;;  %v4689_v23 = vpop.f32.mrf.mxu0 }
 0xa82   :  { %v2782_v35 = vpack.c.bf16 %v2288_v30, %v2285_v2 }
 0xa83   :  { %v2170_v41 = vpop.f32.mrf.mxu1 }
 0xa84   :  { %4720 = vmatprep.subr.bf16.mxu0 %v2782_v35  ;;  %v2171_v12 = vadd.f32 %v4109_v36, %v2170_v41 }
 0xa85   :  { %v4660_v38 = vpop.f32.mrf.mxu1  ;;  %4721 = vmatpush3.bf16.msra.mxu0 %v2782_v35 }
 0xa86   :  { %4722 = vmatprep.subr.bf16.mxu0 %v2781_v6  ;;  %v2092_v38 = vadd.f32 %v6279_v43, %v2091_v54 }
 0xa87   :  { %v2173_v8 = vpop.f32.mrf.mxu1 }
 0xa88   :  { %v2174_v23 = vadd.f32 %v4109_v36, %v2173_v8  ;;  %v2296_v8 = vmul.f32 %v2092_v38, %v5375_v56  ;;  %v2308_v40 = vmul.f32 %v2092_v38, %v5453_v28 }
 0xa89   :  { %v4661_v44 = vpop.f32.mrf.mxu1  ;;  %4723 = vmatpush3.bf16.msra.mxu0 %v2781_v6  ;;  %v2084_v6 = vadd.f32 %v6279_v43, %v2083_v42 }
 0xa8a   :  { %4724 = vmatprep.subr.bf16.mxu0 %v2780_v10  ;;  %v2327_v35 = vpack.c.bf16 %v2174_v23, %v2171_v12  ;;  %v2089_v44 = vadd.f32 %v6279_v43, %v2088_v62  ;;  %v2299_v43 = vmul.f32 %v2081_v22, %v5437_v17 }
 0xa8b   :  { %v2178_v18 = vpop.f32.mrf.mxu1  ;;  %v2294_v41 = vmul.f32 %v2084_v6, %v5375_v56  ;;  %v2300_v13 = vmul.f32 %v2084_v6, %v5437_v17 }
 0xa8c   :  { %v2179_v30 = vadd.f32 %v4109_v36, %v2178_v18  ;;  %v2293_v18 = vmul.f32 %v2081_v22, %v5375_v56  ;;  %v2295_v42 = vmul.f32 %v2089_v44, %v5375_v56 }
 0xa8d   :  { %v4664_v20 = vpop.f32.mrf.mxu1  ;;  %4725 = vmatpush3.bf16.msra.mxu0 %v2780_v10  ;;  %v2367_v10 = vsel %vm135_vm1, %v2327_v35, 0  ;;  %v2319_v62 = vpack.c.bf16 %v2300_v13, %v2299_v43 }
 0xa8e   :  { %v2316_v20 = vpack.c.bf16 %v2294_v41, %v2293_v18  ;;  %v2317_v54 = vpack.c.bf16 %v2296_v8, %v2295_v42 }
 0xa8f   :  { %v2181_v53 = vpop.f32.mrf.mxu1 }
 0xa90   :  { %v2182_v50 = vadd.f32 %v4109_v36, %v2181_v53  ;;  %v2302_v53 = vmul.f32 %v2092_v38, %v5437_v17 }
 0xa91   :  { %v4665_v9 = vpop.f32.mrf.mxu1 }
 0xa92   :  { %v2328_v2 = vpack.c.bf16 %v2182_v50, %v2179_v30  ;;  %v2301_v9 = vmul.f32 %v2089_v44, %v5437_v17  ;;  %v2312_v50 = vmul.f32 %v2084_v6, %v5378_v59 }
 0xa93   :  { %v2186_v47 = vpop.f32.mrf.mxu1 }
 0xa94   :  { %v2187_v11 = vadd.f32 %v4109_v36, %v2186_v47  ;;  %v2370_v45 = vsel %vm135_vm1, %v2328_v2, 0  ;;  %v2320_v47 = vpack.c.bf16 %v2302_v53, %v2301_v9  ;;  %v2325_v5 = vpack.c.bf16 %v2312_v50, %v2311_v26 }
 0xa95   :  { %v4668_v60 = vpop.f32.mrf.mxu1 }
 0xa96   :  { %v2306_v60 = vmul.f32 %v2084_v6, %v5453_v28 }
 0xa97   :  { %v2189_v63 = vpop.f32.mrf.mxu1 }
 0xa98   :  { %v2190_v19 = vadd.f32 %v4109_v36, %v2189_v63  ;;  %v2322_v36 = vpack.c.bf16 %v2306_v60, %v2305_v34 }
 0xa99   :  { %v4669_v27 = vpop.f32.mrf.mxu1 }
 0xa9a   :  { %v2329_v29 = vpack.c.bf16 %v2190_v19, %v2187_v11  ;;  %v2313_v11 = vmul.f32 %v2089_v44, %v5378_v59 }
 0xa9c   :  { %4783 = vmatprep.subr.msk.bf16.mxu1 %vm135_vm1, %v2329_v29  ;;  %v2373_v32 = vsel %vm135_vm1, %v2329_v29, 0 }
 0xa9d   :  { %4691 = vmatpush3.bf16.xpose.msra.mxu1 %v2373_v32 }
 0xa9e   :  { %4784 = vmatprep.subr.msk.bf16.mxu1 %vm135_vm1, %v2328_v2 }
 0xaa5   :  { %4693 = vmatpush3.bf16.xpose.msra.mxu1 %v2370_v45 }
 0xaa6   :  { %4785 = vmatprep.subr.msk.bf16.mxu1 %vm135_vm1, %v2327_v35 }
 0xaad   :  { %4695 = vmatpush3.bf16.xpose.msra.mxu1 %v2367_v10 }
 0xaae   :  { %4750 = vmatprep.subr.bf16.mxu1 %v5182_v0 }
 0xab4   :  { %4697 = vmatmul.mubr.msk.bf16.vlgmr.msra.gmra.mxu1 %vm135_vm1, %v2316_v20 }
 0xab5   :  { %4700 = vmatprep.mubr.msk.bf16.mxu1 %vm135_vm1, %v2317_v54 }
 0xabc   :  { %4701 = vmatmul.mubr.msk.bf16.gmra.mxu1 %vm135_vm1, %v2318_v55  ;;  %v2307_v55 = vmul.f32 %v2089_v44, %v5453_v28 }
 0xabd   :  { %4704 = vmatprep.mubr.msk.bf16.mxu1 %vm135_vm1, %v2319_v62 }
 0xabe   :  { %v2323_v63 = vpack.c.bf16 %v2308_v40, %v2307_v55 }
 0xac4   :  { %4705 = vmatmul.mubr.msk.bf16.gmra.mxu1 %vm135_vm1, %v2320_v47 }
 0xac5   :  { %4708 = vmatprep.mubr.msk.bf16.mxu1 %vm135_vm1, %v2321_v16  ;;  %v2314_v16 = vmul.f32 %v2092_v38, %v5378_v59 }
 0xac7   :  { %v2326_v19 = vpack.c.bf16 %v2314_v16, %v2313_v11 }
 0xacc   :  { %4709 = vmatmul.mubr.msk.bf16.gmra.mxu1 %vm135_vm1, %v2322_v36 }
 0xacd   :  { %4712 = vmatprep.mubr.msk.bf16.mxu1 %vm135_vm1, %v2323_v63 }
 0xad4   :  { %4713 = vmatmul.mubr.msk.bf16.gmra.mxu1 %vm135_vm1, %v2324_v46 }
 0xad5   :  { %4716 = vmatprep.mubr.msk.bf16.mxu1 %vm135_vm1, %v2325_v5 }
 0xadc   :  { %4717 = vmatmul.mubr.msk.bf16.gmra.mxu1 %vm135_vm1, %v2326_v19 }
 0xadd   :  { %4758 = vmatprep.mubr.msk.bf16.mxu1 %vm5183_vm0, %v5182_v0 }
 0xb74   :  { %v4698_v27 = vpop.f32.mrf.mxu1 }
 0xb75   :  { %v6372_v39 = vadd.f32 %v4698_v27, %v5514_v57 }
 0xb76   :  { %v2409_v30 = vpop.f32.mrf.mxu1 }
 0xb77   :  { %v6369_v29 = vadd.f32 %v2409_v30, %v5521_v61  ;;  %v2510_v45 = vsel %vm721_vm7, %v6372_v39, -inf }
 0xb78   :  { %v4699_v3 = vpop.f32.mrf.mxu1 }
 0xb79   :  { %v2504_v46 = vsel %vm721_vm7, %v6369_v29, -inf  ;;  %v6380_v12 = vadd.f32 %v4699_v3, %v5528_v1 }
 0xb7a   :  { %v2412_v2 = vpop.f32.mrf.mxu1  ;;  %2505 = vmax.xlane.f32.xlu0 %v2504_v46 }
 0xb7b   :  { %v6377_v32 = vadd.f32 %v2412_v2, %v5537_v7  ;;  %v2513_v44 = vsel %vm721_vm7, %v6380_v12, -inf }
 0xb7c   :  { %v4702_v23 = vpop.f32.mrf.mxu1 }
 0xb7d   :  { %v2507_v35 = vsel %vm721_vm7, %v6377_v32, -inf  ;;  %v6390_v10 = vadd.f32 %v4702_v23, %v5521_v61 }
 0xb7e   :  { %v2425_v6 = vpop.f32.mrf.mxu1  ;;  %2508 = vmax.xlane.f32.xlu1 %v2507_v35  ;;  %2511 = vmax.xlane.f32.xlu0 %v2510_v45 }
 0xb7f   :  { %v6387_v38 = vadd.f32 %v2425_v6, %v5552_v15  ;;  %v2522_v13 = vsel %vm721_vm7, %v6390_v10, -inf }
 0xb80   :  { %v4703_v22 = vpop.f32.mrf.mxu1 }
 0xb81   :  { %v2516_v41 = vsel %vm721_vm7, %v6387_v38, -inf  ;;  %v6400_v20 = vadd.f32 %v4703_v22, %v5537_v7 }
 0xb82   :  { %v2428_v8 = vpop.f32.mrf.mxu1  ;;  %2514 = vmax.xlane.f32.xlu1 %v2513_v44  ;;  %2517 = vmax.xlane.f32.xlu0 %v2516_v41 }
 0xb83   :  { %v6397_v18 = vadd.f32 %v2428_v8, %v5561_v21  ;;  %v2525_v47 = vsel %vm721_vm7, %v6400_v20, -inf }
 0xb84   :  { %v4706_v42 = vpop.f32.mrf.mxu1 }
 0xb85   :  { %v2519_v54 = vsel %vm721_vm7, %v6397_v18, -inf  ;;  %v6410_v9 = vadd.f32 %v4706_v42, %v5552_v15 }
 0xb86   :  { %v2441_v43 = vpop.f32.mrf.mxu1  ;;  %2520 = vmax.xlane.f32.xlu1 %v2519_v54  ;;  %2523 = vmax.xlane.f32.xlu0 %v2522_v13 }
 0xb87   :  { %v6407_v62 = vadd.f32 %v2441_v43, %v5514_v57  ;;  %v2534_v50 = vsel %vm721_vm7, %v6410_v9, -inf }
 0xb88   :  { %v4707_v53 = vpop.f32.mrf.mxu1 }
 0xb89   :  { %v2528_v60 = vsel %vm721_vm7, %v6407_v62, -inf  ;;  %v6420_v36 = vadd.f32 %v4707_v53, %v5561_v21 }
 0xb8a   :  { %v2444_v40 = vpop.f32.mrf.mxu1  ;;  %2526 = vmax.xlane.f32.xlu1 %v2525_v47  ;;  %2529 = vmax.xlane.f32.xlu0 %v2528_v60 }
 0xb8b   :  { %v6417_v34 = vadd.f32 %v2444_v40, %v5528_v1  ;;  %v2537_v19 = vsel %vm721_vm7, %v6420_v36, -inf }
 0xb8c   :  { %v4710_v55 = vpop.f32.mrf.mxu1 }
 0xb8d   :  { %v2531_v63 = vsel %vm721_vm7, %v6417_v34, -inf  ;;  %v6430_v11 = vadd.f32 %v4710_v55, %v5514_v57 }
 0xb8e   :  { %v2457_v26 = vpop.f32.mrf.mxu1  ;;  %2532 = vmax.xlane.f32.xlu1 %v2531_v63  ;;  %2535 = vmax.xlane.f32.xlu0 %v2534_v50 }
 0xb8f   :  { %v6427_v5 = vadd.f32 %v2457_v26, %v5521_v61  ;;  %v2546_v35 = vsel %vm721_vm7, %v6430_v11, -inf }
 0xb90   :  { %v4711_v16 = vpop.f32.mrf.mxu1 }
 0xb91   :  { %v2540_v27 = vsel %vm721_vm7, %v6427_v5, -inf  ;;  %v6440_v2 = vadd.f32 %v4711_v16, %v5528_v1 }
 0xb92   :  { %v2460_v30 = vpop.f32.mrf.mxu1  ;;  %2538 = vmax.xlane.f32.xlu1 %v2537_v19  ;;  %2541 = vmax.xlane.f32.xlu0 %v2540_v27 }
 0xb93   :  { %v6437_v3 = vadd.f32 %v2460_v30, %v5537_v7  ;;  %v2549_v41 = vsel %vm721_vm7, %v6440_v2, -inf }
 0xb94   :  { %v4714_v46 = vpop.f32.mrf.mxu1 }
 0xb95   :  { %v2543_v23 = vsel %vm721_vm7, %v6437_v3, -inf  ;;  %v6450_v44 = vadd.f32 %v4714_v46, %v5521_v61 }
 0xb96   :  { %v2473_v45 = vpop.f32.mrf.mxu1  ;;  %2544 = vmax.xlane.f32.xlu1 %v2543_v23  ;;  %2547 = vmax.xlane.f32.xlu0 %v2546_v35 }
 0xb97   :  { %v6447_v6 = vadd.f32 %v2473_v45, %v5552_v15  ;;  %v2558_v53 = vsel %vm721_vm7, %v6450_v44, -inf }
 0xb98   :  { %v4715_v22 = vpop.f32.mrf.mxu1 }
 0xb99   :  { %v2552_v8 = vsel %vm721_vm7, %v6447_v6, -inf  ;;  %v6460_v43 = vadd.f32 %v4715_v22, %v5537_v7 }
 0xb9a   :  { %v2476_v42 = vpop.f32.mrf.mxu1  ;;  %2550 = vmax.xlane.f32.xlu1 %v2549_v41  ;;  %2553 = vmax.xlane.f32.xlu0 %v2552_v8 }
 0xb9b   :  { %v6457_v54 = vadd.f32 %v2476_v42, %v5561_v21  ;;  %v2561_v7 = vsel %vm721_vm7, %v6460_v43, -inf }
 0xb9c   :  { %v4718_v13 = vpop.f32.mrf.mxu1 }
 0xb9d   :  { %v2555_v61 = vsel %vm721_vm7, %v6457_v54, -inf  ;;  %v6470_v55 = vadd.f32 %v4718_v13, %v5552_v15 }
 0xb9e   :  { %v2489_v47 = vpop.f32.mrf.mxu1  ;;  %2556 = vmax.xlane.f32.xlu1 %v2555_v61  ;;  %2559 = vmax.xlane.f32.xlu0 %v2558_v53 }
 0xb9f   :  { %v6467_v60 = vadd.f32 %v2489_v47, %v5514_v57  ;;  %v2570_v15 = vsel %vm721_vm7, %v6470_v55, -inf }
 0xba0   :  { %v4719_v40 = vpop.f32.mrf.mxu1 }
 0xba1   :  { %v2564_v63 = vsel %vm721_vm7, %v6467_v60, -inf  ;;  %v6480_v16 = vadd.f32 %v4719_v40, %v5561_v21 }
 0xba2   :  { %v2492_v50 = vpop.f32.mrf.mxu1  ;;  %2562 = vmax.xlane.f32.xlu1 %v2561_v7  ;;  %2565 = vmax.xlane.f32.xlu0 %v2564_v63 }
 0xba3   :  { %v6477_v26 = vadd.f32 %v2492_v50, %v5528_v1  ;;  %v2573_v19 = vsel %vm721_vm7, %v6480_v16, -inf }
 0xba5   :  { %v2567_v57 = vsel %vm721_vm7, %v6477_v26, -inf }
 0xba6   :  { %2568 = vmax.xlane.f32.xlu1 %v2567_v57  ;;  %2571 = vmax.xlane.f32.xlu0 %v2570_v15 }
 0xbaa   :  { %2574 = vmax.xlane.f32.xlu1 %v2573_v19 }
 0xc03   :  { %v2506_v27 = vpop.xlane.xlu0 %2505 }
 0xc04   :  { %v2576_v30 = vsub.f32 %v6369_v29, %v2506_v27 }
 0xc06   :  { %v2600_v1 = vmul.f32 1.442695, %v2576_v30 }
 0xc07   :  { %v2509_v46 = vpop.xlane.xlu1 %2508  ;;  %v2512_v23 = vpop.xlane.xlu0 %2511 }
 0xc08   :  { %5038 = vpow2.f32 %v2600_v1  ;;  %v2577_v21 = vsub.f32 %v6377_v32, %v2509_v46  ;;  %v2578_v35 = vsub.f32 %v6372_v39, %v2512_v23 }
 0xc0a   :  { %v2602_v45 = vmul.f32 1.442695, %v2577_v21  ;;  %v2604_v22 = vmul.f32 1.442695, %v2578_v35 }
 0xc0b   :  { %v2515_v41 = vpop.xlane.xlu1 %2514  ;;  %v2518_v8 = vpop.xlane.xlu0 %2517 }
 0xc0c   :  { %5040 = vpow2.f32 %v2602_v45  ;;  %v2579_v42 = vsub.f32 %v6380_v12, %v2515_v41  ;;  %v2580_v13 = vsub.f32 %v6387_v38, %v2518_v8 }
 0xc0d   :  { %5042 = vpow2.f32 %v2604_v22 }
 0xc0e   :  { %v2606_v61 = vmul.f32 1.442695, %v2579_v42  ;;  %v2608_v29 = vmul.f32 1.442695, %v2580_v13 }
 0xc0f   :  { %v2521_v53 = vpop.xlane.xlu1 %2520  ;;  %v2524_v47 = vpop.xlane.xlu0 %2523 }
 0xc10   :  { %5044 = vpow2.f32 %v2606_v61  ;;  %v2581_v40 = vsub.f32 %v6397_v18, %v2521_v53  ;;  %v2582_v32 = vsub.f32 %v6390_v10, %v2524_v47 }
 0xc11   :  { %5046 = vpow2.f32 %v2608_v29 }
 0xc12   :  { %v2610_v39 = vmul.f32 1.442695, %v2581_v40  ;;  %v2612_v7 = vmul.f32 1.442695, %v2582_v32 }
 0xc13   :  { %v2527_v63 = vpop.xlane.xlu1 %2526  ;;  %v2530_v50 = vpop.xlane.xlu0 %2529 }
 0xc14   :  { %5048 = vpow2.f32 %v2610_v39  ;;  %v2583_v12 = vsub.f32 %v6400_v20, %v2527_v63  ;;  %v2584_v38 = vsub.f32 %v6407_v62, %v2530_v50 }
 0xc15   :  { %v6497_v57 = vpop.eup %5038  ;;  %5050 = vpow2.f32 %v2612_v7 }
 0xc16   :  { %v2614_v15 = vmul.f32 1.442695, %v2583_v12  ;;  %v2616_v19 = vmul.f32 1.442695, %v2584_v38  ;;  %v2648_v18 = vsel %vm721_vm7, %v6497_v57, 0.0 }
 0xc17   :  { %v2533_v27 = vpop.xlane.xlu1 %2532  ;;  %2649 = vadd.xlane.f32.xlu0 %v2648_v18  ;;  %v2536_v10 = vpop.xlane.xlu0 %2535 }
 0xc18   :  { %5052 = vpow2.f32 %v2614_v15  ;;  %v2585_v30 = vsub.f32 %v6417_v34, %v2533_v27  ;;  %v2586_v1 = vsub.f32 %v6410_v9, %v2536_v10 }
 0xc19   :  { %v6503_v46 = vpop.eup %5040  ;;  %5054 = vpow2.f32 %v2616_v19 }
 0xc1a   :  { %v6505_v20 = vpop.eup %5042  ;;  %v2618_v62 = vmul.f32 1.442695, %v2585_v30  ;;  %v2620_v23 = vmul.f32 1.442695, %v2586_v1  ;;  %v2651_v21 = vsel %vm721_vm7, %v6503_v46, 0.0 }
 0xc1b   :  { %2652 = vadd.xlane.f32.xlu1 %v2651_v21  ;;  %v2539_v35 = vpop.xlane.xlu1 %2538  ;;  %v2654_v45 = vsel %vm721_vm7, %v6505_v20, 0.0  ;;  %v2542_v22 = vpop.xlane.xlu0 %2541 }
 0xc1c   :  { %5056 = vpow2.f32 %v2618_v62  ;;  %v2587_v34 = vsub.f32 %v6420_v36, %v2539_v35  ;;  %2655 = vadd.xlane.f32.xlu0 %v2654_v45  ;;  %v2588_v9 = vsub.f32 %v6427_v5, %v2542_v22 }
 0xc1d   :  { %v6513_v41 = vpop.eup %5044  ;;  %5058 = vpow2.f32 %v2620_v23 }
 0xc1e   :  { %v6515_v8 = vpop.eup %5046  ;;  %v2622_v42 = vmul.f32 1.442695, %v2587_v34  ;;  %v2624_v13 = vmul.f32 1.442695, %v2588_v9  ;;  %v2657_v61 = vsel %vm721_vm7, %v6513_v41, 0.0 }
 0xc1f   :  { %2658 = vadd.xlane.f32.xlu1 %v2657_v61  ;;  %v2545_v29 = vpop.xlane.xlu1 %2544  ;;  %v2660_v53 = vsel %vm721_vm7, %v6515_v8, 0.0  ;;  %v2548_v47 = vpop.xlane.xlu0 %2547 }
 0xc20   :  { %5060 = vpow2.f32 %v2622_v42  ;;  %v2589_v36 = vsub.f32 %v6437_v3, %v2545_v29  ;;  %2661 = vadd.xlane.f32.xlu0 %v2660_v53  ;;  %v2590_v5 = vsub.f32 %v6430_v11, %v2548_v47 }
 0xc21   :  { %v6523_v40 = vpop.eup %5048  ;;  %5062 = vpow2.f32 %v2624_v13 }
 0xc22   :  { %v6525_v32 = vpop.eup %5050  ;;  %v2626_v39 = vmul.f32 1.442695, %v2589_v36  ;;  %v2628_v7 = vmul.f32 1.442695, %v2590_v5  ;;  %v2663_v63 = vsel %vm721_vm7, %v6523_v40, 0.0 }
 0xc23   :  { %2664 = vadd.xlane.f32.xlu1 %v2663_v63  ;;  %v2551_v50 = vpop.xlane.xlu1 %2550  ;;  %v2666_v12 = vsel %vm721_vm7, %v6525_v32, 0.0  ;;  %v2554_v38 = vpop.xlane.xlu0 %2553 }
 0xc24   :  { %5064 = vpow2.f32 %v2626_v39  ;;  %v2591_v3 = vsub.f32 %v6440_v2, %v2551_v50  ;;  %2667 = vadd.xlane.f32.xlu0 %v2666_v12  ;;  %v2592_v11 = vsub.f32 %v6447_v6, %v2554_v38 }
 0xc25   :  { %v6533_v15 = vpop.eup %5052  ;;  %5066 = vpow2.f32 %v2628_v7 }
 0xc26   :  { %v6535_v19 = vpop.eup %5054  ;;  %v2630_v18 = vmul.f32 1.442695, %v2591_v3  ;;  %v2632_v27 = vmul.f32 1.442695, %v2592_v11  ;;  %v2669_v10 = vsel %vm721_vm7, %v6533_v15, 0.0 }
 0xc27   :  { %2670 = vadd.xlane.f32.xlu1 %v2669_v10  ;;  %v2557_v30 = vpop.xlane.xlu1 %2556  ;;  %v2672_v1 = vsel %vm721_vm7, %v6535_v19, 0.0  ;;  %v2560_v62 = vpop.xlane.xlu0 %2559 }
 0xc28   :  { %5068 = vpow2.f32 %v2630_v18  ;;  %v2593_v2 = vsub.f32 %v6457_v54, %v2557_v30  ;;  %2673 = vadd.xlane.f32.xlu0 %v2672_v1  ;;  %v2594_v6 = vsub.f32 %v6450_v44, %v2560_v62 }
 0xc29   :  { %v6543_v23 = vpop.eup %5056  ;;  %5070 = vpow2.f32 %v2632_v27 }
 0xc2a   :  { %v6545_v21 = vpop.eup %5058  ;;  %v2634_v35 = vmul.f32 1.442695, %v2593_v2  ;;  %v2636_v45 = vmul.f32 1.442695, %v2594_v6  ;;  %v2675_v22 = vsel %vm721_vm7, %v6543_v23, 0.0 }
 0xc2b   :  { %2676 = vadd.xlane.f32.xlu1 %v2675_v22  ;;  %v2563_v34 = vpop.xlane.xlu1 %2562  ;;  %v2678_v9 = vsel %vm721_vm7, %v6545_v21, 0.0  ;;  %v2566_v42 = vpop.xlane.xlu0 %2565 }
 0xc2c   :  { %5072 = vpow2.f32 %v2634_v35  ;;  %v2595_v54 = vsub.f32 %v6460_v43, %v2563_v34  ;;  %2679 = vadd.xlane.f32.xlu0 %v2678_v9  ;;  %v2596_v44 = vsub.f32 %v6467_v60, %v2566_v42 }
 0xc2d   :  { %v6553_v13 = vpop.eup %5060  ;;  %5074 = vpow2.f32 %v2636_v45 }
 0xc2e   :  { %v6555_v61 = vpop.eup %5062  ;;  %v2638_v29 = vmul.f32 1.442695, %v2595_v54  ;;  %v2640_v53 = vmul.f32 1.442695, %v2596_v44  ;;  %v2681_v47 = vsel %vm721_vm7, %v6553_v13, 0.0 }
 0xc2f   :  { %2682 = vadd.xlane.f32.xlu1 %v2681_v47  ;;  %v2569_v36 = vpop.xlane.xlu1 %2568  ;;  %v2684_v5 = vsel %vm721_vm7, %v6555_v61, 0.0  ;;  %v2572_v39 = vpop.xlane.xlu0 %2571 }
 0xc30   :  { %5076 = vpow2.f32 %v2638_v29  ;;  %v2597_v43 = vsub.f32 %v6477_v26, %v2569_v36  ;;  %2685 = vadd.xlane.f32.xlu0 %v2684_v5  ;;  %v2598_v60 = vsub.f32 %v6470_v55, %v2572_v39 }
 0xc31   :  { %v6563_v7 = vpop.eup %5064  ;;  %5078 = vpow2.f32 %v2640_v53 }
 0xc32   :  { %v6565_v63 = vpop.eup %5066  ;;  %v2642_v50 = vmul.f32 1.442695, %v2597_v43  ;;  %v2644_v12 = vmul.f32 1.442695, %v2598_v60  ;;  %v2687_v38 = vsel %vm721_vm7, %v6563_v7, 0.0 }
 0xc33   :  { %2688 = vadd.xlane.f32.xlu1 %v2687_v38  ;;  %v2575_v3 = vpop.xlane.xlu1 %2574  ;;  %v2690_v11 = vsel %vm721_vm7, %v6565_v63, 0.0 }
 0xc34   :  { %5080 = vpow2.f32 %v2642_v50  ;;  %v2599_v26 = vsub.f32 %v6480_v16, %v2575_v3  ;;  %2691 = vadd.xlane.f32.xlu0 %v2690_v11 }
 0xc35   :  { %v6572_v55 = vpop.eup %5068  ;;  %5082 = vpow2.f32 %v2644_v12 }
 0xc36   :  { %v6574_v18 = vpop.eup %5070  ;;  %v2646_v27 = vmul.f32 1.442695, %v2599_v26  ;;  %v2693_v10 = vsel %vm721_vm7, %v6572_v55, 0.0 }
 0xc37   :  { %2694 = vadd.xlane.f32.xlu1 %v2693_v10  ;;  %v2696_v30 = vsel %vm721_vm7, %v6574_v18, 0.0 }
 0xc38   :  { %5084 = vpow2.f32 %v2646_v27  ;;  %2697 = vadd.xlane.f32.xlu0 %v2696_v30 }
 0xc39   :  { %v6580_v1 = vpop.eup %5072 }
 0xc3a   :  { %v6582_v62 = vpop.eup %5074  ;;  %v2699_v16 = vsel %vm721_vm7, %v6580_v1, 0.0 }
 0xc3b   :  { %2700 = vadd.xlane.f32.xlu1 %v2699_v16  ;;  %v2702_v2 = vsel %vm721_vm7, %v6582_v62, 0.0 }
 0xc3c   :  { %2703 = vadd.xlane.f32.xlu0 %v2702_v2 }
 0xc3d   :  { %v6588_v6 = vpop.eup %5076 }
 0xc3e   :  { %v6590_v35 = vpop.eup %5078  ;;  %v2705_v45 = vsel %vm721_vm7, %v6588_v6, 0.0 }
 0xc3f   :  { %2706 = vadd.xlane.f32.xlu1 %v2705_v45  ;;  %v2708_v22 = vsel %vm721_vm7, %v6590_v35, 0.0 }
 0xc40   :  { %2709 = vadd.xlane.f32.xlu0 %v2708_v22 }
 0xc41   :  { %v6596_v34 = vpop.eup %5080 }
 0xc42   :  { %v6598_v9 = vpop.eup %5082  ;;  %v2711_v42 = vsel %vm721_vm7, %v6596_v34, 0.0 }
 0xc43   :  { %2712 = vadd.xlane.f32.xlu1 %v2711_v42  ;;  %v2714_v54 = vsel %vm721_vm7, %v6598_v9, 0.0 }
 0xc44   :  { %2715 = vadd.xlane.f32.xlu0 %v2714_v54 }
 0xc45   :  { %v6604_v44 = vpop.eup %5084 }
 0xc46   :  { %v2717_v29 = vsel %vm721_vm7, %v6604_v44, 0.0 }
 0xc47   :  { %2718 = vadd.xlane.f32.xlu1 %v2717_v29 }
 0xca0   :  { %v2650_v53 = vpop.xlane.xlu0 %2649 }
 0xca1   :  { %5086 = vrcp.f32 %v2650_v53 }
 0xca4   :  { %v2653_v47 = vpop.xlane.xlu1 %2652 }
 0xca5   :  { %5088 = vrcp.f32 %v2653_v47  ;;  %v2656_v36 = vpop.xlane.xlu0 %2655 }
 0xca6   :  { %5090 = vrcp.f32 %v2656_v36 }
 0xca8   :  { %v2659_v5 = vpop.xlane.xlu1 %2658 }
 0xca9   :  { %5092 = vrcp.f32 %v2659_v5  ;;  %v2662_v39 = vpop.xlane.xlu0 %2661 }
 0xcaa   :  { %5094 = vrcp.f32 %v2662_v39 }
 0xcac   :  { %v2665_v43 = vpop.xlane.xlu1 %2664 }
 0xcad   :  { %5096 = vrcp.f32 %v2665_v43  ;;  %v2668_v60 = vpop.xlane.xlu0 %2667 }
 0xcae   :  { %5098 = vrcp.f32 %v2668_v60  ;;  %v5087_v50 = vpop.eup %5086 }
 0xcaf   :  { %v2744_v11 = vmul.f32 %v5087_v50, %v6497_v57 }
 0xcb0   :  { %v2671_v12 = vpop.xlane.xlu1 %2670 }
 0xcb1   :  { %5100 = vrcp.f32 %v2671_v12  ;;  %v2674_v38 = vpop.xlane.xlu0 %2673 }
 0xcb2   :  { %v5089_v3 = vpop.eup %5088  ;;  %5102 = vrcp.f32 %v2674_v38 }
 0xcb3   :  { %v2745_v26 = vmul.f32 %v5089_v3, %v6503_v46  ;;  %v5091_v27 = vpop.eup %5090 }
 0xcb4   :  { %v2677_v10 = vpop.xlane.xlu1 %2676  ;;  %v2746_v45 = vmul.f32 %v5091_v27, %v6505_v20 }
 0xcb5   :  { %5104 = vrcp.f32 %v2677_v10  ;;  %v2680_v30 = vpop.xlane.xlu0 %2679  ;;  %v2768_v16 = vpack.c.bf16 %v2745_v26, %v2744_v11 }
 0xcb6   :  { %v5093_v2 = vpop.eup %5092  ;;  %5106 = vrcp.f32 %v2680_v30 }
 0xcb7   :  { %v2747_v22 = vmul.f32 %v5093_v2, %v6513_v41  ;;  %4726 = vmatprep.mubr.msk.bf16.mxu0 %vm721_vm7, %v2768_v16  ;;  %v5095_v42 = vpop.eup %5094 }
 0xcb8   :  { %v2683_v54 = vpop.xlane.xlu1 %2682  ;;  %v2748_v46 = vmul.f32 %v5095_v42, %v6515_v8 }
 0xcb9   :  { %v2769_v29 = vpack.c.bf16 %v2747_v22, %v2746_v45  ;;  %5108 = vrcp.f32 %v2683_v54  ;;  %v2686_v57 = vpop.xlane.xlu0 %2685 }
 0xcba   :  { %v5097_v53 = vpop.eup %5096  ;;  %5110 = vrcp.f32 %v2686_v57 }
 0xcbb   :  { %4727 = vmatmul.mubr.msk.bf16.vlgmr.msra.gmra.mxu0 %vm721_vm7, %v2769_v29  ;;  %v2749_v47 = vmul.f32 %v5097_v53, %v6523_v40  ;;  %v5099_v36 = vpop.eup %5098 }
 0xcbc   :  { %v2689_v20 = vpop.xlane.xlu1 %2688  ;;  %v2750_v43 = vmul.f32 %v5099_v36, %v6525_v32 }
 0xcbd   :  { %5112 = vrcp.f32 %v2689_v20  ;;  %v2692_v41 = vpop.xlane.xlu0 %2691  ;;  %v2770_v5 = vpack.c.bf16 %v2749_v47, %v2748_v46 }
 0xcbe   :  { %v5101_v39 = vpop.eup %5100  ;;  %5114 = vrcp.f32 %v2692_v41 }
 0xcbf   :  { %4730 = vmatprep.mubr.msk.bf16.mxu0 %vm721_vm7, %v2770_v5  ;;  %v2751_v60 = vmul.f32 %v5101_v39, %v6533_v15  ;;  %v5103_v50 = vpop.eup %5102 }
 0xcc0   :  { %v2695_v12 = vpop.xlane.xlu1 %2694  ;;  %v2752_v40 = vmul.f32 %v5103_v50, %v6535_v19 }
 0xcc1   :  { %5116 = vrcp.f32 %v2695_v12  ;;  %v2698_v38 = vpop.xlane.xlu0 %2697  ;;  %v2771_v8 = vpack.c.bf16 %v2751_v60, %v2750_v43 }
 0xcc2   :  { %v5105_v3 = vpop.eup %5104  ;;  %5118 = vrcp.f32 %v2698_v38 }
 0xcc3   :  { %4731 = vmatmul.mubr.msk.bf16.gmra.mxu0 %vm721_vm7, %v2771_v8  ;;  %v2753_v11 = vmul.f32 %v5105_v3, %v6543_v23  ;;  %v5107_v26 = vpop.eup %5106 }
 0xcc4   :  { %v2701_v27 = vpop.xlane.xlu1 %2700  ;;  %v2754_v15 = vmul.f32 %v5107_v26, %v6545_v21 }
 0xcc5   :  { %5120 = vrcp.f32 %v2701_v27  ;;  %v2704_v10 = vpop.xlane.xlu0 %2703  ;;  %v2772_v32 = vpack.c.bf16 %v2753_v11, %v2752_v40 }
 0xcc6   :  { %v5109_v30 = vpop.eup %5108  ;;  %5122 = vrcp.f32 %v2704_v10 }
 0xcc7   :  { %4734 = vmatprep.mubr.msk.bf16.mxu0 %vm721_vm7, %v2772_v32  ;;  %v2755_v16 = vmul.f32 %v5109_v30, %v6553_v13  ;;  %v5111_v2 = vpop.eup %5110 }
 0xcc8   :  { %v2707_v45 = vpop.xlane.xlu1 %2706  ;;  %v2756_v23 = vmul.f32 %v5111_v2, %v6555_v61 }
 0xcc9   :  { %5124 = vrcp.f32 %v2707_v45  ;;  %v2710_v22 = vpop.xlane.xlu0 %2709  ;;  %v2773_v19 = vpack.c.bf16 %v2755_v16, %v2754_v15 }
 0xcca   :  { %v5113_v42 = vpop.eup %5112  ;;  %5126 = vrcp.f32 %v2710_v22 }
 0xccb   :  { %4735 = vmatmul.mubr.msk.bf16.gmra.mxu0 %vm721_vm7, %v2773_v19  ;;  %v2757_v54 = vmul.f32 %v5113_v42, %v6563_v7  ;;  %v5115_v29 = vpop.eup %5114 }
 0xccc   :  { %v2713_v57 = vpop.xlane.xlu1 %2712  ;;  %v2758_v13 = vmul.f32 %v5115_v29, %v6565_v63 }
 0xccd   :  { %5128 = vrcp.f32 %v2713_v57  ;;  %v2716_v53 = vpop.xlane.xlu0 %2715  ;;  %v2774_v21 = vpack.c.bf16 %v2757_v54, %v2756_v23 }
 0xcce   :  { %v5117_v46 = vpop.eup %5116  ;;  %5130 = vrcp.f32 %v2716_v53 }
 0xccf   :  { %4738 = vmatprep.mubr.msk.bf16.mxu0 %vm721_vm7, %v2774_v21  ;;  %v2759_v47 = vmul.f32 %v5117_v46, %v6572_v55  ;;  %v5119_v36 = vpop.eup %5118 }
 0xcd0   :  { %v2719_v20 = vpop.xlane.xlu1 %2718  ;;  %v2760_v7 = vmul.f32 %v5119_v36, %v6574_v18 }
 0xcd1   :  { %5132 = vrcp.f32 %v2719_v20  ;;  %v2775_v41 = vpack.c.bf16 %v2759_v47, %v2758_v13 }
 0xcd2   :  { %v5121_v61 = vpop.eup %5120 }
 0xcd3   :  { %4739 = vmatmul.mubr.msk.bf16.gmra.mxu0 %vm721_vm7, %v2775_v41  ;;  %v2761_v5 = vmul.f32 %v5121_v61, %v6580_v1  ;;  %v5123_v39 = vpop.eup %5122 }
 0xcd4   :  { %v2762_v63 = vmul.f32 %v5123_v39, %v6582_v62 }
 0xcd5   :  { %v2776_v43 = vpack.c.bf16 %v2761_v5, %v2760_v7 }
 0xcd6   :  { %v5125_v60 = vpop.eup %5124 }
 0xcd7   :  { %4742 = vmatprep.mubr.msk.bf16.mxu0 %vm721_vm7, %v2776_v43  ;;  %v2763_v55 = vmul.f32 %v5125_v60, %v6588_v6  ;;  %v5127_v50 = vpop.eup %5126  ;;  %v4850_v6 = vld [vmem:[%s7030_s1 + $0x118] sm:$0xff]  }
 0xcd8   :  { %v2764_v8 = vmul.f32 %v5127_v50, %v6590_v35  ;;  %4751 = vmatpush3.bf16.msra.mxu1 %v4850_v6  ;;  %v4851_v35 = vld [vmem:[%s7030_s1 + $0x110] sm:$0xff]  }
 0xcd9   :  { %v2777_v12 = vpack.c.bf16 %v2763_v55, %v2762_v63  ;;  %4752 = vmatprep.subr.bf16.mxu1 %v5182_v0 }
 0xcda   :  { %v5129_v38 = vpop.eup %5128 }
 0xcdb   :  { %4743 = vmatmul.mubr.msk.bf16.gmra.mxu0 %vm721_vm7, %v2777_v12  ;;  %v2765_v18 = vmul.f32 %v5129_v38, %v6596_v34  ;;  %v5131_v3 = vpop.eup %5130  ;;  %v4852_v34 = vld [vmem:[%s7030_s1 + $0x108] sm:$0xff]  }
 0xcdc   :  { %v2766_v11 = vmul.f32 %v5131_v3, %v6598_v9  ;;  %4753 = vmatpush3.bf16.msra.mxu1 %v4851_v35  ;;  %v4853_v9 = vld [vmem:[%s7030_s1 + $0x100] sm:$0xff]  }
 0xcdd   :  { %v2778_v1 = vpack.c.bf16 %v2765_v18, %v2764_v8  ;;  %4754 = vmatprep.subr.bf16.mxu1 %v5182_v0 }
 0xcde   :  { %v5133_v40 = vpop.eup %5132 }
 0xcdf   :  { %4746 = vmatprep.mubr.msk.bf16.mxu0 %vm721_vm7, %v2778_v1  ;;  %v2767_v62 = vmul.f32 %v5133_v40, %v6604_v44 }
 0xce0   :  { %4755 = vmatpush3.bf16.msra.mxu1 %v4852_v34 }
 0xce1   :  { %v2779_v26 = vpack.c.bf16 %v2767_v62, %v2766_v11  ;;  %4756 = vmatprep.subr.bf16.mxu1 %v5182_v0 }
 0xce3   :  { %4747 = vmatmul.mubr.msk.bf16.gmra.mxu0 %vm721_vm7, %v2779_v26 }
 0xce4   :  { %3318 = vmatprep.mubr.bf16.mxu0 %v5185_v14  ;;  %4757 = vmatpush3.bf16.msra.mxu1 %v4853_v9 }
 0xd7b   :  { %v4728_v44 = vpop.f32.mrf.mxu0 }
 0xd7c   :  { %v2950_v40 = vmul.f32 %v4728_v44, %v5375_v56 }
 0xd7d   :  { %v2853_v27 = vpop.f32.mrf.mxu0 }
 0xd7e   :  { %v2948_v13 = vmul.f32 %v2853_v27, %v5375_v56 }
 0xd7f   :  { %v4729_v10 = vpop.f32.mrf.mxu0 }
 0xd80   :  { %v2951_v11 = vmul.f32 %v4729_v10, %v5375_v56 }
 0xd81   :  { %v2856_v32 = vpop.f32.mrf.mxu0 }
 0xd82   :  { %v2949_v47 = vmul.f32 %v2856_v32, %v5375_v56 }
 0xd83   :  { %v4732_v30 = vpop.f32.mrf.mxu0 }
 0xd84   :  { %v2954_v53 = vmul.f32 %v4732_v30, %v5437_v17 }
 0xd85   :  { %v2869_v15 = vpop.f32.mrf.mxu0 }
 0xd86   :  { %v2972_v61 = vadd.f32 %v2954_v53, %v2948_v13 }
 0xd87   :  { %v4733_v16 = vpop.f32.mrf.mxu0 }
 0xd88   :  { %v2955_v21 = vmul.f32 %v4733_v16, %v5437_v17 }
 0xd89   :  { %v2872_v2 = vpop.f32.mrf.mxu0 }
 0xd8a   :  { %v2973_v7 = vadd.f32 %v2955_v21, %v2949_v47  ;;  %v2953_v16 = vmul.f32 %v2872_v2, %v5375_v56 }
 0xd8b   :  { %v4736_v45 = vpop.f32.mrf.mxu0 }
 0xd8d   :  { %v2885_v22 = vpop.f32.mrf.mxu0 }
 0xd8e   :  { %v2956_v8 = vmul.f32 %v2885_v22, %v5437_v17  ;;  %v2958_v22 = vmul.f32 %v4736_v45, %v5437_v17 }
 0xd8f   :  { %v4737_v19 = vpop.f32.mrf.mxu0 }
 0xd90   :  { %v2974_v35 = vadd.f32 %v2956_v8, %v2950_v40  ;;  %v2959_v32 = vmul.f32 %v4737_v19, %v5437_v17 }
 0xd91   :  { %v2888_v42 = vpop.f32.mrf.mxu0 }
 0xd92   :  { %v2957_v18 = vmul.f32 %v2888_v42, %v5437_v17 }
 0xd93   :  { %v4740_v23 = vpop.f32.mrf.mxu0 }
 0xd94   :  { %v2962_v62 = vmul.f32 %v4740_v23, %v5453_v28  ;;  %v2975_v34 = vadd.f32 %v2957_v18, %v2951_v11 }
 0xd95   :  { %v2901_v54 = vpop.f32.mrf.mxu0 }
 0xd96   :  { %v2960_v36 = vmul.f32 %v2901_v54, %v5453_v28  ;;  %v2980_v44 = vadd.f32 %v2974_v35, %v2962_v62 }
 0xd97   :  { %v4741_v29 = vpop.f32.mrf.mxu0 }
 0xd98   :  { %v2978_v43 = vadd.f32 %v2972_v61, %v2960_v36  ;;  %v2963_v26 = vmul.f32 %v4741_v29, %v5453_v28  ;;  %v2952_v29 = vmul.f32 %v2869_v15, %v5375_v56  ;;  %v4167_v56 = vld [vmem:[%s7032_s4 + $0xd] ss:$0 sm:$0xff] }
 0xd99   :  { %v2904_v57 = vpop.f32.mrf.mxu0 }
 0xd9a   :  { %v2961_v20 = vmul.f32 %v2904_v57, %v5453_v28  ;;  %v2981_v30 = vadd.f32 %v2975_v34, %v2963_v26  ;;  %v2977_v57 = vadd.f32 %v2959_v32, %v2953_v16 }
 0xd9b   :  { %v4744_v46 = vpop.f32.mrf.mxu0 }
 0xd9c   :  { %v2966_v5 = vmul.f32 %v4744_v46, %v5378_v59  ;;  %v2979_v60 = vadd.f32 %v2973_v7, %v2961_v20  ;;  %v2976_v46 = vadd.f32 %v2958_v22, %v2952_v29 }
 0xd9d   :  { %v2917_v41 = vpop.f32.mrf.mxu0 }
 0xd9e   :  { %v2984_v50 = vadd.f32 %v2978_v43, %v2966_v5  ;;  %v2964_v53 = vmul.f32 %v2917_v41, %v5453_v28 }
 0xd9f   :  { %v4745_v39 = vpop.f32.mrf.mxu0 }
 0xda0   :  { %v2967_v63 = vmul.f32 %v4745_v39, %v5378_v59  ;;  %v2982_v17 = vadd.f32 %v2976_v46, %v2964_v53 }
 0xda1   :  { %v2920_v55 = vpop.f32.mrf.mxu0 }
 0xda2   :  { %v2985_v12 = vadd.f32 %v2979_v60, %v2967_v63  ;;  %v2965_v42 = vmul.f32 %v2920_v55, %v5453_v28 }
 0xda3   :  { %v4748_v38 = vpop.f32.mrf.mxu0 }
 0xda4   :  { %v2990_v3 = vpack.c.bf16 %v2985_v12, %v2984_v50  ;;  %v2983_v13 = vadd.f32 %v2977_v57, %v2965_v42  ;;  %v2970_v47 = vmul.f32 %v4748_v38, %v5378_v59 }
 0xda5   :  { %v2933_v1 = vpop.f32.mrf.mxu0 }
 0xda6   :  { %4759 = vmatmul.mubr.msk.bf16.vlgmr.msra.gmra.mxu1 %vm135_vm1, %v2990_v3  ;;  %v2968_v9 = vmul.f32 %v2933_v1, %v5378_v59  ;;  %v2988_v45 = vadd.f32 %v2982_v17, %v2970_v47 }
 0xda7   :  { %v4749_v6 = vpop.f32.mrf.mxu0  ;;  %4762 = vmatprep.mubr.msk.bf16.mxu1 %vm5183_vm0, %v5182_v0 }
 0xda8   :  { %v2986_v23 = vadd.f32 %v2980_v44, %v2968_v9  ;;  %v2971_v21 = vmul.f32 %v4749_v6, %v5378_v59  ;;  %v4856_v9 = vld [vmem:[%s7033_s2 + $0x74] ss:$8 sps:$4 sm:$0xff]  }
 0xda9   :  { %v2936_v27 = vpop.f32.mrf.mxu0  ;;  %3294 = vmatprep.subr.bf16.mxu0 %v4856_v9 }
 0xdaa   :  { %v2969_v10 = vmul.f32 %v2936_v27, %v5378_v59  ;;  %v2989_v2 = vadd.f32 %v2983_v13, %v2971_v21 }
 0xdac   :  { %v2987_v54 = vadd.f32 %v2981_v30, %v2969_v10  ;;  %v2992_v36 = vpack.c.bf16 %v2989_v2, %v2988_v45 }
 0xdae   :  { %v2991_v19 = vpack.c.bf16 %v2987_v54, %v2986_v23 }
 0xdb0   :  { %4763 = vmatmul.mubr.msk.bf16.gmra.mxu1 %vm135_vm1, %v2991_v19 }
 0xdb1   :  { %4766 = vmatprep.mubr.msk.bf16.mxu1 %vm5183_vm0, %v5182_v0 }
 0xdb8   :  { %4767 = vmatmul.mubr.msk.bf16.gmra.mxu1 %vm135_vm1, %v2992_v36 }
 0xe66   :  { %v3077_v28 = vpop.f32.mrf.mxu1 }
 0xe67   :  { %v3078_v15 = vadd.f32 %v4167_v56, %v3077_v28 }
 0xe68   :  { %v4760_v20 = vpop.f32.mrf.mxu1 }
 0xe69   :  { %v3100_v59 = vadd.f32 %v3078_v15, %v6216_v25 }
 0xe6a   :  { %v3080_v41 = vpop.f32.mrf.mxu1 }
 0xe6b   :  { %v3081_v61 = vadd.f32 %v4167_v56, %v3080_v41  ;;  %v3110_v7 = vsel %vm135_vm1, %v3100_v59, 0.0 }
 0xe6c   :  { %3111 = vadd.xlane.f32.xlu0 %v3110_v7  ;;  %v4761_v5 = vpop.f32.mrf.mxu1  ;;  %v4857_v7 = vld [vmem:[%s7033_s2 + $0x60] ss:$8 sps:$4 sm:$0xff]  }
 0xe6d   :  { %v3101_v39 = vadd.f32 %v3081_v61, %v6218_v37  ;;  %v4859_v61 = vld [vmem:[%s7033_s2 + $0x64] ss:$8 sps:$4 sm:$0xff]   ;;  %v4862_v5 = vld [vmem:[%s7033_s2 + $0x54] ss:$8 sps:$4 sm:$0xff]  }
 0xe6f   :  { %v3113_v43 = vsel %vm135_vm1, %v3101_v39, 0.0 }
 0xe70   :  { %3114 = vadd.xlane.f32.xlu1 %v3113_v43  ;;  %v3085_v60 = vpop.f32.mrf.mxu1  ;;  %v4865_v43 = vld [vmem:[%s7033_s2 + $0x44] ss:$8 sps:$4 sm:$0xff]  }
 0xe71   :  { %v3086_v63 = vadd.f32 %v4167_v56, %v3085_v60  ;;  %v4863_v60 = vld [vmem:[%s7033_s2 + $0x40] ss:$8 sps:$4 sm:$0xff]  }
 0xe72   :  { %v4764_v55 = vpop.f32.mrf.mxu1 }
 0xe73   :  { %v3102_v50 = vadd.f32 %v3086_v63, %v6237_v24 }
 0xe74   :  { %v3088_v12 = vpop.f32.mrf.mxu1 }
 0xe75   :  { %v3089_v38 = vadd.f32 %v4167_v56, %v3088_v12  ;;  %v3116_v25 = vsel %vm135_vm1, %v3102_v50, 0.0 }
 0xe76   :  { %3117 = vadd.xlane.f32.xlu0 %v3116_v25  ;;  %v4765_v8 = vpop.f32.mrf.mxu1 }
 0xe77   :  { %v3103_v18 = vadd.f32 %v3089_v38, %v6239_v4  ;;  %v4854_v4 = vld [vmem:[%s7033_s2 + $0x70] ss:$8 sps:$4 sm:$0xff]  }
 0xe78   :  { %v3093_v3 = vpop.f32.mrf.mxu1  ;;  %3295 = vmatpush1.bf16.msra.mxu0 %v4854_v4 }
 0xe79   :  { %v3094_v1 = vadd.f32 %v4167_v56, %v3093_v3  ;;  %v3119_v37 = vsel %vm135_vm1, %v3103_v18, 0.0  ;;  %3296 = vmatprep.subr.bf16.mxu0 %v4859_v61  ;;  %v4870_v61 = vld [vmem:[%s7034_s3 + $0xe8] sm:$0xff]  }
 0xe7a   :  { %3120 = vadd.xlane.f32.xlu1 %v3119_v37  ;;  %v4768_v40 = vpop.f32.mrf.mxu1 }
 0xe7b   :  { %v3104_v11 = vadd.f32 %v3094_v1, %v6259_v58 }
 0xe7c   :  { %v3096_v62 = vpop.f32.mrf.mxu1  ;;  %3297 = vmatpush1.bf16.msra.mxu0 %v4857_v7  ;;  %v4871_v7 = vld [vmem:[%s7034_s3 + $0xa8] sm:$0xff]  }
 0xe7d   :  { %v3097_v26 = vadd.f32 %v4167_v56, %v3096_v62  ;;  %v3122_v24 = vsel %vm135_vm1, %v3104_v11, 0.0  ;;  %3298 = vmatprep.subr.bf16.mxu0 %v4862_v5  ;;  %v4872_v5 = vld [vmem:[%s7034_s3 + $0xe0] sm:$0xff]  }
 0xe7e   :  { %3123 = vadd.xlane.f32.xlu0 %v3122_v24  ;;  %v4769_v6 = vpop.f32.mrf.mxu1 }
 0xe7f   :  { %v3105_v35 = vadd.f32 %v3097_v26, %v6261_v52  ;;  %v4177_v6 = vld [vmem:[%s7032_s4 + $0xe] ss:$0 sm:$0xff] }
 0xe81   :  { %v3125_v34 = vsel %vm135_vm1, %v3105_v35, 0.0 }
 0xe82   :  { %3126 = vadd.xlane.f32.xlu1 %v3125_v34 }
 0xef5   :  { %v3112_v58 = vpop.xlane.xlu0 %3111 }
 0xef6   :  { %v3128_v27 = vmul.f32 0.015625, %v3112_v58 }
 0xef8   :  { %v6712_v32 = vsub.f32 %v3100_v59, %v3128_v27 }
 0xef9   :  { %v3115_v44 = vpop.xlane.xlu1 %3114 }
 0xefa   :  { %v3129_v30 = vmul.f32 0.015625, %v3115_v44  ;;  %v3140_v52 = vmul.f32 %v6712_v32, %v6712_v32  ;;  %v4178_v44 = vld [vmem:[%s7032_s4 + $0xf] ss:$0 sm:$0xff] }
 0xefc   :  { %v6716_v10 = vsub.f32 %v3101_v39, %v3129_v30  ;;  %v3146_v16 = vsel %vm135_vm1, %v3140_v52, 0.0  ;;  %v4860_v39 = vld [vmem:[%s7033_s2 + $0x50] ss:$8 sps:$4 sm:$0xff]  }
 0xefd   :  { %3147 = vadd.xlane.f32.xlu0 %v3146_v16  ;;  %3299 = vmatpush1.bf16.msra.mxu0 %v4860_v39  ;;  %v4873_v39 = vld [vmem:[%s7034_s3 + $0xa0] sm:$0xff]  }
 0xefe   :  { %v3141_v22 = vmul.f32 %v6716_v10, %v6716_v10  ;;  %3300 = vmatprep.subr.bf16.mxu0 %v4865_v43  ;;  %v4874_v43 = vld [vmem:[%s7034_s3 + $0xd8] sm:$0xff]  }
 0xeff   :  { %v3118_v42 = vpop.xlane.xlu0 %3117 }
 0xf00   :  { %v3130_v23 = vmul.f32 0.015625, %v3118_v42  ;;  %v3149_v54 = vsel %vm135_vm1, %v3141_v22, 0.0 }
 0xf01   :  { %3150 = vadd.xlane.f32.xlu1 %v3149_v54  ;;  %3301 = vmatpush1.bf16.msra.mxu0 %v4863_v60  ;;  %v4875_v60 = vld [vmem:[%s7034_s3 + $0x98] sm:$0xff]  }
 0xf02   :  { %v6722_v29 = vsub.f32 %v3102_v50, %v3130_v23  ;;  %4770 = vmatprep.subr.bf16.mxu0 %v5182_v0 }
 0xf03   :  { %v3121_v57 = vpop.xlane.xlu1 %3120 }
 0xf04   :  { %v3131_v53 = vmul.f32 0.015625, %v3121_v57  ;;  %v3142_v21 = vmul.f32 %v6722_v29, %v6722_v29 }
 0xf06   :  { %v6726_v19 = vsub.f32 %v3103_v18, %v3131_v53  ;;  %v3152_v46 = vsel %vm135_vm1, %v3142_v21, 0.0 }
 0xf07   :  { %3153 = vadd.xlane.f32.xlu0 %v3152_v46  ;;  %v3124_v13 = vpop.xlane.xlu0 %3123 }
 0xf08   :  { %v3132_v47 = vmul.f32 0.015625, %v3124_v13  ;;  %v3143_v17 = vmul.f32 %v6726_v19, %v6726_v19 }
 0xf0a   :  { %v6731_v2 = vsub.f32 %v3104_v11, %v3132_v47  ;;  %v3155_v45 = vsel %vm135_vm1, %v3143_v17, 0.0 }
 0xf0b   :  { %3156 = vadd.xlane.f32.xlu1 %v3155_v45  ;;  %v3127_v36 = vpop.xlane.xlu1 %3126 }
 0xf0c   :  { %v3133_v56 = vmul.f32 0.015625, %v3127_v36  ;;  %v3144_v28 = vmul.f32 %v6731_v2, %v6731_v2 }
 0xf0e   :  { %v6736_v15 = vsub.f32 %v3105_v35, %v3133_v56  ;;  %v3158_v20 = vsel %vm135_vm1, %v3144_v28, 0.0 }
 0xf0f   :  { %3159 = vadd.xlane.f32.xlu0 %v3158_v20  ;;  %v4867_v20 = vld [vmem:[%s7034_s3 + $0xb8] sm:$0xff]  }
 0xf10   :  { %v3145_v59 = vmul.f32 %v6736_v15, %v6736_v15 }
 0xf12   :  { %v3161_v41 = vsel %vm135_vm1, %v3145_v59, 0.0  ;;  %v4868_v59 = vld [vmem:[%s7034_s3 + $0xf0] sm:$0xff]  }
 0xf13   :  { %3162 = vadd.xlane.f32.xlu1 %v3161_v41  ;;  %v4869_v41 = vld [vmem:[%s7034_s3 + $0xb0] sm:$0xff]  }
 0xf86   :  { %v3148_v63 = vpop.xlane.xlu0 %3147 }
 0xf87   :  { %v3164_v55 = vmul.f32 0.015625, %v3148_v63  ;;  %v4876_v63 = vld [vmem:[%s7034_s3 + $0xd0] sm:$0xff]  }
 0xf89   :  { %v3170_v50 = vadd.f32 1e-05, %v3164_v55  ;;  %v4877_v55 = vld [vmem:[%s7034_s3 + $0x90] sm:$0xff]  }
 0xf8a   :  { %v3151_v12 = vpop.xlane.xlu1 %3150 }
 0xf8b   :  { %5134 = vrsqrt.f32 %v3170_v50  ;;  %v3165_v38 = vmul.f32 0.015625, %v3151_v12  ;;  %v4878_v50 = vld [vmem:[%s7034_s3 + $0xc8] sm:$0xff]  }
 0xf8c   :  { %v4879_v12 = vld [vmem:[%s7034_s3 + $0x88] sm:$0xff]  }
 0xf8d   :  { %v3171_v25 = vadd.f32 1e-05, %v3165_v38  ;;  %v4880_v38 = vld [vmem:[%s7034_s3 + $0xc0] sm:$0xff]  }
 0xf8f   :  { %5136 = vrsqrt.f32 %v3171_v25  ;;  %v4881_v25 = vld [vmem:[%s7034_s3 + $0x80] sm:$0xff]  }
 0xf90   :  { %v3154_v8 = vpop.xlane.xlu0 %3153 }
 0xf91   :  { %v3166_v18 = vmul.f32 0.015625, %v3154_v8  ;;  %v4187_v8 = vld [vmem:[%s7035_s5 + $0x2] sm:$0x3] }
 0xf93   :  { %v3172_v3 = vadd.f32 1e-05, %v3166_v18  ;;  %v6850_v18 = vrot.slane %v4187_v8, %v6020_v33 }
 0xf94   :  { %v3157_v1 = vpop.xlane.xlu1 %3156 }
 0xf95   :  { %5138 = vrsqrt.f32 %v3172_v3  ;;  %v3167_v37 = vmul.f32 0.015625, %v3157_v1  ;;  %v6853_v3 = vrot.slane %v4187_v8, %v6026_v31 }
 0xf97   :  { %v3173_v40 = vadd.f32 1e-05, %v3167_v37 }
 0xf98   :  { %v5135_v11 = vpop.eup %5134  ;;  %v3160_v62 = vpop.xlane.xlu0 %3159 }
 0xf99   :  { %v3182_v26 = vmul.f32 %v5135_v11, %v6712_v32  ;;  %5140 = vrsqrt.f32 %v3173_v40  ;;  %v3168_v24 = vmul.f32 0.015625, %v3160_v62 }
 0xf9b   :  { %v3174_v35 = vadd.f32 1e-05, %v3168_v24  ;;  %v3194_v9 = vmul.f32 %v4177_v6, %v3182_v26 }
 0xf9c   :  { %v5137_v34 = vpop.eup %5136  ;;  %v3163_v4 = vpop.xlane.xlu1 %3162 }
 0xf9d   :  { %v3183_v58 = vmul.f32 %v5137_v34, %v6716_v10  ;;  %5142 = vrsqrt.f32 %v3174_v35  ;;  %v3169_v27 = vmul.f32 0.015625, %v3163_v4  ;;  %v6769_v52 = vadd.f32 %v4178_v44, %v3194_v9 }
 0xf9f   :  { %v3195_v30 = vmul.f32 %v4177_v6, %v3183_v58  ;;  %v3175_v32 = vadd.f32 1e-05, %v3169_v27 }
 0xfa1   :  { %5144 = vrsqrt.f32 %v3175_v32  ;;  %v6771_v16 = vadd.f32 %v4178_v44, %v3195_v30 }
 0xfa2   :  { %v5139_v22 = vpop.eup %5138 }
 0xfa3   :  { %v3184_v42 = vmul.f32 %v5139_v22, %v6722_v29  ;;  %v3212_v23 = vpack.c.bf16 %v6771_v16, %v6769_v52 }
 0xfa5   :  { %4196 = vmatmul.mubr.msk.bf16.vlgmr.msra.gmra.mxu0 %vm135_vm1, %v3212_v23  ;;  %v3196_v57 = vmul.f32 %v4177_v6, %v3184_v42 }
 0xfa6   :  { %v5141_v10 = vpop.eup %5140  ;;  %3328 = vmatprep.mubr.bf16.mxu0 %v5185_v14 }
 0xfa7   :  { %v3185_v54 = vmul.f32 %v5141_v10, %v6726_v19  ;;  %v6780_v13 = vadd.f32 %v4178_v44, %v3196_v57 }
 0xfa9   :  { %v3197_v53 = vmul.f32 %v4177_v6, %v3185_v54 }
 0xfaa   :  { %v5143_v21 = vpop.eup %5142 }
 0xfab   :  { %v3186_v46 = vmul.f32 %v5143_v21, %v6731_v2  ;;  %v6782_v47 = vadd.f32 %v4178_v44, %v3197_v53 }
 0xfad   :  { %v3213_v29 = vpack.c.bf16 %v6782_v47, %v6780_v13  ;;  %v3198_v36 = vmul.f32 %v4177_v6, %v3186_v46 }
 0xfae   :  { %v5145_v17 = vpop.eup %5144 }
 0xfaf   :  { %v3187_v45 = vmul.f32 %v5145_v17, %v6736_v15  ;;  %4197 = vmatmul.mubr.msk.bf16.gmra.mxu0 %vm135_vm1, %v3213_v29  ;;  %v6789_v56 = vadd.f32 %v4178_v44, %v3198_v36  ;;  %v4866_v15 = vld [vmem:[%s7034_s3 + $0xf8] sm:$0xff]  }
 0xfb0   :  { %3338 = vmatprep.mubr.bf16.mxu0 %v5185_v14  ;;  %4432 = vmatprep.subr.bf16.mxu1 %v4866_v15 }
 0xfb1   :  { %v3199_v19 = vmul.f32 %v4177_v6, %v3187_v45  ;;  %4433 = vmatpush3.bf16.msra.mxu1 %v4867_v20 }
 0xfb2   :  { %4434 = vmatprep.subr.bf16.mxu1 %v4868_v59 }
 0xfb3   :  { %v6791_v28 = vadd.f32 %v4178_v44, %v3199_v19 }
 0xfb5   :  { %v3214_v2 = vpack.c.bf16 %v6791_v28, %v6789_v56  ;;  %4435 = vmatpush3.bf16.msra.mxu1 %v4869_v41 }
 0xfb6   :  { %4436 = vmatprep.subr.bf16.mxu1 %v4870_v61 }
 0xfb7   :  { %4198 = vmatmul.mubr.msk.bf16.gmra.mxu0 %vm135_vm1, %v3214_v2 }
 0xfb8   :  { %4776 = vmatprep.mubr.msk.bf16.mxu0 %vm5183_vm0, %v5182_v0 }
 0xfb9   :  { %4437 = vmatpush3.bf16.msra.mxu1 %v4871_v7 }
 0xfba   :  { %4438 = vmatprep.subr.bf16.mxu1 %v4872_v5 }
 0xfbd   :  { %4439 = vmatpush3.bf16.msra.mxu1 %v4873_v39 }
 0xfbe   :  { %4440 = vmatprep.subr.bf16.mxu1 %v4874_v43 }
 0xfc1   :  { %4441 = vmatpush3.bf16.msra.mxu1 %v4875_v60 }
 0xfc2   :  { %4442 = vmatprep.subr.bf16.mxu1 %v4876_v63 }
 0xfc5   :  { %4443 = vmatpush3.bf16.msra.mxu1 %v4877_v55 }
 0xfc6   :  { %4444 = vmatprep.subr.bf16.mxu1 %v4878_v50 }
 0xfc9   :  { %4445 = vmatpush3.bf16.msra.mxu1 %v4879_v12 }
 0xfca   :  { %4446 = vmatprep.subr.bf16.mxu1 %v4880_v38 }
 0xfcd   :  { %4447 = vmatpush3.bf16.msra.mxu1 %v4881_v25 }
0x1065   :  { %v3320_v1 = vpop.f32.mrf.mxu0 }
0x1066   :  { %v6856_v37 = vadd.f32 %v3320_v1, %v6850_v18 }
0x1067   :  { %v3322_v40 = vpop.f32.mrf.mxu0 }
0x1068   :  { %v3361_v11 = vmul.f32 0.044715, %v6856_v37  ;;  %v6860_v62 = vadd.f32 %v3322_v40, %v6853_v3 }
0x1069   :  { %v3324_v26 = vpop.f32.mrf.mxu0 }
0x106a   :  { %v3373_v24 = vmul.f32 %v3361_v11, %v6856_v37  ;;  %v3362_v6 = vmul.f32 0.044715, %v6860_v62  ;;  %v6865_v35 = vadd.f32 %v3324_v26, %v6850_v18 }
0x106b   :  { %v3326_v34 = vpop.f32.mrf.mxu0 }
0x106c   :  { %v3385_v4 = vmul.f32 %v3373_v24, %v6856_v37  ;;  %v3374_v9 = vmul.f32 %v3362_v6, %v6860_v62  ;;  %v3363_v58 = vmul.f32 0.044715, %v6865_v35  ;;  %v6871_v27 = vadd.f32 %v3326_v34, %v6853_v3 }
0x106e   :  { %v3397_v44 = vadd.f32 %v3385_v4, %v6856_v37  ;;  %v3386_v30 = vmul.f32 %v3374_v9, %v6860_v62  ;;  %v3375_v32 = vmul.f32 %v3363_v58, %v6865_v35  ;;  %v3364_v22 = vmul.f32 0.044715, %v6871_v27 }
0x106f   :  { %v3330_v42 = vpop.f32.mrf.mxu0 }
0x1070   :  { %v3409_v23 = vmul.f32 0.7978846, %v3397_v44  ;;  %v3387_v10 = vmul.f32 %v3375_v32, %v6865_v35  ;;  %v6879_v54 = vadd.f32 %v3330_v42, %v6850_v18  ;;  %v3398_v57 = vadd.f32 %v3386_v30, %v6860_v62 }
0x1071   :  { %v3376_v53 = vmul.f32 %v3364_v22, %v6871_v27  ;;  %v3332_v21 = vpop.f32.mrf.mxu0 }
0x1072   :  { %v3399_v46 = vadd.f32 %v3387_v10, %v6865_v35  ;;  %v3365_v29 = vmul.f32 0.044715, %v6879_v54  ;;  %v6886_v17 = vadd.f32 %v3332_v21, %v6853_v3  ;;  %5146 = vtanh.f32 %v3409_v23 }
0x1073   :  { %v3388_v45 = vmul.f32 %v3376_v53, %v6871_v27  ;;  %v3334_v36 = vpop.f32.mrf.mxu0  ;;  %v3410_v19 = vmul.f32 0.7978846, %v3398_v57 }
0x1074   :  { %v3411_v2 = vmul.f32 0.7978846, %v3399_v46  ;;  %v3377_v15 = vmul.f32 %v3365_v29, %v6879_v54  ;;  %v3366_v20 = vmul.f32 0.044715, %v6886_v17  ;;  %v6892_v59 = vadd.f32 %v3334_v36, %v6850_v18 }
0x1075   :  { %v3336_v41 = vpop.f32.mrf.mxu0  ;;  %v3400_v61 = vadd.f32 %v3388_v45, %v6871_v27  ;;  %5148 = vtanh.f32 %v3410_v19 }
0x1076   :  { %5150 = vtanh.f32 %v3411_v2  ;;  %v3389_v7 = vmul.f32 %v3377_v15, %v6879_v54  ;;  %v3378_v5 = vmul.f32 %v3366_v20, %v6886_v17  ;;  %v3367_v39 = vmul.f32 0.044715, %v6892_v59 }
0x1077   :  { %v6899_v43 = vadd.f32 %v3336_v41, %v6853_v3  ;;  %v3340_v60 = vpop.f32.mrf.mxu0  ;;  %v3412_v63 = vmul.f32 0.7978846, %v3400_v61 }
0x1078   :  { %v3401_v55 = vadd.f32 %v3389_v7, %v6879_v54  ;;  %v3390_v50 = vmul.f32 %v3378_v5, %v6886_v17  ;;  %v3379_v12 = vmul.f32 %v3367_v39, %v6892_v59  ;;  %v6905_v38 = vadd.f32 %v3340_v60, %v6850_v18 }
0x1079   :  { %v3368_v25 = vmul.f32 0.044715, %v6899_v43  ;;  %v3342_v8 = vpop.f32.mrf.mxu0  ;;  %5152 = vtanh.f32 %v3412_v63 }
0x107a   :  { %v3413_v1 = vmul.f32 0.7978846, %v3401_v55  ;;  %v3391_v40 = vmul.f32 %v3379_v12, %v6892_v59  ;;  %v3369_v11 = vmul.f32 0.044715, %v6905_v38  ;;  %v6911_v26 = vadd.f32 %v3342_v8, %v6853_v3 }
0x107b   :  { %v3380_v24 = vmul.f32 %v3368_v25, %v6899_v43  ;;  %v3344_v6 = vpop.f32.mrf.mxu0  ;;  %v3402_v34 = vadd.f32 %v3390_v50, %v6886_v17  ;;  %v3351_v12 = vmul.f32 0.5, %v6865_v35  ;;  %v3350_v25 = vmul.f32 0.5, %v6860_v62 }
0x107c   :  { %v3403_v4 = vadd.f32 %v3391_v40, %v6892_v59  ;;  %v3381_v9 = vmul.f32 %v3369_v11, %v6905_v38  ;;  %v3370_v58 = vmul.f32 0.044715, %v6911_v26  ;;  %5154 = vtanh.f32 %v3413_v1 }
0x107d   :  { %v3392_v44 = vmul.f32 %v3380_v24, %v6899_v43  ;;  %v6920_v30 = vadd.f32 %v3344_v6, %v6850_v18  ;;  %v3346_v32 = vpop.f32.mrf.mxu0  ;;  %v3414_v22 = vmul.f32 0.7978846, %v3402_v34  ;;  %v3352_v8 = vmul.f32 0.5, %v6871_v27 }
0x107e   :  { %v3415_v42 = vmul.f32 0.7978846, %v3403_v4  ;;  %v3393_v23 = vmul.f32 %v3381_v9, %v6905_v38  ;;  %v3382_v10 = vmul.f32 %v3370_v58, %v6911_v26  ;;  %v6925_v57 = vadd.f32 %v3346_v32, %v6853_v3 }
0x107f   :  { %v3371_v53 = vmul.f32 0.044715, %v6920_v30  ;;  %v3404_v21 = vadd.f32 %v3392_v44, %v6899_v43  ;;  %5156 = vtanh.f32 %v3414_v22  ;;  %v5147_v46 = vpop.eup %5146  ;;  %v3349_v24 = vmul.f32 0.5, %v6856_v37 }
0x1080   :  { %5158 = vtanh.f32 %v3415_v42  ;;  %v3405_v18 = vadd.f32 %v3393_v23, %v6905_v38  ;;  %v3394_v29 = vmul.f32 %v3382_v10, %v6911_v26  ;;  %v3372_v36 = vmul.f32 0.044715, %v6925_v57 }
0x1081   :  { %v3383_v45 = vmul.f32 %v3371_v53, %v6920_v30  ;;  %v3416_v19 = vmul.f32 0.7978846, %v3404_v21  ;;  %v3433_v50 = vadd.f32 1.0, %v5147_v46  ;;  %v3355_v37 = vmul.f32 0.5, %v6892_v59 }
0x1082   :  { %v5149_v2 = vpop.eup %5148  ;;  %v3406_v3 = vadd.f32 %v3394_v29, %v6911_v26  ;;  %v3384_v41 = vmul.f32 %v3372_v36, %v6925_v57  ;;  %v3417_v7 = vmul.f32 0.7978846, %v3405_v18  ;;  %v3354_v53 = vmul.f32 0.5, %v6886_v17 }
0x1083   :  { %v5151_v15 = vpop.eup %5150  ;;  %v3395_v20 = vmul.f32 %v3383_v45, %v6920_v30  ;;  %5160 = vtanh.f32 %v3416_v19  ;;  %v3434_v63 = vadd.f32 1.0, %v5149_v2  ;;  %v3445_v44 = vmul.f32 %v3433_v50, %v3349_v24 }
0x1084   :  { %v3435_v61 = vadd.f32 1.0, %v5151_v15  ;;  %v3418_v5 = vmul.f32 0.7978846, %v3406_v3  ;;  %v3396_v60 = vmul.f32 %v3384_v41, %v6925_v57  ;;  %v3356_v21 = vmul.f32 0.5, %v6899_v43 }
0x1085   :  { %v3407_v39 = vadd.f32 %v3395_v20, %v6920_v30  ;;  %v3446_v34 = vmul.f32 %v3434_v63, %v3350_v25  ;;  %v3353_v18 = vmul.f32 0.5, %v6879_v54  ;;  %v3359_v17 = vmul.f32 0.5, %v6920_v30 }
0x1086   :  { %v5153_v55 = vpop.eup %5152  ;;  %v3408_v11 = vadd.f32 %v3396_v60, %v6925_v57  ;;  %5162 = vtanh.f32 %v3418_v5  ;;  %v3447_v6 = vmul.f32 %v3435_v61, %v3351_v12  ;;  %v3358_v5 = vmul.f32 0.5, %v6911_v26 }
0x1087   :  { %v3419_v1 = vmul.f32 0.7978846, %v3407_v39  ;;  %v3436_v40 = vadd.f32 1.0, %v5153_v55  ;;  %5164 = vtanh.f32 %v3417_v7  ;;  %v3360_v54 = vmul.f32 0.5, %v6925_v57 }
0x1088   :  { %v3420_v9 = vmul.f32 0.7978846, %v3408_v11  ;;  %v3457_v32 = vpack.c.bf16 %v3447_v6, %v3445_v44  ;;  %v3357_v60 = vmul.f32 0.5, %v6905_v38 }
0x1089   :  { %5166 = vtanh.f32 %v3419_v1  ;;  %v3448_v4 = vmul.f32 %v3436_v40, %v3352_v8  ;;  %v5155_v58 = vpop.eup %5154 }
0x108a   :  { %5168 = vtanh.f32 %v3420_v9  ;;  %v3437_v10 = vadd.f32 1.0, %v5155_v58  ;;  %v4232_v58 = vld [vmem:[%s7032_s4 + $0x10] ss:$0 sm:$0xff] }
0x108b   :  { %v3458_v35 = vpack.c.bf16 %v3448_v4, %v3446_v34 }
0x108c   :  { %v5157_v62 = vpop.eup %5156  ;;  %v3449_v2 = vmul.f32 %v3437_v10, %v3353_v18 }
0x108d   :  { %v5159_v27 = vpop.eup %5158  ;;  %3632 = vmatprep.mubr.bf16.mxu1 %v3458_v35  ;;  %v3438_v42 = vadd.f32 1.0, %v5157_v62 }
0x108e   :  { %3633 = vmatmul.mubr.bf16.vlgmr.msra.gmra.mxu1 %v3457_v32  ;;  %v3439_v22 = vadd.f32 1.0, %v5159_v27 }
0x108f   :  { %v3450_v45 = vmul.f32 %v3438_v42, %v3354_v53 }
0x1090   :  { %v5161_v23 = vpop.eup %5160  ;;  %v3451_v29 = vmul.f32 %v3439_v22, %v3355_v37 }
0x1091   :  { %v3440_v46 = vadd.f32 1.0, %v5161_v23 }
0x1092   :  { %v3459_v41 = vpack.c.bf16 %v3451_v29, %v3449_v2 }
0x1093   :  { %v3452_v36 = vmul.f32 %v3440_v46, %v3356_v21  ;;  %v5163_v19 = vpop.eup %5162 }
0x1094   :  { %v5165_v3 = vpop.eup %5164  ;;  %v3442_v61 = vadd.f32 1.0, %v5163_v19 }
0x1095   :  { %v3460_v15 = vpack.c.bf16 %v3452_v36, %v3450_v45  ;;  %v3441_v43 = vadd.f32 1.0, %v5165_v3 }
0x1096   :  { %v5167_v20 = vpop.eup %5166  ;;  %v3454_v55 = vmul.f32 %v3442_v61, %v3358_v5 }
0x1097   :  { %3640 = vmatprep.mubr.bf16.mxu1 %v3460_v15  ;;  %v3443_v59 = vadd.f32 1.0, %v5167_v20  ;;  %v5169_v7 = vpop.eup %5168  ;;  %v3453_v12 = vmul.f32 %v3441_v43, %v3357_v60 }
0x1098   :  { %3641 = vmatmul.mubr.bf16.gmra.mxu1 %v3459_v41  ;;  %v3444_v39 = vadd.f32 1.0, %v5169_v7 }
0x1099   :  { %v3455_v63 = vmul.f32 %v3443_v59, %v3359_v17 }
0x109a   :  { %v3456_v50 = vmul.f32 %v3444_v39, %v3360_v54 }
0x109b   :  { %v3461_v8 = vpack.c.bf16 %v3455_v63, %v3453_v12 }
0x109c   :  { %v3462_v25 = vpack.c.bf16 %v3456_v50, %v3454_v55 }
0x109e   :  { %3648 = vmatprep.mubr.bf16.mxu1 %v3462_v25 }
0x10a0   :  { %3649 = vmatmul.mubr.bf16.gmra.mxu1 %v3461_v8 }
0x114e   :  { %v4448_v1 = vpop.f32.mrf.mxu1 }
0x1150   :  { %v4449_v40 = vpop.f32.mrf.mxu1 }
0x1151   :  { %v4450_v44 = vadd.f32 %v4449_v40, %v4448_v1 }
0x1152   :  { %v4451_v11 = vpop.f32.mrf.mxu1 }
0x1153   :  { %v3635_v37 = vadd.f32 %v4450_v44, %v4232_v58 }
0x1154   :  { %v4452_v30 = vpop.f32.mrf.mxu1 }
0x1155   :  { %v4453_v10 = vadd.f32 %v4452_v30, %v4451_v11  ;;  %v3657_v45 = vadd.f32 %v3635_v37, %v6769_v52 }
0x1157   :  { %v3638_v36 = vadd.f32 %v4453_v10, %v4232_v58  ;;  %v3667_v15 = vsel %vm135_vm1, %v3657_v45, 0.0 }
0x1158   :  { %v4454_v24 = vpop.f32.mrf.mxu1 }
0x115a   :  { %v4455_v6 = vpop.f32.mrf.mxu1 }
0x115b   :  { %v4456_v4 = vadd.f32 %v4455_v6, %v4454_v24 }
0x115c   :  { %v4457_v26 = vpop.f32.mrf.mxu1 }
0x115d   :  { %v3643_v62 = vadd.f32 %v4456_v4, %v4232_v58 }
0x115e   :  { %v4458_v34 = vpop.f32.mrf.mxu1 }
0x115f   :  { %v4459_v32 = vadd.f32 %v4458_v34, %v4457_v26  ;;  %v3659_v18 = vadd.f32 %v3643_v62, %v6780_v13  ;;  %v3658_v13 = vadd.f32 %v3638_v36, %v6771_v16 }
0x1160   :  { %v4460_v57 = vpop.f32.mrf.mxu1 }
0x1161   :  { %v3646_v53 = vadd.f32 %v4459_v32, %v4232_v58  ;;  %v3673_v2 = vsel %vm135_vm1, %v3659_v18, 0.0 }
0x1162   :  { %v4461_v9 = vpop.f32.mrf.mxu1 }
0x1163   :  { %v4462_v38 = vadd.f32 %v4461_v9, %v4460_v57 }
0x1164   :  { %v4463_v35 = vpop.f32.mrf.mxu1 }
0x1165   :  { %v3651_v27 = vadd.f32 %v4462_v38, %v4232_v58 }
0x1166   :  { %v4464_v22 = vpop.f32.mrf.mxu1 }
0x1167   :  { %v4465_v42 = vadd.f32 %v4464_v22, %v4463_v35  ;;  %v3661_v23 = vadd.f32 %v3651_v27, %v6789_v56  ;;  %v3660_v56 = vadd.f32 %v3646_v53, %v6782_v47 }
0x1169   :  { %v3654_v21 = vadd.f32 %v4465_v42, %v4232_v58  ;;  %v3679_v46 = vsel %vm135_vm1, %v3661_v23, 0.0  ;;  %v3676_v3 = vsel %vm135_vm1, %v3660_v56, 0.0 }
0x116a   :  { %3680 = vadd.xlane.f32.xlu0 %v3679_v46 }
0x116b   :  { %v3662_v29 = vadd.f32 %v3654_v21, %v6791_v28  ;;  %v3670_v28 = vsel %vm135_vm1, %v3658_v13, 0.0 }
0x116d   :  { %v3682_v19 = vsel %vm135_vm1, %v3662_v29, 0.0 }
0x116e   :  { %3683 = vadd.xlane.f32.xlu1 %v3682_v19  ;;  %3674 = vadd.xlane.f32.xlu0 %v3673_v2  ;;  %v4251_v19 = vld [vmem:[%s7032_s4 + $0x11] ss:$0 sm:$0xff] }
0x1172   :  { %3677 = vadd.xlane.f32.xlu1 %v3676_v3  ;;  %3668 = vadd.xlane.f32.xlu0 %v3667_v15 }
0x1176   :  { %3671 = vadd.xlane.f32.xlu1 %v3670_v28 }
0x11f3   :  { %v3681_v52 = vpop.xlane.xlu0 %3680 }
0x11f4   :  { %v3689_v20 = vmul.f32 0.015625, %v3681_v52 }
0x11f6   :  { %v3695_v41 = vsub.f32 %v3661_v23, %v3689_v20 }
0x11f7   :  { %v3684_v61 = vpop.xlane.xlu1 %3683  ;;  %v3675_v59 = vpop.xlane.xlu0 %3674 }
0x11f8   :  { %v3690_v7 = vmul.f32 0.015625, %v3684_v61  ;;  %v3687_v47 = vmul.f32 0.015625, %v3675_v59  ;;  %v3701_v17 = vmul.f32 %v3695_v41, %v3695_v41 }
0x11fa   :  { %v3696_v43 = vsub.f32 %v3662_v29, %v3690_v7  ;;  %v3693_v5 = vsub.f32 %v3659_v18, %v3687_v47  ;;  %v3715_v54 = vsel %vm135_vm1, %v3701_v17, 0.0  ;;  %v3770_v17 = vmul.u32 3, %v5507_v48 }
0x11fb   :  { %v3678_v39 = vpop.xlane.xlu1 %3677  ;;  %3716 = vadd.xlane.f32.xlu0 %v3715_v54  ;;  %v3669_v16 = vpop.xlane.xlu0 %3668 }
0x11fc   :  { %v3688_v60 = vmul.f32 0.015625, %v3678_v39  ;;  %v3685_v63 = vmul.f32 0.015625, %v3669_v16  ;;  %v3702_v55 = vmul.f32 %v3696_v43, %v3696_v43  ;;  %v3699_v50 = vmul.f32 %v3693_v5, %v3693_v5 }
0x11fd   :  { %v3769_v39 = vmul.u32 3, %v5492_v51  ;;  %vm3772_vm0 = vcmp.eq.s32.totalorder %v5361_v49, %v3770_v17 }
0x11fe   :  { %v3694_v12 = vsub.f32 %v3660_v56, %v3688_v60  ;;  %v3691_v25 = vsub.f32 %v3657_v45, %v3685_v63  ;;  %v3718_v8 = vsel %vm135_vm1, %v3702_v55, 0.0  ;;  %v3709_v1 = vsel %vm135_vm1, %v3699_v50, 0.0 }
0x11ff   :  { %3719 = vadd.xlane.f32.xlu1 %v3718_v8  ;;  %v3672_v40 = vpop.xlane.xlu1 %3671  ;;  %3710 = vadd.xlane.f32.xlu0 %v3709_v1  ;;  %vm3771_vm12 = vcmp.eq.s32.totalorder %v5361_v49, %v3769_v39  ;;  %v3774_v1 = vsel %vm3772_vm0, 1.0, %v5182_v0  ;;  %v4882_v49 = vld [vmem:[%s7033_s2 + $0xb0] ss:$8 sps:$4 sm:$0xff]  }
0x1200   :  { %v3686_v11 = vmul.f32 0.015625, %v3672_v40  ;;  %v3700_v30 = vmul.f32 %v3694_v12, %v3694_v12  ;;  %v3697_v24 = vmul.f32 %v3691_v25, %v3691_v25  ;;  %v3773_v51 = vsel %vm3771_vm12, 1.0, %v5182_v0  ;;  %v4884_v40 = vld [vmem:[%s7033_s2 + $0xb4] ss:$8 sps:$4 sm:$0xff]  }
0x1202   :  { %v3692_v6 = vsub.f32 %v3658_v13, %v3686_v11  ;;  %v3712_v26 = vsel %vm135_vm1, %v3700_v30, 0.0  ;;  %v3703_v34 = vsel %vm135_vm1, %v3697_v24, 0.0  ;;  %v4252_v13 = vld [vmem:[%s7032_s4 + $0x12] ss:$0 sm:$0xff]  ;;  %v3775_v30 = vpack.c.bf16 %v3774_v1, %v3773_v51  ;;  %v4887_v24 = vld [vmem:[%s7033_s2 + $0xa4] ss:$8 sps:$4 sm:$0xff]  }
0x1203   :  { %3713 = vadd.xlane.f32.xlu1 %v3712_v26  ;;  %3704 = vadd.xlane.f32.xlu0 %v3703_v34  ;;  %v4888_v26 = vld [vmem:[%s7033_s2 + $0x90] ss:$8 sps:$4 sm:$0xff]   ;;  %v4891_v34 = vld [vmem:[%s7033_s2 + $0x80] ss:$8 sps:$4 sm:$0xff]  }
0x1204   :  { %v3698_v57 = vmul.f32 %v3692_v6, %v3692_v6 }
0x1206   :  { %v3706_v4 = vsel %vm135_vm1, %v3698_v57, 0.0 }
0x1207   :  { %3707 = vadd.xlane.f32.xlu1 %v3706_v4 }
0x1284   :  { %v3717_v9 = vpop.xlane.xlu0 %3716 }
0x1285   :  { %v3725_v38 = vmul.f32 0.015625, %v3717_v9 }
0x1287   :  { %v3731_v58 = vadd.f32 1e-05, %v3725_v38 }
0x1288   :  { %v3720_v44 = vpop.xlane.xlu1 %3719  ;;  %v3711_v35 = vpop.xlane.xlu0 %3710 }
0x1289   :  { %5170 = vrsqrt.f32 %v3731_v58  ;;  %v3726_v62 = vmul.f32 0.015625, %v3720_v44  ;;  %v3723_v32 = vmul.f32 0.015625, %v3711_v35  ;;  %v4262_v44 = vld [vmem:[%s7035_s5 + $0x4] sm:$0x3] }
0x128a   :  { %v3839_v35 = vrot.slane %v4262_v44, %v6020_v33 }
0x128b   :  { %v3732_v27 = vadd.f32 1e-05, %v3726_v62  ;;  %v3729_v22 = vadd.f32 1e-05, %v3723_v32  ;;  %v3843_v62 = vrot.slane %v4262_v44, %v6026_v31 }
0x128c   :  { %v3714_v42 = vpop.xlane.xlu1 %3713  ;;  %v3705_v23 = vpop.xlane.xlu0 %3704 }
0x128d   :  { %5172 = vrsqrt.f32 %v3732_v27  ;;  %v3724_v37 = vmul.f32 0.015625, %v3714_v42  ;;  %v3721_v10 = vmul.f32 0.015625, %v3705_v23 }
0x128e   :  { %5174 = vrsqrt.f32 %v3729_v22 }
0x128f   :  { %v3730_v53 = vadd.f32 1e-05, %v3724_v37  ;;  %v3727_v21 = vadd.f32 1e-05, %v3721_v10 }
0x1290   :  { %v3708_v46 = vpop.xlane.xlu1 %3707 }
0x1291   :  { %5176 = vrsqrt.f32 %v3730_v53  ;;  %v3722_v18 = vmul.f32 0.015625, %v3708_v46 }
0x1292   :  { %5178 = vrsqrt.f32 %v3727_v21 }
0x1293   :  { %v3728_v29 = vadd.f32 1e-05, %v3722_v18 }
0x1295   :  { %5180 = vrsqrt.f32 %v3728_v29 }
0x1296   :  { %v5171_v45 = vpop.eup %5170 }
0x1297   :  { %v3743_v36 = vmul.f32 %v5171_v45, %v3695_v41 }
0x1299   :  { %v3755_v15 = vmul.f32 %v4251_v19, %v3743_v36 }
0x129a   :  { %v5173_v2 = vpop.eup %5172 }
0x129b   :  { %v5175_v56 = vpop.eup %5174  ;;  %v3744_v3 = vmul.f32 %v5173_v2, %v3696_v43  ;;  %v3767_v59 = vadd.f32 %v4252_v13, %v3755_v15 }
0x129c   :  { %v3741_v28 = vmul.f32 %v5175_v56, %v3693_v5 }
0x129d   :  { %v3756_v52 = vmul.f32 %v4251_v19, %v3744_v3 }
0x129e   :  { %v5177_v20 = vpop.eup %5176  ;;  %v3753_v41 = vmul.f32 %v4251_v19, %v3741_v28 }
0x129f   :  { %v5179_v61 = vpop.eup %5178  ;;  %v3768_v7 = vadd.f32 %v4252_v13, %v3756_v52  ;;  %v3742_v47 = vmul.f32 %v5177_v20, %v3694_v12 }
0x12a0   :  { %v3739_v54 = vmul.f32 %v5179_v61, %v3691_v25  ;;  %v3765_v63 = vadd.f32 %v4252_v13, %v3753_v41 }
0x12a1   :  { %v3778_v16 = vpack.c.bf16 %v3768_v7, %v3767_v59  ;;  %v3754_v43 = vmul.f32 %v4251_v19, %v3742_v47 }
0x12a2   :  { %v5181_v60 = vpop.eup %5180  ;;  %v3751_v5 = vmul.f32 %v4251_v19, %v3739_v54 }
0x12a3   :  { %4771 = vmatpush3.bf16.msra.mxu0 %v3778_v16  ;;  %v3766_v55 = vadd.f32 %v4252_v13, %v3754_v43  ;;  %v3740_v50 = vmul.f32 %v5181_v60, %v3692_v6  ;;  %v4890_v6 = vld [vmem:[%s7033_s2 + $0x94] ss:$8 sps:$4 sm:$0xff]  }
0x12a4   :  { %4772 = vmatprep.subr.bf16.mxu0 %v5182_v0  ;;  %v3763_v48 = vadd.f32 %v4252_v13, %v3751_v5 }
0x12a5   :  { %v3777_v12 = vpack.c.bf16 %v3766_v55, %v3765_v63  ;;  %v3752_v8 = vmul.f32 %v4251_v19, %v3740_v50 }
0x12a7   :  { %4773 = vmatpush3.bf16.msra.mxu0 %v3777_v12  ;;  %v3764_v25 = vadd.f32 %v4252_v13, %v3752_v8 }
0x12a8   :  { %4774 = vmatprep.subr.bf16.mxu0 %v5182_v0  ;;  %v4885_v0 = vld [vmem:[%s7033_s2 + $0xa0] ss:$8 sps:$4 sm:$0xff]  }
0x12a9   :  { %v3776_v11 = vpack.c.bf16 %v3764_v25, %v3763_v48 }
0x12ab   :  { %4775 = vmatpush3.bf16.msra.mxu0 %v3776_v11 }
0x12ac   :  { %3897 = vmatprep.subr.bf16.mxu0 %v4884_v40 }
0x12ae   :  { %4777 = vmatmul.mubr.msk.bf16.vlgmr.msra.gmra.mxu0 %vm721_vm7, %v3775_v30 }
0x12af   :  { %3898 = vmatpush1.bf16.msra.mxu0 %v4882_v49  ;;  %3921 = vmatprep.mubr.bf16.mxu0 %v5185_v14  ;;  %v4893_v14 = vld [vmem:[%s7033_s2 + $0x84] ss:$8 sps:$4 sm:$0xff]  }
0x12b0   :  { %3899 = vmatprep.subr.bf16.mxu0 %v4887_v24 }
0x12b3   :  { %3900 = vmatpush1.bf16.msra.mxu0 %v4885_v0 }
0x12b4   :  { %3901 = vmatprep.subr.bf16.mxu0 %v4890_v6 }
0x12b7   :  { %3902 = vmatpush1.bf16.msra.mxu0 %v4888_v26 }
0x12b8   :  { %3903 = vmatprep.subr.bf16.mxu0 %v4893_v14 }
0x12bb   :  { %3904 = vmatpush1.bf16.msra.mxu0 %v4891_v34 }
0x136e   :  { %v3816_v57 = vpop.f32.mrf.mxu0 }
0x1370   :  { %v4778_v4 = vpop.f32.mrf.mxu0 }
0x1372   :  { %v3819_v9 = vpop.f32.mrf.mxu0 }
0x1373   :  { %v3823_v38 = vpack.c.bf16 %v3819_v9, %v3816_v57 }
0x1374   :  { %v4779_v58 = vpop.f32.mrf.mxu0 }
0x1375   :  { %4271 = vmatmul.mubr.msk.bf16.vlgmr.msra.gmra.mxu0 %vm135_vm1, %v3823_v38 }
0x1435   :  { %v3923_v32 = vpop.f32.mrf.mxu0 }
0x1436   :  { %v3924_v27 = vadd.f32 %v3923_v32, %v3839_v35 }
0x1437   :  { %v3925_v22 = vpop.f32.mrf.mxu0 }
0x1438   :  { %3932 = vst [vmem:[%s7036_s6] sm:$0xff] %v3924_v27  ;;  %v3926_v42 = vadd.f32 %v3925_v22, %v3843_v62 }
0x1439   :  { %v3927_v23 = vpop.f32.mrf.mxu0 }
0x143a   :  { %3933 = vst [vmem:[%s7036_s6 + $0x8] sm:$0xff] %v3926_v42  ;;  %v3928_v37 = vadd.f32 %v3927_v23, %v3839_v35 }
0x143b   :  { %v3929_v10 = vpop.f32.mrf.mxu0 }
0x143c   :  { %3934 = vst [vmem:[%s7036_s6 + $0x10] sm:$0xff] %v3928_v37  ;;  %v3930_v33 = vadd.f32 %v3929_v10, %v3843_v62 }
0x143e   :  { %3935 = vst [vmem:[%s7036_s6 + $0x18] sm:$0xff] %v3930_v33 }

</bundles_post_ra>
